<compile_context>
chip_gen: v7x
topology: tpu7x:2x2x1
jax: 0.10.0
libtpu: 0.0.40
codegen_flags: <defaults>
</compile_context>

<pallas_src>
import jax
import jax.numpy as jnp
from jax.experimental import pallas as pl
from jax.experimental.pallas import tpu as pltpu

SEQ = 50
D_IN = 36
D_IN_PAD = 128          # lane-dense padding of the 36-wide input feature axis
D_HID = 512
D_OUT = 768


# ---------------------------------------------------------------------------
# Pallas kernel: fused 5-layer MLP (Linear+ReLU x4, Linear) on one row tile
# ---------------------------------------------------------------------------
def _mlp_kernel(x_ref,
                w0_ref, b0_ref,
                w1_ref, b1_ref,
                w2_ref, b2_ref,
                w3_ref, b3_ref,
                w4_ref, b4_ref,
                o_ref):
    # x tile: (TM, 128) bf16 (feature axis zero-padded 36 -> 128).
    x = x_ref[...]

    def hidden(h, w_ref, b_ref):
        # MXU matmul with f32 accumulation; bf16 epilogue (single cast, bf16
        # bias add, bf16 ReLU) halves VALU pressure vs f32 add+max+cast.
        acc = jnp.dot(h, w_ref[...], preferred_element_type=jnp.float32)
        return jnp.maximum(acc.astype(jnp.bfloat16) + b_ref[...], 0)

    # TODO(synk): layer 0 (and everything else) runs in bf16; for real IR
    # spectra with large dynamic range consider keeping layer 0 in f32.
    h = hidden(x, w0_ref, b0_ref)          # 128(=padded 36) -> 512
    h = hidden(h, w1_ref, b1_ref)          # 512 -> 512
    h = hidden(h, w2_ref, b2_ref)          # 512 -> 512
    h = hidden(h, w3_ref, b3_ref)          # 512 -> 512

    # final layer: 512 -> 768, no activation; f32 bias add, bf16 store
    out = jnp.dot(h, w4_ref[...], preferred_element_type=jnp.float32) + b4_ref[...]
    o_ref[...] = out.astype(o_ref.dtype)


# ---------------------------------------------------------------------------
# Batch-adaptive row-tile selection
# ---------------------------------------------------------------------------
def _pick_row_tile(m, max_tm=512, min_steps=2):
    """Pick the row tile TM for M rows.

    Prefer the largest multiple-of-8 tile that divides M exactly (no padded
    rows -> no wasted MXU work and no output slice copy in the wrapper) while
    keeping at least `min_steps` grid steps (software pipelining + megacore
    sharding on v7x).  Otherwise fall back to roughly 8 grid steps with
    minimal row padding, capped at `max_tm`.
    """
    best = 0
    for cand in range(8, min(max_tm, m // min_steps) + 1, 8):
        if m % cand == 0:
            best = cand
    if best >= 64 or (best > 0 and m <= 2048):
        return best
    # ~8 steps, rounded up to a sublane multiple, capped for VMEM headroom.
    return max(8, min(max_tm, pl.cdiv(pl.cdiv(m, 8), 8) * 8))


# ---------------------------------------------------------------------------
# Wrapper: padding, bf16 casts, grid / BlockSpecs
# ---------------------------------------------------------------------------
def ir_projection_pallas(ir_spectra_input, params, *, max_tm=512):
    """Pallas implementation of MolecularGenerator.ir_projection.

    ir_spectra_input: (B, 1800) or (B, 50, 36) float32
    params: dict with w0..w4 stored as (d_in, d_out) and b0..b4 as (1, d_out)
    returns: (B, 50, 768) bfloat16 embedding
    """
    B = ir_spectra_input.shape[0]
    M = B * SEQ
    tm = _pick_row_tile(M, max_tm)
    m_pad = pl.cdiv(M, tm) * tm

    # Flatten to (M, 36); zero-pad rows to m_pad (usually m_pad == M thanks to
    # the tile picker) and the 36-wide feature axis to 128 lanes so every DMA
    # and MXU pass is lane-dense.  bf16 activations/weights, f32 accumulation.
    x = ir_spectra_input.reshape(M, D_IN).astype(jnp.float32)
    x = jnp.pad(x, ((0, m_pad - M), (0, D_IN_PAD - D_IN))).astype(jnp.bfloat16)

    w0 = jnp.pad(params["w0"], ((0, D_IN_PAD - D_IN), (0, 0))).astype(jnp.bfloat16)
    w1 = params["w1"].astype(jnp.bfloat16)
    w2 = params["w2"].astype(jnp.bfloat16)
    w3 = params["w3"].astype(jnp.bfloat16)
    w4 = params["w4"].astype(jnp.bfloat16)
    # hidden-layer biases in bf16 (bf16 epilogue); final bias stays f32.
    b0, b1, b2, b3 = (params[f"b{i}"].astype(jnp.bfloat16) for i in range(4))
    b4 = params["b4"].astype(jnp.float32)

    def resident(arr):
        # Full-array block with a constant index map: stays VMEM-resident
        # across all grid steps (block index never changes -> no re-DMA).
        return pl.BlockSpec(arr.shape, lambda i: (0, 0))

    flops = 2 * m_pad * (D_IN_PAD * D_HID + 3 * D_HID * D_HID + D_HID * D_OUT)
    bytes_accessed = (
        x.size * 2
        + sum(int(w.size) * 2 for w in (w0, w1, w2, w3, w4))
        + sum(int(b.size) * 2 for b in (b0, b1, b2, b3)) + int(b4.size) * 4
        + m_pad * D_OUT * 2
    )

    out = pl.pallas_call(
        _mlp_kernel,
        out_shape=jax.ShapeDtypeStruct((m_pad, D_OUT), jnp.bfloat16),
        grid_spec=pltpu.PrefetchScalarGridSpec(
            num_scalar_prefetch=0,
            grid=(m_pad // tm,),
            in_specs=[
                pl.BlockSpec((tm, D_IN_PAD), lambda i: (i, 0)),   # x row tile
                resident(w0), resident(b0),
                resident(w1), resident(b1),
                resident(w2), resident(b2),
                resident(w3), resident(b3),
                resident(w4), resident(b4),
            ],
            out_specs=pl.BlockSpec((tm, D_OUT), lambda i: (i, 0)),
        ),
        compiler_params=pltpu.CompilerParams(
            dimension_semantics=("parallel",),      # shard row tiles across TCs (v7x)
            vmem_limit_bytes=32 << 20,              # valid on v5e/v6e/v7x
        ),
        cost_estimate=pl.CostEstimate(
            flops=flops, transcendentals=0, bytes_accessed=bytes_accessed),
    )(x, w0, b0, w1, b1, w2, b2, w3, b3, w4, b4)

    # When m_pad == M (the common case with the adaptive tile) the slice is a
    # no-op and the reshape is free metadata.
    return out[:M].reshape(B, SEQ, D_OUT)


# ---------------------------------------------------------------------------
# Pure-JAX references
# ---------------------------------------------------------------------------
def ir_projection_ref_f32(ir_spectra_input, params):
    B = ir_spectra_input.shape[0]
    x = ir_spectra_input.reshape(B * SEQ, D_IN).astype(jnp.float32)
    h = jnp.maximum(x @ params["w0"] + params["b0"], 0.0)
    h = jnp.maximum(h @ params["w1"] + params["b1"], 0.0)
    h = jnp.maximum(h @ params["w2"] + params["b2"], 0.0)
    h = jnp.maximum(h @ params["w3"] + params["b3"], 0.0)
    out = h @ params["w4"] + params["b4"]
    return out.reshape(B, SEQ, D_OUT)


def ir_projection_ref_bf16(ir_spectra_input, params):
    """Same bf16-in / f32-accumulate / bf16-epilogue recipe as the kernel."""
    B = ir_spectra_input.shape[0]
    h = ir_spectra_input.reshape(B * SEQ, D_IN).astype(jnp.bfloat16)
    for i in range(4):
        w = params[f"w{i}"].astype(jnp.bfloat16)
        acc = jnp.dot(h, w, preferred_element_type=jnp.float32)
        h = jnp.maximum(acc.astype(jnp.bfloat16)
                        + params[f"b{i}"].astype(jnp.bfloat16), 0)
    w4 = params["w4"].astype(jnp.bfloat16)
    out = jnp.dot(h, w4, preferred_element_type=jnp.float32) + params["b4"]
    return out.astype(jnp.bfloat16).astype(jnp.float32).reshape(B, SEQ, D_OUT)


# ---------------------------------------------------------------------------
# Deterministic parameter init (shapes match MLP(36, 3, 512, 768)).
# The torch module zero-inits biases and zero-inits the final layer weight
# ('final'); here weights and biases are small random values so the checks
# are non-trivial (semantics of the forward pass are unchanged).
# ---------------------------------------------------------------------------
def make_params(key):
    dims = [(D_IN, D_HID), (D_HID, D_HID), (D_HID, D_HID), (D_HID, D_HID),
            (D_HID, D_OUT)]
    params = {}
    keys = jax.random.split(key, 2 * len(dims))
    for i, (d_in, d_out) in enumerate(dims):
        std = (1.0 / d_in) ** 0.5
        # weights stored as (d_in, d_out) == torch Linear weight transposed
        params[f"w{i}"] = jax.random.normal(keys[2 * i], (d_in, d_out),
                                            jnp.float32) * std
        params[f"b{i}"] = jax.random.normal(keys[2 * i + 1], (1, d_out),
                                            jnp.float32) * 0.02
    return params


if __name__ == "__main__":
    key = jax.random.PRNGKey(0)
    k_param, k_input = jax.random.split(key)

    params = make_params(k_param)

    # ir_spectra_input: (batch=2, 50*36=1800)
    B = 2
    ir_spectra_input = jax.random.normal(k_input, (B, SEQ * D_IN), jnp.float32)

    out = ir_projection_pallas(ir_spectra_input, params)
    out = jax.block_until_ready(out)
    assert out.shape == (B, SEQ, D_OUT), out.shape
    assert out.dtype == jnp.bfloat16, out.dtype
    out_f32 = out.astype(jnp.float32)

    # Tight check vs a reference that uses the same bf16/f32-accumulate math.
    ref_bf16 = ir_projection_ref_bf16(ir_spectra_input, params)
    assert jnp.allclose(out_f32, ref_bf16, atol=2e-2, rtol=2e-2), \
        "mismatch vs bf16 reference"

    # Loose check vs the full-f32 torch-equivalent math.
    ref_f32 = ir_projection_ref_f32(ir_spectra_input, params)
    assert jnp.allclose(out_f32, ref_f32, atol=1e-1, rtol=1e-1), \
        "mismatch vs f32 reference"

    print("KERNEL_OK")
</pallas_src>

<mosaic_0001>
module attributes {stable_mosaic.version = 11 : i64} {
  func.func @_mlp_kernel(%arg0: i32, %arg1: memref<16x128xbf16, #tpu.memory_space<vmem>>, %arg2: memref<128x512xbf16, #tpu.memory_space<vmem>>, %arg3: memref<1x512xbf16, #tpu.memory_space<vmem>>, %arg4: memref<512x512xbf16, #tpu.memory_space<vmem>>, %arg5: memref<1x512xbf16, #tpu.memory_space<vmem>>, %arg6: memref<512x512xbf16, #tpu.memory_space<vmem>>, %arg7: memref<1x512xbf16, #tpu.memory_space<vmem>>, %arg8: memref<512x512xbf16, #tpu.memory_space<vmem>>, %arg9: memref<1x512xbf16, #tpu.memory_space<vmem>>, %arg10: memref<512x768xbf16, #tpu.memory_space<vmem>>, %arg11: memref<1x768xf32, #tpu.memory_space<vmem>>, %arg12: memref<16x768xbf16, #tpu.memory_space<vmem>>) attributes {dimension_semantics = [#tpu.dimension_semantics<parallel>], iteration_bounds = array<i64: 7>, scalar_prefetch = 0 : i64, scratch_operands = 0 : i64, tpu.core_type = #tpu.core_type<tc>, window_params = [{transform_indices = @transform_0, window_bounds = array<i64: 16, 128>}, {pipeline_mode = #tpu.pipeline_mode<synchronous>, transform_indices = @transform_1, window_bounds = array<i64: 128, 512>}, {pipeline_mode = #tpu.pipeline_mode<synchronous>, transform_indices = @transform_2, window_bounds = array<i64: 1, 512>}, {pipeline_mode = #tpu.pipeline_mode<synchronous>, transform_indices = @transform_3, window_bounds = array<i64: 512, 512>}, {pipeline_mode = #tpu.pipeline_mode<synchronous>, transform_indices = @transform_4, window_bounds = array<i64: 1, 512>}, {pipeline_mode = #tpu.pipeline_mode<synchronous>, transform_indices = @transform_5, window_bounds = array<i64: 512, 512>}, {pipeline_mode = #tpu.pipeline_mode<synchronous>, transform_indices = @transform_6, window_bounds = array<i64: 1, 512>}, {pipeline_mode = #tpu.pipeline_mode<synchronous>, transform_indices = @transform_7, window_bounds = array<i64: 512, 512>}, {pipeline_mode = #tpu.pipeline_mode<synchronous>, transform_indices = @transform_8, window_bounds = array<i64: 1, 512>}, {pipeline_mode = #tpu.pipeline_mode<synchronous>, transform_indices = @transform_9, window_bounds = array<i64: 512, 768>}, {pipeline_mode = #tpu.pipeline_mode<synchronous>, transform_indices = @transform_10, window_bounds = array<i64: 1, 768>}, {transform_indices = @transform_11, window_bounds = array<i64: 16, 768>}]} {
    %c0 = arith.constant 0 : index
    %c0_0 = arith.constant 0 : index
    %0 = vector.load %arg1[%c0, %c0_0] : memref<16x128xbf16, #tpu.memory_space<vmem>>, vector<16x128xbf16>
    %c0_1 = arith.constant 0 : index
    %c0_2 = arith.constant 0 : index
    %1 = vector.load %arg2[%c0_1, %c0_2] : memref<128x512xbf16, #tpu.memory_space<vmem>>, vector<128x512xbf16>
    %cst = arith.constant dense<0.000000e+00> : vector<16x512xf32>
    %2 = tpu.matmul %0, %1, %cst {dimension_numbers = #tpu.dot_dimension_numbers<[1], [0], [0], [1], [0, 0, 1, 1], [], []>} : vector<16x128xbf16>, vector<128x512xbf16>, vector<16x512xf32> -> vector<16x512xf32>
    %3 = arith.truncf %2 : vector<16x512xf32> to vector<16x512xbf16>
    %c0_3 = arith.constant 0 : index
    %c0_4 = arith.constant 0 : index
    %4 = vector.load %arg3[%c0_3, %c0_4] : memref<1x512xbf16, #tpu.memory_space<vmem>>, vector<1x512xbf16>
    %5 = vector.broadcast %4 : vector<1x512xbf16> to vector<16x512xbf16>
    %6 = arith.addf %3, %5 : vector<16x512xbf16>
    %cst_5 = arith.constant 0.000000e+00 : bf16
    %7 = vector.broadcast %cst_5 : bf16 to vector<16x512xbf16>
    %8 = arith.maximumf %6, %7 : vector<16x512xbf16>
    %c0_6 = arith.constant 0 : index
    %c0_7 = arith.constant 0 : index
    %9 = vector.load %arg4[%c0_6, %c0_7] : memref<512x512xbf16, #tpu.memory_space<vmem>>, vector<512x512xbf16>
    %cst_8 = arith.constant dense<0.000000e+00> : vector<16x512xf32>
    %10 = tpu.matmul %8, %9, %cst_8 {dimension_numbers = #tpu.dot_dimension_numbers<[1], [0], [0], [1], [0, 0, 1, 1], [], []>} : vector<16x512xbf16>, vector<512x512xbf16>, vector<16x512xf32> -> vector<16x512xf32>
    %11 = arith.truncf %10 : vector<16x512xf32> to vector<16x512xbf16>
    %c0_9 = arith.constant 0 : index
    %c0_10 = arith.constant 0 : index
    %12 = vector.load %arg5[%c0_9, %c0_10] : memref<1x512xbf16, #tpu.memory_space<vmem>>, vector<1x512xbf16>
    %13 = vector.broadcast %12 : vector<1x512xbf16> to vector<16x512xbf16>
    %14 = arith.addf %11, %13 : vector<16x512xbf16>
    %cst_11 = arith.constant 0.000000e+00 : bf16
    %15 = vector.broadcast %cst_11 : bf16 to vector<16x512xbf16>
    %16 = arith.maximumf %14, %15 : vector<16x512xbf16>
    %c0_12 = arith.constant 0 : index
    %c0_13 = arith.constant 0 : index
    %17 = vector.load %arg6[%c0_12, %c0_13] : memref<512x512xbf16, #tpu.memory_space<vmem>>, vector<512x512xbf16>
    %cst_14 = arith.constant dense<0.000000e+00> : vector<16x512xf32>
    %18 = tpu.matmul %16, %17, %cst_14 {dimension_numbers = #tpu.dot_dimension_numbers<[1], [0], [0], [1], [0, 0, 1, 1], [], []>} : vector<16x512xbf16>, vector<512x512xbf16>, vector<16x512xf32> -> vector<16x512xf32>
    %19 = arith.truncf %18 : vector<16x512xf32> to vector<16x512xbf16>
    %c0_15 = arith.constant 0 : index
    %c0_16 = arith.constant 0 : index
    %20 = vector.load %arg7[%c0_15, %c0_16] : memref<1x512xbf16, #tpu.memory_space<vmem>>, vector<1x512xbf16>
    %21 = vector.broadcast %20 : vector<1x512xbf16> to vector<16x512xbf16>
    %22 = arith.addf %19, %21 : vector<16x512xbf16>
    %cst_17 = arith.constant 0.000000e+00 : bf16
    %23 = vector.broadcast %cst_17 : bf16 to vector<16x512xbf16>
    %24 = arith.maximumf %22, %23 : vector<16x512xbf16>
    %c0_18 = arith.constant 0 : index
    %c0_19 = arith.constant 0 : index
    %25 = vector.load %arg8[%c0_18, %c0_19] : memref<512x512xbf16, #tpu.memory_space<vmem>>, vector<512x512xbf16>
    %cst_20 = arith.constant dense<0.000000e+00> : vector<16x512xf32>
    %26 = tpu.matmul %24, %25, %cst_20 {dimension_numbers = #tpu.dot_dimension_numbers<[1], [0], [0], [1], [0, 0, 1, 1], [], []>} : vector<16x512xbf16>, vector<512x512xbf16>, vector<16x512xf32> -> vector<16x512xf32>
    %27 = arith.truncf %26 : vector<16x512xf32> to vector<16x512xbf16>
    %c0_21 = arith.constant 0 : index
    %c0_22 = arith.constant 0 : index
    %28 = vector.load %arg9[%c0_21, %c0_22] : memref<1x512xbf16, #tpu.memory_space<vmem>>, vector<1x512xbf16>
    %29 = vector.broadcast %28 : vector<1x512xbf16> to vector<16x512xbf16>
    %30 = arith.addf %27, %29 : vector<16x512xbf16>
    %cst_23 = arith.constant 0.000000e+00 : bf16
    %31 = vector.broadcast %cst_23 : bf16 to vector<16x512xbf16>
    %32 = arith.maximumf %30, %31 : vector<16x512xbf16>
    %c0_24 = arith.constant 0 : index
    %c0_25 = arith.constant 0 : index
    %33 = vector.load %arg10[%c0_24, %c0_25] : memref<512x768xbf16, #tpu.memory_space<vmem>>, vector<512x768xbf16>
    %cst_26 = arith.constant dense<0.000000e+00> : vector<16x768xf32>
    %34 = tpu.matmul %32, %33, %cst_26 {dimension_numbers = #tpu.dot_dimension_numbers<[1], [0], [0], [1], [0, 0, 1, 1], [], []>} : vector<16x512xbf16>, vector<512x768xbf16>, vector<16x768xf32> -> vector<16x768xf32>
    %c0_27 = arith.constant 0 : index
    %c0_28 = arith.constant 0 : index
    %35 = vector.load %arg11[%c0_27, %c0_28] : memref<1x768xf32, #tpu.memory_space<vmem>>, vector<1x768xf32>
    %36 = vector.broadcast %35 : vector<1x768xf32> to vector<16x768xf32>
    %37 = arith.addf %34, %36 : vector<16x768xf32>
    %38 = arith.truncf %37 : vector<16x768xf32> to vector<16x768xbf16>
    %c0_29 = arith.constant 0 : index
    %c0_30 = arith.constant 0 : index
    %39 = vector.load %arg12[%c0_29, %c0_30] : memref<16x768xbf16, #tpu.memory_space<vmem>>, vector<16x768xbf16>
    tpu.vector_store %arg12[%c0_29, %c0_30], %38 {strides = array<i32>} : memref<16x768xbf16, #tpu.memory_space<vmem>>, vector<16x768xbf16>,
    return
  }
  func.func @transform_0(%arg0: i32) -> (i32, i32) {
    %c0_i32 = arith.constant 0 : i32
    %c0_i32_0 = arith.constant 0 : i32
    return %arg0, %c0_i32 : i32, i32
  }
  func.func @transform_1(%arg0: i32) -> (i32, i32) {
    %c0_i32 = arith.constant 0 : i32
    %c0_i32_0 = arith.constant 0 : i32
    %c0_i32_1 = arith.constant 0 : i32
    return %c0_i32, %c0_i32_0 : i32, i32
  }
  func.func @transform_2(%arg0: i32) -> (i32, i32) {
    %c0_i32 = arith.constant 0 : i32
    %c0_i32_0 = arith.constant 0 : i32
    %c0_i32_1 = arith.constant 0 : i32
    return %c0_i32, %c0_i32_0 : i32, i32
  }
  func.func @transform_3(%arg0: i32) -> (i32, i32) {
    %c0_i32 = arith.constant 0 : i32
    %c0_i32_0 = arith.constant 0 : i32
    %c0_i32_1 = arith.constant 0 : i32
    return %c0_i32, %c0_i32_0 : i32, i32
  }
  func.func @transform_4(%arg0: i32) -> (i32, i32) {
    %c0_i32 = arith.constant 0 : i32
    %c0_i32_0 = arith.constant 0 : i32
    %c0_i32_1 = arith.constant 0 : i32
    return %c0_i32, %c0_i32_0 : i32, i32
  }
  func.func @transform_5(%arg0: i32) -> (i32, i32) {
    %c0_i32 = arith.constant 0 : i32
    %c0_i32_0 = arith.constant 0 : i32
    %c0_i32_1 = arith.constant 0 : i32
    return %c0_i32, %c0_i32_0 : i32, i32
  }
  func.func @transform_6(%arg0: i32) -> (i32, i32) {
    %c0_i32 = arith.constant 0 : i32
    %c0_i32_0 = arith.constant 0 : i32
    %c0_i32_1 = arith.constant 0 : i32
    return %c0_i32, %c0_i32_0 : i32, i32
  }
  func.func @transform_7(%arg0: i32) -> (i32, i32) {
    %c0_i32 = arith.constant 0 : i32
    %c0_i32_0 = arith.constant 0 : i32
    %c0_i32_1 = arith.constant 0 : i32
    return %c0_i32, %c0_i32_0 : i32, i32
  }
  func.func @transform_8(%arg0: i32) -> (i32, i32) {
    %c0_i32 = arith.constant 0 : i32
    %c0_i32_0 = arith.constant 0 : i32
    %c0_i32_1 = arith.constant 0 : i32
    return %c0_i32, %c0_i32_0 : i32, i32
  }
  func.func @transform_9(%arg0: i32) -> (i32, i32) {
    %c0_i32 = arith.constant 0 : i32
    %c0_i32_0 = arith.constant 0 : i32
    %c0_i32_1 = arith.constant 0 : i32
    return %c0_i32, %c0_i32_0 : i32, i32
  }
  func.func @transform_10(%arg0: i32) -> (i32, i32) {
    %c0_i32 = arith.constant 0 : i32
    %c0_i32_0 = arith.constant 0 : i32
    %c0_i32_1 = arith.constant 0 : i32
    return %c0_i32, %c0_i32_0 : i32, i32
  }
  func.func @transform_11(%arg0: i32) -> (i32, i32) {
    %c0_i32 = arith.constant 0 : i32
    %c0_i32_0 = arith.constant 0 : i32
    return %arg0, %c0_i32 : i32, i32
  }
}

</mosaic_0001>

<bundles_post_ra>
// kernel: tpu_custom_call.1
= control target key start
LH: loop header
LB: loop body
LE: loop exit
PB: predicated region body
PF: predicated region fallthrough
CT: control target
= control target key end

     0   :  { %s7977_s0 = inlined_call_operand.hbm [shape: bf16[112,128], index: 0, kind: input, shape index: {}]   ;;  %s7978_s1 = inlined_call_operand.hbm [shape: bf16[128,512], index: 1, kind: input, shape index: {}]   ;;  %s7979_s2 = inlined_call_operand.vmem [shape: bf16[1,512], index: 2, kind: input, shape index: {}]   ;;  %s7980_s3 = inlined_call_operand.hbm [shape: bf16[512,512], index: 3, kind: input, shape index: {}]   ;;  %s7981_s4 = inlined_call_operand.vmem [shape: bf16[1,512], index: 4, kind: input, shape index: {}]   ;;  %s7982_s5 = inlined_call_operand.hbm [shape: bf16[512,512], index: 5, kind: input, shape index: {}]   ;;  %s7983_s6 = inlined_call_operand.vmem [shape: bf16[1,512], index: 6, kind: input, shape index: {}]   ;;  %s7984_s7 = inlined_call_operand.hbm [shape: bf16[512,512], index: 7, kind: input, shape index: {}]   ;;  %s7985_s8 = inlined_call_operand.vmem [shape: bf16[1,512], index: 8, kind: input, shape index: {}]   ;;  %s7986_s9 = inlined_call_operand.hbm [shape: bf16[512,768], index: 9, kind: input, shape index: {}]   ;;  %s7987_s10 = inlined_call_operand.vmem [shape: f32[1,768], index: 10, kind: input, shape index: {}]   ;;  %s7988_s11 = inlined_call_operand.hbm [shape: bf16[112,768], index: 11, kind: output, shape index: {}]  }
   0x1   :  { %7993 = sst [smem:[#allocation19_spill]] %s7978_s1 }
   0x2   :  { %7994 = sst [smem:[#allocation20_spill]] %s7985_s8 }
   0x3   :  { %7995 = sst [smem:[#allocation21_spill]] %s7987_s10 }
   0x4   :  { %7996 = sst [smem:[#allocation22_spill]] %s7988_s11 }
   0x5   :  { %16 = vsyncpa [#allocation3], 0 }
   0x6   :  { %18 = vsyncpa [#allocation3 + $0x1], 0 }
   0x7   :  { %19 = vsyncpa [#allocation6], 0 }
   0x8   :  { %20 = vsyncpa [#allocation9], 0 }
   0x9   :  { %21 = vsyncpa [#allocation12], 0 }
   0xa   :  { %22 = vsyncpa [#allocation4], 0 }
   0xb   :  { %24 = vsyncpa [#allocation4 + $0x1], 0  ;;  %s7517_s17 = smov 0   ;;  %s7519_s18 = smov 0  }
   0xc   :  { %s7521_s19 = smov 0   ;;  %s7523_s20 = smov 0  }
   0xd LB: > { %s7440_s21 = smov [#allocation5]   ;;  %s7538_s23 = sadd.s32 4294967295, %s7438_s20   ;;  %s7438_s20 = sphi %s7523_s20, %s8021_s20   ;;  %s7434_s19 = sphi %s7521_s19, %s8020_s19   ;;  %s7430_s18 = sphi %s7519_s18, %s8019_s18   ;;  %s7426_s17 = sphi %s7517_s17, %s8018_s17  }
   0xe   : > { %s309_s22 = sshll.u32 %s7440_s21, 4  ;;  %p5472_p0 = scmp.ge.s32.totalorder %s7438_s20, 1  ;;  %s7543_s22 = int_to_ptr.vmem [resolvable:$true] %s309_s22 }
   0xf   : > { %p7990_p1 = scmp.eq.s32.totalorder %s7538_s23, 0  ;;  %p297_p2 = scmp.lt.s32.totalorder %s7438_s20, 8 }
  0x10   : > { %s7441_s25 = smov [#allocation8]   ;;  %s7442_s28 = smov [#allocation7]  }
  0x11   : > { %p7545_p3 = pnand %p5472_p0, %p297_p2  ;;  %s341_s26 = sshll.u32 %s7441_s25, 4  ;;  %s7557_s26 = int_to_ptr.vmem [resolvable:$true] %s341_s26 }
  0x12   : > { %s325_s29 = sshll.u32 %s7442_s28, 4  ;;  %s7999_s1 = sld [smem:[#allocation19_spill]]  ;;  %s7559_s29 = int_to_ptr.vmem [resolvable:$true] %s325_s29 }
  0x13   : > { %s7997_s24 = scalar_select %p7545_p3, 1, 0 }
  0x14   : > { %p6194_p4 = pneg %p7545_p3 }
  0x16   : > { %p7553_p5 = pnand %p6194_p4, %p7990_p1 }
  0x18   : > { %s7190_s13 = scalar_lea.hbm %s7999_s1, 4096  ;;  %p7569_p7 = pneg %p7553_p5 }
  0x19   : > { %p7191_p6 = scmp.ne.s32.totalorder %s7999_s1, %s7190_s13  ;;  %p7197_p10 = scmp.lt.u32.totalorder %s7190_s13, %s7999_s1 }
  0x1b   : > { %p7193_p8 = pnand %p7569_p7, %p7191_p6 }
  0x1d   : > { %p7194_p9 = pneg %p7193_p8 }
  0x1f   : > { %p7199_p11 = pnand %p7197_p10, %p7194_p9 }
  0x21   : > { %7202 = shalt.err (!%p7199_p11)
}
  0x22   : > { %s7203_s28 = scalar_lea.vmem %s7543_s22, 4096  ;;  %p7211_p2 = scmp.lt.s32.totalorder %s7543_s22, %s7543_s22 }
  0x23   : > { %p7204_p12 = scmp.ne.s32.totalorder %s7543_s22, %s7203_s28  ;;  %p7212_p4 = scmp.lt.s32.totalorder %s7203_s28, %s7203_s28 }
  0x25   : > { %p7206_p13 = pnand %p7204_p12, %p7569_p7  ;;  %p7213_p6 = por %p7212_p4, %p7211_p2 }
  0x27   : > { %p7207_p0 = pneg %p7206_p13 }
  0x29   : > { %p7214_p8 = pnand %p7213_p6, %p7207_p0 }
  0x2b   : > { %7217 = shalt.err (!%p7214_p8)
}
  0x2c   : > { %s7443_s30 = smov 256   ;;  %s7444_s12 = smov 16  }
  0x2d   : > { %6197 = dma.hbm_to_vmem [thread:$0]  (!%p7553_p5), %s7999_s1, 4096, %s7543_s22, [#allocation6], %s7443_s30, %s7443_s30, %s7444_s12  }
  0x2e   : > { %s7218_s25 = scalar_lea.hbm %s7982_s5, 16384 }
  0x2f   : > { %p7219_p9 = scmp.ne.s32.totalorder %s7982_s5, %s7218_s25  ;;  %p7225_p12 = scmp.lt.u32.totalorder %s7218_s25, %s7982_s5 }
  0x31   : > { %p7221_p10 = pnand %p7219_p9, %p7569_p7 }
  0x33   : > { %p7222_p11 = pneg %p7221_p10 }
  0x35   : > { %p7227_p13 = pnand %p7225_p12, %p7222_p11 }
  0x37   : > { %7230 = shalt.err (!%p7227_p13)
}
  0x38   : > { %s7231_s22 = scalar_lea.vmem %s7557_s26, 16384  ;;  %p7239_p6 = scmp.lt.s32.totalorder %s7557_s26, %s7557_s26 }
  0x39   : > { %p7232_p0 = scmp.ne.s32.totalorder %s7557_s26, %s7231_s22  ;;  %p7240_p8 = scmp.lt.s32.totalorder %s7231_s22, %s7231_s22 }
  0x3b   : > { %p7234_p2 = pnand %p7232_p0, %p7569_p7  ;;  %p7241_p9 = por %p7240_p8, %p7239_p6 }
  0x3d   : > { %p7235_p4 = pneg %p7234_p2 }
  0x3f   : > { %p7242_p10 = pnand %p7241_p9, %p7235_p4 }
  0x41   : > { %7245 = shalt.err (!%p7242_p10)
}
  0x42   : > { %6203 = dma.hbm_to_vmem [thread:$0]  (!%p7553_p5), %s7982_s5, 16384, %s7557_s26, [#allocation9], %s7443_s30, %s7443_s30, %s7444_s12  }
  0x43   : > { %s7246_s14 = scalar_lea.hbm %s7980_s3, 16384 }
  0x44   : > { %p7247_p11 = scmp.ne.s32.totalorder %s7980_s3, %s7246_s14  ;;  %p7253_p0 = scmp.lt.u32.totalorder %s7246_s14, %s7980_s3 }
  0x46   : > { %p7249_p12 = pnand %p7247_p11, %p7569_p7 }
  0x48   : > { %p7250_p13 = pneg %p7249_p12 }
  0x4a   : > { %p7255_p2 = pnand %p7253_p0, %p7250_p13 }
  0x4c   : > { %7258 = shalt.err (!%p7255_p2)
}
  0x4d   : > { %s7259_s26 = scalar_lea.vmem %s7559_s29, 16384  ;;  %p7267_p9 = scmp.lt.s32.totalorder %s7559_s29, %s7559_s29 }
  0x4e   : > { %p7260_p4 = scmp.ne.s32.totalorder %s7559_s29, %s7259_s26  ;;  %p7268_p10 = scmp.lt.s32.totalorder %s7259_s26, %s7259_s26 }
  0x50   : > { %p7262_p6 = pnand %p7260_p4, %p7569_p7  ;;  %p7269_p11 = por %p7268_p10, %p7267_p9 }
  0x52   : > { %p7263_p8 = pneg %p7262_p6 }
  0x54   : > { %p7270_p12 = pnand %p7269_p11, %p7263_p8 }
  0x56   : > { %7273 = shalt.err (!%p7270_p12)
}
  0x57   : > { %6200 = dma.hbm_to_vmem [thread:$0]  (!%p7553_p5), %s7980_s3, 16384, %s7559_s29, [#allocation6], %s7443_s30, %s7443_s30, %s7444_s12  }
  0x58   : > { %s7445_s10 = smov [#allocation10]   ;;  %s7446_s13 = smov [#allocation11]  }
  0x59   : > { %s357_s11 = sshll.u32 %s7445_s10, 4  ;;  %s373_s14 = sshll.u32 %s7446_s13, 4  ;;  %s358_s11 = int_to_ptr.vmem [resolvable:$true] %s357_s11  ;;  %s374_s14 = int_to_ptr.vmem [resolvable:$true] %s373_s14 }
  0x5a   : > { %s7274_s25 = scalar_lea.hbm %s7984_s7, 16384 }
  0x5b   : > { %p7275_p13 = scmp.ne.s32.totalorder %s7984_s7, %s7274_s25  ;;  %p7281_p4 = scmp.lt.u32.totalorder %s7274_s25, %s7984_s7 }
  0x5d   : > { %p7277_p0 = pnand %p7275_p13, %p7569_p7 }
  0x5f   : > { %p7278_p2 = pneg %p7277_p0 }
  0x61   : > { %p7283_p6 = pnand %p7281_p4, %p7278_p2 }
  0x63   : > { %7286 = shalt.err (!%p7283_p6)
}
  0x64   : > { %s7287_s29 = scalar_lea.vmem %s358_s11, 16384  ;;  %p7295_p11 = scmp.lt.s32.totalorder %s358_s11, %s358_s11 }
  0x65   : > { %p7288_p8 = scmp.ne.s32.totalorder %s358_s11, %s7287_s29  ;;  %p7296_p12 = scmp.lt.s32.totalorder %s7287_s29, %s7287_s29 }
  0x67   : > { %p7290_p9 = pnand %p7288_p8, %p7569_p7  ;;  %p7297_p1 = por %p7296_p12, %p7295_p11 }
  0x69   : > { %p7291_p10 = pneg %p7290_p9 }
  0x6b   : > { %p7298_p3 = pnand %p7297_p1, %p7291_p10 }
  0x6d   : > { %7301 = shalt.err (!%p7298_p3)
}
  0x6e   : > { %6206 = dma.hbm_to_vmem [thread:$0]  (!%p7553_p5), %s7984_s7, 16384, %s358_s11, [#allocation9], %s7443_s30, %s7443_s30, %s7444_s12  }
  0x6f   : > { %s7302_s15 = scalar_lea.hbm %s7986_s9, 24576 }
  0x70   : > { %p7303_p1 = scmp.ne.s32.totalorder %s7986_s9, %s7302_s15  ;;  %p7309_p0 = scmp.lt.u32.totalorder %s7302_s15, %s7986_s9 }
  0x72   : > { %p7305_p3 = pnand %p7303_p1, %p7569_p7 }
  0x74   : > { %p7306_p13 = pneg %p7305_p3 }
  0x76   : > { %p7311_p2 = pnand %p7309_p0, %p7306_p13 }
  0x78   : > { %7314 = shalt.err (!%p7311_p2)
}
  0x79   : > { %s7315_s22 = scalar_lea.vmem %s374_s14, 24576  ;;  %p7323_p9 = scmp.lt.s32.totalorder %s374_s14, %s374_s14 }
  0x7a   : > { %p7316_p4 = scmp.ne.s32.totalorder %s374_s14, %s7315_s22  ;;  %p7324_p10 = scmp.lt.s32.totalorder %s7315_s22, %s7315_s22 }
  0x7c   : > { %p7318_p6 = pnand %p7316_p4, %p7569_p7  ;;  %p7325_p11 = por %p7324_p10, %p7323_p9 }
  0x7e   : > { %p7319_p8 = pneg %p7318_p6 }
  0x80   : > { %p7326_p12 = pnand %p7325_p11, %p7319_p8 }
  0x82   : > { %7329 = shalt.err (!%p7326_p12)
}
  0x83   : > { %s7447_s30 = smov 384   ;;  %s7448_s16 = smov 24  }
  0x84   : > { %6209 = dma.hbm_to_vmem [thread:$0]  (!%p7553_p5), %s7986_s9, 24576, %s374_s14, [#allocation12], %s7447_s30, %s7447_s30, %s7448_s16  }
  0x85   : > { %s5471_s29 = sadd.s32 4294967294, %s7438_s20   ;;  %s7686_s1 = sadd.s32 1, %s7438_s20  }
  0x86   : > { %s37_s8 = sadd.s32 1, %s7434_s19  ;;  %s34_s10 = ssub.s32 %s7438_s20, %s7686_s1 }
  0x87   : > { %p44_p7 = scmp.ne.s32.totalorder %s7434_s19, %s7430_s18  ;;  %p35_p1 = scmp.eq.s32.totalorder %s34_s10, 0 }
  0x88   : > { %p45_p3 = scmp.eq.s32.totalorder %s7438_s20, 0  ;;  %p50_p13 = scmp.ne.s32.totalorder %s7430_s18, %s7426_s17 }
  0x89   : > { %p284_p0 = scmp.eq.s32.totalorder %s7538_s23, 6  ;;  %p8001_p4 = scmp.eq.s32.totalorder %s7538_s23, 0 }
  0x8a   : > { %s7698_s13 = scalar_select %p35_p1, %s7434_s19, %s37_s8  }
  0x8b   : > { %p46_p2 = por %p45_p3, %p44_p7  ;;  %p7702_p6 = por %p8001_p4, %p50_p13 }
  0x8c   : > { %p7706_p5 = por %p284_p0, %p44_p7  ;;  %p290_p8 = scmp.eq.s32.totalorder %s5471_s29, 6 }
  0x8d   : > { %p6223_p9 = scmp.lt.s32.totalorder %s7438_s20, 7  ;;  %s390_s15 = sand.u32 1, %s7434_s19  }
  0x8e   : > { %s8003_s14 = scalar_select %p7706_p5, 1, 0 }
  0x8f   : > { %p7712_p10 = por %p290_p8, %p50_p13  ;;  %s5479_s25 = sshll.u32 %s390_s15, 3 }
  0x90   : > { %s6113_s28 = sshll.u32 %s7438_s20, 7  ;;  %s394_s16 = scalar_lea.vmem [#allocation2], %s5479_s25 }
  0x91   : > { %s8004_s21 = scalar_select %p7712_p10, 1, 0 }
  0x92   : > { %s7720_s30 = scalar_lea.hbm %s7977_s0, %s6113_s28  ;;  %s401_s12 = sshll.u32 %s394_s16, 4  ;;  %s7726_s12 = int_to_ptr.vmem [resolvable:$true] %s401_s12 }
  0x93   : > { %p7722_p11 = pnand %p6223_p9, %p46_p2  ;;  %s7728_s29 = scalar_lea.sflag [#allocation3], %s390_s15 }
  0x94   : > { %s7330_s8 = scalar_lea.hbm %s7720_s30, 128  ;;  %s7335_s28 = scalar_lea.hbm %s7977_s0, 896 }
  0x95   : > { %p7331_p12 = scmp.ne.s32.totalorder %s7720_s30, %s7330_s8  ;;  %p7332_p7 = pneg %p7722_p11 }
  0x96   : > { %p7336_p13 = scmp.lt.u32.totalorder %s7720_s30, %s7977_s0  ;;  %p7337_p0 = scmp.lt.u32.totalorder %s7335_s28, %s7330_s8 }
  0x97   : > { %p7333_p1 = pnand %p7332_p7, %p7331_p12  ;;  %p7339_p4 = scmp.lt.u32.totalorder %s7330_s8, %s7720_s30 }
  0x98   : > { %p7338_p2 = por %p7337_p0, %p7336_p13 }
  0x99   : > { %p7334_p3 = pneg %p7333_p1 }
  0x9a   : > { %p7340_p8 = por %p7339_p4, %p7338_p2 }
  0x9c   : > { %p7341_p9 = pnand %p7340_p8, %p7334_p3 }
  0x9e   : > { %7344 = shalt.err (!%p7341_p9)
}
  0x9f   : > { %s7345_s15 = scalar_lea.vmem %s7726_s12, 128  ;;  %s7449_s16 = smov [#allocation2]  }
  0xa0   : > { %p7346_p12 = scmp.ne.s32.totalorder %s7726_s12, %s7345_s15  ;;  %s7350_s10 = sshll.u32 %s7449_s16, 4  ;;  %s7351_s10 = int_to_ptr.vmem [resolvable:$false] %s7350_s10 }
  0xa1   : > { %s7352_s25 = scalar_lea.vmem %s7351_s10, 256  ;;  %p7353_p5 = scmp.lt.s32.totalorder %s7726_s12, %s7351_s10 }
  0xa2   : > { %p7348_p1 = pnand %p7346_p12, %p7332_p7  ;;  %p7354_p13 = scmp.lt.s32.totalorder %s7352_s25, %s7345_s15 }
  0xa4   : > { %p7349_p10 = pneg %p7348_p1  ;;  %p7355_p0 = por %p7354_p13, %p7353_p5 }
  0xa6   : > { %p7356_p2 = pnand %p7355_p0, %p7349_p10 }
  0xa8   : > { %7359 = shalt.err (!%p7356_p2)
}
  0xa9   : > { %s7450_s8 = smov 64   ;;  %s7451_s28 = smov 4  }
  0xaa   : > { %6213 = dma.hbm_to_vmem [thread:$0]  (!%p7722_p11), %s7720_s30, 128, %s7726_s12, %s7728_s29, %s7450_s8, %s7450_s8, %s7451_s28  }
  0xab   : > { %p8006_p7 = scmp.ne.s32.totalorder %s7997_s24, 0 }
  0xac   : > { %s7759_s26 = sand.u32 (!%p8006_p7), 1, %s7430_s18  }
  0xad   : > { %413 = sbr.rel (%p8006_p7) target bundleno = 1731 (0x6c3), region = 64  ;;  %s5483_s22 = sshll.u32 (!%p8006_p7), %s7759_s26, 3 }
  0xae   : > { %s416_s15 = scalar_lea.sflag (!%p8006_p7), [#allocation3], %s7759_s26  ;;  %s7763_s16 = scalar_lea.vmem (!%p8006_p7), [#allocation2], %s5483_s22 }
  0xb4   : > { %7405 = dma.done.wait (%p7702_p6), %s416_s15, 128  }
  0xb5   : > { %7407 = vsyncadd (%p7702_p6), %s416_s15, 4294967168  ;;  %p8007_p5 = scmp.eq.s32.totalorder %s7538_s23, 0 }
  0xb7   : > { %7409 = dma.done.wait (%p8007_p5), [#allocation6], 20480   ;;  %p8008_p10 = pmov %p8007_p5 }
  0xb8   : > { %p8009_p11 = pmov %p8007_p5 }
  0xb9   : > { %7411 = vsyncadd (%p8008_p10), [#allocation6], 4294946816 }
  0xba   : > { %7413 = dma.done.wait (%p8009_p11), [#allocation9], 32768   ;;  %p8010_p3 = pmov %p8007_p5 }
  0xbc   : > { %7415 = vsyncadd (%p8010_p3), [#allocation9], 4294934528  ;;  %p8011_p4 = pmov %p8010_p3 }
  0xbd   : > { %p8012_p8 = pmov %p8010_p3 }
  0xbe   : > { %7417 = dma.done.wait (%p8011_p4), [#allocation12], 24576  }
  0xbf   : > { %7419 = vsyncadd (%p8012_p8), [#allocation12], 4294942720  ;;  %v7452_v0 = vmov 0   ;;  %v6277_v1 = vld [vmem:[#allocation5 + $0x4] ss:$16 sps:$4 sm:$0xff]   ;;  %s8013_s8 = sld [smem:[#allocation20_spill]] }
  0xc0   : > { %713 = vmatprep.mubr.bf16.mxu0 %v7452_v0  ;;  %756 = vmatprep.mubr.bf16.mxu1 %v7452_v0  ;;  %v6279_v2 = vld [vmem:[#allocation5 + $0xc] ss:$16 sps:$4 sm:$0xff]   ;;  %v6281_v3 = vld [vmem:[#allocation5] ss:$16 sps:$4 sm:$0xff]   ;;  %v6282_v4 = vld [vmem:[#allocation5 + $0x8] ss:$16 sps:$4 sm:$0xff]  }
  0xc1   : > { %681 = vmatprep.subr.bf16.mxu0 %v6277_v1  ;;  %724 = vmatprep.subr.bf16.mxu1 %v6279_v2  ;;  %v6283_v5 = vld [vmem:[#allocation5 + $0x24] ss:$16 sps:$4 sm:$0xff]   ;;  %v6285_v6 = vld [vmem:[#allocation5 + $0x2c] ss:$16 sps:$4 sm:$0xff]   ;;  %v6287_v7 = vld [vmem:[#allocation5 + $0x20] ss:$16 sps:$4 sm:$0xff]  }
  0xc2   : > { %682 = vmatpush1.bf16.msra.mxu0 %v6281_v3  ;;  %725 = vmatpush1.bf16.msra.mxu1 %v6282_v4  ;;  %v6288_v8 = vld [vmem:[#allocation5 + $0x28] ss:$16 sps:$4 sm:$0xff]   ;;  %v6289_v9 = vld [vmem:[#allocation5 + $0x44] ss:$16 sps:$4 sm:$0xff]   ;;  %v6291_v10 = vld [vmem:[#allocation5 + $0x4c] ss:$16 sps:$4 sm:$0xff]  }
  0xc3   : > { %683 = vmatprep.subr.bf16.mxu0 %v6283_v5  ;;  %726 = vmatprep.subr.bf16.mxu1 %v6285_v6  ;;  %v6293_v11 = vld [vmem:[#allocation5 + $0x40] ss:$16 sps:$4 sm:$0xff]   ;;  %v6294_v12 = vld [vmem:[#allocation5 + $0x48] ss:$16 sps:$4 sm:$0xff]   ;;  %v6295_v13 = vld [vmem:[#allocation5 + $0x64] ss:$16 sps:$4 sm:$0xff]  }
  0xc4   : > { %v6297_v14 = vld [vmem:[#allocation5 + $0x6c] ss:$16 sps:$4 sm:$0xff]   ;;  %v6299_v15 = vld [vmem:[#allocation5 + $0x60] ss:$16 sps:$4 sm:$0xff]   ;;  %v6300_v16 = vld [vmem:[#allocation5 + $0x68] ss:$16 sps:$4 sm:$0xff]  }
  0xc5   : > { %v6301_v17 = vld [vmem:[#allocation5 + $0x84] ss:$16 sps:$4 sm:$0xff]   ;;  %v6303_v18 = vld [vmem:[#allocation5 + $0x8c] ss:$16 sps:$4 sm:$0xff]   ;;  %v6305_v19 = vld [vmem:[#allocation5 + $0x80] ss:$16 sps:$4 sm:$0xff]  }
  0xc6   : > { %684 = vmatpush1.bf16.msra.mxu0 %v6287_v7  ;;  %727 = vmatpush1.bf16.msra.mxu1 %v6288_v8  ;;  %v6306_v20 = vld [vmem:[#allocation5 + $0x88] ss:$16 sps:$4 sm:$0xff]   ;;  %v6307_v21 = vld [vmem:[#allocation5 + $0xa4] ss:$16 sps:$4 sm:$0xff]   ;;  %v6309_v22 = vld [vmem:[#allocation5 + $0xac] ss:$16 sps:$4 sm:$0xff]  }
  0xc7   : > { %685 = vmatprep.subr.bf16.mxu0 %v6289_v9  ;;  %728 = vmatprep.subr.bf16.mxu1 %v6291_v10  ;;  %v6311_v23 = vld [vmem:[#allocation5 + $0xa0] ss:$16 sps:$4 sm:$0xff]   ;;  %v6312_v24 = vld [vmem:[#allocation5 + $0xa8] ss:$16 sps:$4 sm:$0xff]   ;;  %v6313_v25 = vld [vmem:[#allocation5 + $0xc4] ss:$16 sps:$4 sm:$0xff]  }
  0xc8   : > { %v6315_v26 = vld [vmem:[#allocation5 + $0xcc] ss:$16 sps:$4 sm:$0xff]   ;;  %v6317_v27 = vld [vmem:[#allocation5 + $0xc0] ss:$16 sps:$4 sm:$0xff]   ;;  %v6318_v28 = vld [vmem:[#allocation5 + $0xc8] ss:$16 sps:$4 sm:$0xff]  }
  0xc9   : > { %v6319_v29 = vld [vmem:[#allocation5 + $0xe4] ss:$16 sps:$4 sm:$0xff]   ;;  %v6321_v30 = vld [vmem:[#allocation5 + $0xec] ss:$16 sps:$4 sm:$0xff]   ;;  %v6323_v31 = vld [vmem:[#allocation5 + $0xe0] ss:$16 sps:$4 sm:$0xff]  }
  0xca   : > { %686 = vmatpush1.bf16.msra.mxu0 %v6293_v11  ;;  %729 = vmatpush1.bf16.msra.mxu1 %v6294_v12  ;;  %v6324_v32 = vld [vmem:[#allocation5 + $0xe8] ss:$16 sps:$4 sm:$0xff]   ;;  %v6328_v33 = vld [vmem:[#allocation7 + $0x4] ss:$16 sps:$4 sm:$0xff]   ;;  %v6326_v36 = vld [vmem:[#allocation7] ss:$16 sps:$4 sm:$0xff]  }
  0xcb   : > { %687 = vmatprep.subr.bf16.mxu0 %v6295_v13  ;;  %730 = vmatprep.subr.bf16.mxu1 %v6297_v14  ;;  %v6331_v34 = vld [vmem:[#allocation7 + $0x204] ss:$16 sps:$4 sm:$0xff]   ;;  %v6329_v37 = vld [vmem:[#allocation7 + $0x200] ss:$16 sps:$4 sm:$0xff]   ;;  %s8014_s15 = sld [smem:[#allocation21_spill]]  ;;  %s6169_s30 = smul.u32 768, %s7538_s23 }
  0xcc   : > { %v6325_v35 = vld [vmem:[%s7763_s16] sm:$0xff]   ;;  %s6168_s16 = smul.u32 48, %s7759_s26  ;;  %s8015_s29 = sld [smem:[#allocation22_spill]] }
  0xcd   : > { %v6334_v38 = vld [vmem:[#allocation7 + $0x24] ss:$16 sps:$4 sm:$0xff]   ;;  %v6332_v40 = vld [vmem:[#allocation7 + $0x20] ss:$16 sps:$4 sm:$0xff]   ;;  %s5336_s23 = scalar_lea.sflag [#allocation4], %s7759_s26  ;;  %p8016_p9 = scmp.ne.s32.totalorder %s8003_s14, 0 }
  0xce   : > { %688 = vmatpush1.bf16.msra.mxu0 %v6299_v15  ;;  %731 = vmatpush1.bf16.msra.mxu1 %v6300_v16  ;;  %v6337_v39 = vld [vmem:[#allocation7 + $0x224] ss:$16 sps:$4 sm:$0xff]   ;;  %v6335_v41 = vld [vmem:[#allocation7 + $0x220] ss:$16 sps:$4 sm:$0xff]   ;;  %s477_s24 = scalar_lea.vmem [#allocation13], %s6168_s16 }
  0xcf   : > { %689 = vmatprep.subr.bf16.mxu0 %v6301_v17  ;;  %732 = vmatprep.subr.bf16.mxu1 %v6303_v18  ;;  %v6340_v42 = vld [vmem:[#allocation7 + $0x44] ss:$16 sps:$4 sm:$0xff]   ;;  %v6338_v44 = vld [vmem:[#allocation7 + $0x40] ss:$16 sps:$4 sm:$0xff]   ;;  %s5350_s27 = sshll.u32 %s477_s24, 4  ;;  %s7929_s27 = int_to_ptr.vmem [resolvable:$true] %s5350_s27 }
  0xd0   : > { %v6343_v43 = vld [vmem:[#allocation7 + $0x244] ss:$16 sps:$4 sm:$0xff]   ;;  %v6341_v45 = vld [vmem:[#allocation7 + $0x240] ss:$16 sps:$4 sm:$0xff]   ;;  %s7360_s25 = scalar_lea.vmem %s7929_s27, 768 }
  0xd1   : > { %v6346_v46 = vld [vmem:[#allocation7 + $0x64] ss:$16 sps:$4 sm:$0xff]   ;;  %v6344_v48 = vld [vmem:[#allocation7 + $0x60] ss:$16 sps:$4 sm:$0xff]   ;;  %p7361_p6 = scmp.ne.s32.totalorder %s7929_s27, %s7360_s25 }
  0xd2   : > { %690 = vmatpush1.bf16.msra.mxu0 %v6305_v19  ;;  %733 = vmatpush1.bf16.msra.mxu1 %v6306_v20  ;;  %v6349_v47 = vld [vmem:[#allocation7 + $0x264] ss:$16 sps:$4 sm:$0xff]   ;;  %v6347_v49 = vld [vmem:[#allocation7 + $0x260] ss:$16 sps:$4 sm:$0xff]   ;;  %s7934_s10 = scalar_lea.hbm %s8015_s29, %s6169_s30 }
  0xd3   : > { %691 = vmatprep.subr.bf16.mxu0 %v6307_v21  ;;  %734 = vmatprep.subr.bf16.mxu1 %v6309_v22  ;;  %v6352_v50 = vld [vmem:[#allocation7 + $0x84] ss:$16 sps:$4 sm:$0xff]   ;;  %v6350_v52 = vld [vmem:[#allocation7 + $0x80] ss:$16 sps:$4 sm:$0xff]   ;;  %p7362_p12 = pnand %p7361_p6, %p8016_p9 }
  0xd4   : > { %v6355_v51 = vld [vmem:[#allocation7 + $0x284] ss:$16 sps:$4 sm:$0xff]   ;;  %v6353_v53 = vld [vmem:[#allocation7 + $0x280] ss:$16 sps:$4 sm:$0xff]  }
  0xd5   : > { %v6358_v54 = vld [vmem:[#allocation7 + $0xa4] ss:$16 sps:$4 sm:$0xff]   ;;  %v6356_v56 = vld [vmem:[#allocation7 + $0xa0] ss:$16 sps:$4 sm:$0xff]   ;;  %p7363_p1 = pneg %p7362_p12 }
  0xd6   : > { %692 = vmatpush1.bf16.msra.mxu0 %v6311_v23  ;;  %735 = vmatpush1.bf16.msra.mxu1 %v6312_v24  ;;  %v6361_v55 = vld [vmem:[#allocation7 + $0x2a4] ss:$16 sps:$4 sm:$0xff]   ;;  %v6359_v57 = vld [vmem:[#allocation7 + $0x2a0] ss:$16 sps:$4 sm:$0xff]  }
  0xd7   : > { %693 = vmatprep.subr.bf16.mxu0 %v6313_v25  ;;  %736 = vmatprep.subr.bf16.mxu1 %v6315_v26  ;;  %v6364_v58 = vld [vmem:[#allocation7 + $0xc4] ss:$16 sps:$4 sm:$0xff]   ;;  %v6362_v60 = vld [vmem:[#allocation7 + $0xc0] ss:$16 sps:$4 sm:$0xff]  }
  0xd8   : > { %v6367_v59 = vld [vmem:[#allocation7 + $0x2c4] ss:$16 sps:$4 sm:$0xff]   ;;  %v6365_v61 = vld [vmem:[#allocation7 + $0x2c0] ss:$16 sps:$4 sm:$0xff]  }
  0xd9   : > { %v6370_v62 = vld [vmem:[#allocation7 + $0xe4] ss:$16 sps:$4 sm:$0xff]   ;;  %v6368_v1 = vld [vmem:[#allocation7 + $0xe0] ss:$16 sps:$4 sm:$0xff]  }
  0xda   : > { %694 = vmatpush1.bf16.msra.mxu0 %v6317_v27  ;;  %737 = vmatpush1.bf16.msra.mxu1 %v6318_v28  ;;  %v6373_v63 = vld [vmem:[#allocation7 + $0x2e4] ss:$16 sps:$4 sm:$0xff]   ;;  %v6371_v2 = vld [vmem:[#allocation7 + $0x2e0] ss:$16 sps:$4 sm:$0xff]  }
  0xdb   : > { %695 = vmatprep.subr.bf16.mxu0 %v6319_v29  ;;  %738 = vmatprep.subr.bf16.mxu1 %v6321_v30  ;;  %v6376_v3 = vld [vmem:[#allocation7 + $0x104] ss:$16 sps:$4 sm:$0xff]   ;;  %v6374_v5 = vld [vmem:[#allocation7 + $0x100] ss:$16 sps:$4 sm:$0xff]  }
  0xdc   : > { %v6379_v4 = vld [vmem:[#allocation7 + $0x304] ss:$16 sps:$4 sm:$0xff]   ;;  %v6377_v6 = vld [vmem:[#allocation7 + $0x300] ss:$16 sps:$4 sm:$0xff]  }
  0xdd   : > { %v6382_v7 = vld [vmem:[#allocation7 + $0x124] ss:$16 sps:$4 sm:$0xff]   ;;  %v6380_v9 = vld [vmem:[#allocation7 + $0x120] ss:$16 sps:$4 sm:$0xff]  }
  0xde   : > { %696 = vmatpush1.bf16.msra.mxu0 %v6323_v31  ;;  %739 = vmatpush1.bf16.msra.mxu1 %v6324_v32  ;;  %v6385_v8 = vld [vmem:[#allocation7 + $0x324] ss:$16 sps:$4 sm:$0xff]   ;;  %v6383_v10 = vld [vmem:[#allocation7 + $0x320] ss:$16 sps:$4 sm:$0xff]  }
  0xdf   : > { %1601 = vmatprep.subr.bf16.mxu1 %v6328_v33  ;;  %1644 = vmatprep.subr.bf16.mxu0 %v6331_v34  ;;  %v6388_v11 = vld [vmem:[#allocation7 + $0x144] ss:$16 sps:$4 sm:$0xff]   ;;  %v6386_v13 = vld [vmem:[#allocation7 + $0x140] ss:$16 sps:$4 sm:$0xff]  }
  0xe0   : > { %v6391_v12 = vld [vmem:[#allocation7 + $0x344] ss:$16 sps:$4 sm:$0xff]   ;;  %v6389_v14 = vld [vmem:[#allocation7 + $0x340] ss:$16 sps:$4 sm:$0xff]  }
  0xe1   : > { %714 = vmatmul.mubr.bf16.vlgmr.msra.gmra.mrb[0].mxu0 %v6325_v35  ;;  %757 = vmatmul.mubr.bf16.vlgmr.msra.gmra.mrb[0].mxu1 %v6325_v35  ;;  %v6394_v15 = vld [vmem:[#allocation7 + $0x164] ss:$16 sps:$4 sm:$0xff]   ;;  %v6392_v17 = vld [vmem:[#allocation7 + $0x160] ss:$16 sps:$4 sm:$0xff]   ;;  %v6424_v35 = vld [vmem:[#allocation7 + $0xc] ss:$16 sps:$4 sm:$0xff]  }
  0xe2   : > { %1602 = vmatpush1.bf16.msra.mxu1 %v6326_v36  ;;  %1645 = vmatpush1.bf16.msra.mxu0 %v6329_v37  ;;  %v6397_v16 = vld [vmem:[#allocation7 + $0x364] ss:$16 sps:$4 sm:$0xff]   ;;  %v6395_v18 = vld [vmem:[#allocation7 + $0x360] ss:$16 sps:$4 sm:$0xff]   ;;  %v7453_v36 = vmov 1966171168  }
  0xe3   : > { %1603 = vmatprep.subr.bf16.mxu1 %v6334_v38  ;;  %1646 = vmatprep.subr.bf16.mxu0 %v6337_v39  ;;  %v6400_v19 = vld [vmem:[#allocation7 + $0x184] ss:$16 sps:$4 sm:$0xff]   ;;  %v6398_v21 = vld [vmem:[#allocation7 + $0x180] ss:$16 sps:$4 sm:$0xff]   ;;  %v782_v37 = vunpack.c.l.s4 %v7453_v36  ;;  %v784_v38 = vlaneseq  ;;  %v6442_v36 = vld [vmem:[#allocation7 + $0xcc] ss:$16 sps:$4 sm:$0xff]  }
  0xe4   : > { %v6403_v20 = vld [vmem:[#allocation7 + $0x384] ss:$16 sps:$4 sm:$0xff]   ;;  %v6401_v22 = vld [vmem:[#allocation7 + $0x380] ss:$16 sps:$4 sm:$0xff]  }
  0xe5   : > { %v6406_v23 = vld [vmem:[#allocation7 + $0x1a4] ss:$16 sps:$4 sm:$0xff]   ;;  %v6404_v25 = vld [vmem:[#allocation7 + $0x1a0] ss:$16 sps:$4 sm:$0xff]  }
  0xe6   : > { %1604 = vmatpush1.bf16.msra.mxu1 %v6332_v40  ;;  %1647 = vmatpush1.bf16.msra.mxu0 %v6335_v41  ;;  %v6409_v24 = vld [vmem:[#allocation7 + $0x3a4] ss:$16 sps:$4 sm:$0xff]   ;;  %v6407_v26 = vld [vmem:[#allocation7 + $0x3a0] ss:$16 sps:$4 sm:$0xff]   ;;  %v783_v40 = vunpack.c.0.s8 %v782_v37  ;;  %v7787_v41 = vshrl.u32 %v784_v38, 7 }
  0xe7   : > { %1605 = vmatprep.subr.bf16.mxu1 %v6340_v42  ;;  %1648 = vmatprep.subr.bf16.mxu0 %v6343_v43  ;;  %v6412_v27 = vld [vmem:[#allocation7 + $0x1c4] ss:$16 sps:$4 sm:$0xff]   ;;  %v6410_v28 = vld [vmem:[#allocation7 + $0x1c0] ss:$16 sps:$4 sm:$0xff]   ;;  %v6440_v38 = vld [vmem:[#allocation7 + $0xc8] ss:$16 sps:$4 sm:$0xff]  }
  0xe8   : > { %v6415_v29 = vld [vmem:[#allocation7 + $0x3c4] ss:$16 sps:$4 sm:$0xff]   ;;  %v6413_v30 = vld [vmem:[#allocation7 + $0x3c0] ss:$16 sps:$4 sm:$0xff]   ;;  %v7790_v42 = vsub.s32 %v783_v40, %v7787_v41  ;;  %v6445_v40 = vld [vmem:[#allocation7 + $0xec] ss:$16 sps:$4 sm:$0xff]  }
  0xe9   : > { %v6418_v31 = vld [vmem:[#allocation7 + $0x1e4] ss:$16 sps:$4 sm:$0xff]   ;;  %v6416_v32 = vld [vmem:[#allocation7 + $0x1e0] ss:$16 sps:$4 sm:$0xff]  }
  0xea   : > { %1606 = vmatpush1.bf16.msra.mxu1 %v6338_v44  ;;  %1649 = vmatpush1.bf16.msra.mxu0 %v6341_v45  ;;  %v6421_v33 = vld [vmem:[#allocation7 + $0x3e4] ss:$16 sps:$4 sm:$0xff]   ;;  %v6419_v34 = vld [vmem:[#allocation7 + $0x3e0] ss:$16 sps:$4 sm:$0xff]  }
  0xeb   : > { %1607 = vmatprep.subr.bf16.mxu1 %v6346_v46  ;;  %1650 = vmatprep.subr.bf16.mxu0 %v6349_v47  ;;  %v5522_v39 = vld.sshfl [vmem:[%s7979_s2] sm:$0x33 pattern:$0x75316420] }
  0xec   : > { %v780_v43 = vcombine.high %v5522_v39, %v5522_v39  ;;  %v787_v44 = vrot.slane %v5522_v39, %v7790_v42  ;;  %v6548_v37 = vld [vmem:[#allocation8 + $0xa0] ss:$16 sps:$4 sm:$0xff]   ;;  %v6556_v39 = vld [vmem:[#allocation8 + $0xc4] ss:$16 sps:$4 sm:$0xff]  }
  0xee   : > { %1608 = vmatpush1.bf16.msra.mxu1 %v6344_v48  ;;  %1651 = vmatpush1.bf16.msra.mxu0 %v6347_v49  ;;  %v794_v45 = vrot.slane %v780_v43, %v7790_v42  ;;  %v795_v46 = vcombine.high %v787_v44, %v787_v44  ;;  %v798_v48 = vpack.i.b16 %v787_v44, %v787_v44  ;;  %v7795_v49 = vsub.s32 0, %v7787_v41  ;;  %v6554_v43 = vld [vmem:[#allocation8 + $0xc0] ss:$16 sps:$4 sm:$0xff]   ;;  %v6443_v44 = vld [vmem:[#allocation7 + $0xe8] ss:$16 sps:$4 sm:$0xff]  }
  0xef   : > { %1609 = vmatprep.subr.bf16.mxu1 %v6352_v50  ;;  %1652 = vmatprep.subr.bf16.mxu0 %v6355_v51 }
  0xf0   : > { %v796_v47 = vcombine.high %v794_v45, %v794_v45  ;;  %v812_v50 = vpack.i.b16 %v795_v46, %v795_v46  ;;  %v805_v51 = vpack.i.b16 %v794_v45, %v794_v45  ;;  %v6562_v45 = vld [vmem:[#allocation8 + $0xe4] ss:$16 sps:$4 sm:$0xff]   ;;  %v6448_v46 = vld [vmem:[#allocation7 + $0x10c] ss:$16 sps:$4 sm:$0xff]  }
  0xf2   : > { %1610 = vmatpush1.bf16.msra.mxu1 %v6350_v52  ;;  %1653 = vmatpush1.bf16.msra.mxu0 %v6353_v53  ;;  %v819_v52 = vpack.i.b16 %v796_v47, %v796_v47  ;;  %v6560_v47 = vld [vmem:[#allocation8 + $0xe0] ss:$16 sps:$4 sm:$0xff]  }
  0xf3   : > { %1611 = vmatprep.subr.bf16.mxu1 %v6358_v54  ;;  %1654 = vmatprep.subr.bf16.mxu0 %v6361_v55 }
  0xf6   : > { %1612 = vmatpush1.bf16.msra.mxu1 %v6356_v56  ;;  %1655 = vmatpush1.bf16.msra.mxu0 %v6359_v57  ;;  %v803_v57 = vrot.slane %v798_v48, %v7795_v49  ;;  %v6446_v48 = vld [vmem:[#allocation7 + $0x108] ss:$16 sps:$4 sm:$0xff]  }
  0xf7   : > { %1613 = vmatprep.subr.bf16.mxu1 %v6364_v58  ;;  %1656 = vmatprep.subr.bf16.mxu0 %v6367_v59  ;;  %v817_v58 = vrot.slane %v812_v50, %v7795_v49  ;;  %v6568_v50 = vld [vmem:[#allocation8 + $0x104] ss:$16 sps:$4 sm:$0xff]  }
  0xfa   : > { %1614 = vmatpush1.bf16.msra.mxu1 %v6362_v60  ;;  %1657 = vmatpush1.bf16.msra.mxu0 %v6365_v61  ;;  %v810_v61 = vrot.slane %v805_v51, %v7795_v49  ;;  %v6451_v51 = vld [vmem:[#allocation7 + $0x12c] ss:$16 sps:$4 sm:$0xff]  }
  0xfb   : > { %1615 = vmatprep.subr.bf16.mxu1 %v6370_v62  ;;  %1658 = vmatprep.subr.bf16.mxu0 %v6373_v63  ;;  %v824_v62 = vrot.slane %v819_v52, %v7795_v49  ;;  %v6566_v52 = vld [vmem:[#allocation8 + $0x100] ss:$16 sps:$4 sm:$0xff]  }
  0xfe   : > { %1616 = vmatpush1.bf16.msra.mxu1 %v6368_v1  ;;  %1659 = vmatpush1.bf16.msra.mxu0 %v6371_v2 }
  0xff   : > { %1617 = vmatprep.subr.bf16.mxu1 %v6376_v3  ;;  %1660 = vmatprep.subr.bf16.mxu0 %v6379_v4 }
 0x102   : > { %1618 = vmatpush1.bf16.msra.mxu1 %v6374_v5  ;;  %1661 = vmatpush1.bf16.msra.mxu0 %v6377_v6 }
 0x103   : > { %1619 = vmatprep.subr.bf16.mxu1 %v6382_v7  ;;  %1662 = vmatprep.subr.bf16.mxu0 %v6385_v8 }
 0x106   : > { %1620 = vmatpush1.bf16.msra.mxu1 %v6380_v9  ;;  %1663 = vmatpush1.bf16.msra.mxu0 %v6383_v10  ;;  %v6422_v10 = vld [vmem:[#allocation7 + $0x8] ss:$16 sps:$4 sm:$0xff]  }
 0x107   : > { %1621 = vmatprep.subr.bf16.mxu1 %v6388_v11  ;;  %1664 = vmatprep.subr.bf16.mxu0 %v6391_v12  ;;  %v6427_v12 = vld [vmem:[#allocation7 + $0x2c] ss:$16 sps:$4 sm:$0xff]  }
 0x10a   : > { %1622 = vmatpush1.bf16.msra.mxu1 %v6386_v13  ;;  %1665 = vmatpush1.bf16.msra.mxu0 %v6389_v14 }
 0x10b   : > { %1623 = vmatprep.subr.bf16.mxu1 %v6394_v15  ;;  %1666 = vmatprep.subr.bf16.mxu0 %v6397_v16  ;;  %v6518_v16 = vld [vmem:[#allocation8] ss:$16 sps:$4 sm:$0xff]  }
 0x10e   : > { %1624 = vmatpush1.bf16.msra.mxu1 %v6392_v17  ;;  %1667 = vmatpush1.bf16.msra.mxu0 %v6395_v18  ;;  %v6520_v17 = vld [vmem:[#allocation8 + $0x4] ss:$16 sps:$4 sm:$0xff]   ;;  %v6425_v18 = vld [vmem:[#allocation7 + $0x28] ss:$16 sps:$4 sm:$0xff]  }
 0x10f   : > { %1625 = vmatprep.subr.bf16.mxu1 %v6400_v19  ;;  %1668 = vmatprep.subr.bf16.mxu0 %v6403_v20  ;;  %v6526_v19 = vld [vmem:[#allocation8 + $0x24] ss:$16 sps:$4 sm:$0xff]   ;;  %v6430_v20 = vld [vmem:[#allocation7 + $0x4c] ss:$16 sps:$4 sm:$0xff]  }
 0x112   : > { %1626 = vmatpush1.bf16.msra.mxu1 %v6398_v21  ;;  %1669 = vmatpush1.bf16.msra.mxu0 %v6401_v22  ;;  %v6524_v21 = vld [vmem:[#allocation8 + $0x20] ss:$16 sps:$4 sm:$0xff]   ;;  %v6428_v22 = vld [vmem:[#allocation7 + $0x48] ss:$16 sps:$4 sm:$0xff]  }
 0x113   : > { %1627 = vmatprep.subr.bf16.mxu1 %v6406_v23  ;;  %1670 = vmatprep.subr.bf16.mxu0 %v6409_v24  ;;  %v6532_v23 = vld [vmem:[#allocation8 + $0x44] ss:$16 sps:$4 sm:$0xff]   ;;  %v6433_v24 = vld [vmem:[#allocation7 + $0x6c] ss:$16 sps:$4 sm:$0xff]  }
 0x116   : > { %1628 = vmatpush1.bf16.msra.mxu1 %v6404_v25  ;;  %1671 = vmatpush1.bf16.msra.mxu0 %v6407_v26  ;;  %v6530_v25 = vld [vmem:[#allocation8 + $0x40] ss:$16 sps:$4 sm:$0xff]   ;;  %v6431_v26 = vld [vmem:[#allocation7 + $0x68] ss:$16 sps:$4 sm:$0xff]  }
 0x117   : > { %1629 = vmatprep.subr.bf16.mxu1 %v6412_v27  ;;  %1672 = vmatprep.subr.bf16.mxu0 %v6415_v29  ;;  %v6538_v27 = vld [vmem:[#allocation8 + $0x64] ss:$16 sps:$4 sm:$0xff]   ;;  %v6536_v29 = vld [vmem:[#allocation8 + $0x60] ss:$16 sps:$4 sm:$0xff]  }
 0x11a   : > { %1630 = vmatpush1.bf16.msra.mxu1 %v6410_v28  ;;  %1673 = vmatpush1.bf16.msra.mxu0 %v6413_v30  ;;  %v6436_v28 = vld [vmem:[#allocation7 + $0x8c] ss:$16 sps:$4 sm:$0xff]   ;;  %v6434_v30 = vld [vmem:[#allocation7 + $0x88] ss:$16 sps:$4 sm:$0xff]  }
 0x11b   : > { %1631 = vmatprep.subr.bf16.mxu1 %v6418_v31  ;;  %1674 = vmatprep.subr.bf16.mxu0 %v6421_v33  ;;  %v6544_v31 = vld [vmem:[#allocation8 + $0x84] ss:$16 sps:$4 sm:$0xff]   ;;  %v6542_v33 = vld [vmem:[#allocation8 + $0x80] ss:$16 sps:$4 sm:$0xff]  }
 0x11e   : > { %1632 = vmatpush1.bf16.msra.mxu1 %v6416_v32  ;;  %1675 = vmatpush1.bf16.msra.mxu0 %v6419_v34  ;;  %v6439_v32 = vld [vmem:[#allocation7 + $0xac] ss:$16 sps:$4 sm:$0xff]   ;;  %v6437_v34 = vld [vmem:[#allocation7 + $0xa8] ss:$16 sps:$4 sm:$0xff]  }
 0x11f   : > { %1687 = vmatprep.subr.bf16.mxu1 %v6424_v35  ;;  %2607 = vmatprep.subr.bf16.mxu0 %v6520_v17  ;;  %v6550_v35 = vld [vmem:[#allocation8 + $0xa4] ss:$16 sps:$4 sm:$0xff]   ;;  %v6473_v17 = vld [vmem:[#allocation7 + $0x228] ss:$16 sps:$4 sm:$0xff]  }
 0x1b4   : > { %v715_v53 = vpop.f32.mrb[0].mxu0  ;;  %v758_v54 = vpop.f32.mrb[0].mxu1 }
 0x1b5   : > { %v717_v55 = vpop.f32.mrb[1].mxu0  ;;  %v760_v56 = vpop.f32.mrb[1].mxu1 }
 0x1b6   : > { %v719_v59 = vpop.f32.mrb[2].mxu0  ;;  %v762_v60 = vpop.f32.mrb[2].mxu1 }
 0x1b7   : > { %v767_v63 = vpack.c.bf16 %v719_v59, %v715_v53  ;;  %v769_v1 = vpack.c.bf16 %v762_v60, %v758_v54  ;;  %v721_v2 = vpop.f32.mrb[3].mxu0  ;;  %v764_v3 = vpop.f32.mrb[3].mxu1  ;;  %v6449_v53 = vld [vmem:[#allocation7 + $0x128] ss:$16 sps:$4 sm:$0xff]   ;;  %v6574_v54 = vld [vmem:[#allocation8 + $0x124] ss:$16 sps:$4 sm:$0xff]  }
 0x1b8   : > { %v768_v4 = vpack.c.bf16 %v721_v2, %v717_v55  ;;  %v770_v5 = vpack.c.bf16 %v764_v3, %v760_v56  ;;  %v6454_v55 = vld [vmem:[#allocation7 + $0x14c] ss:$16 sps:$4 sm:$0xff]   ;;  %v6572_v56 = vld [vmem:[#allocation8 + $0x120] ss:$16 sps:$4 sm:$0xff]   ;;  %v6458_v2 = vld [vmem:[#allocation7 + $0x188] ss:$16 sps:$4 sm:$0xff]  }
 0x1b9   : > { %v825_v6 = vadd.bf16 %v803_v57, %v767_v63  ;;  %v827_v7 = vadd.bf16 %v817_v58, %v769_v1  ;;  %v6452_v57 = vld [vmem:[#allocation7 + $0x148] ss:$16 sps:$4 sm:$0xff]   ;;  %v6580_v58 = vld [vmem:[#allocation8 + $0x144] ss:$16 sps:$4 sm:$0xff]   ;;  %v6457_v59 = vld [vmem:[#allocation7 + $0x16c] ss:$16 sps:$4 sm:$0xff]  }
 0x1ba   : > { %v826_v8 = vadd.bf16 %v810_v61, %v768_v4  ;;  %v828_v9 = vadd.bf16 %v824_v62, %v770_v5  ;;  %v6578_v60 = vld [vmem:[#allocation8 + $0x140] ss:$16 sps:$4 sm:$0xff]   ;;  %v6455_v61 = vld [vmem:[#allocation7 + $0x168] ss:$16 sps:$4 sm:$0xff]   ;;  %v6586_v62 = vld [vmem:[#allocation8 + $0x164] ss:$16 sps:$4 sm:$0xff]  }
 0x1bb   : > { %v7802_v11 = vmax.bf16 %v7452_v0, %v827_v7  ;;  %v7809_v15 = vmax.bf16 %v7452_v0, %v825_v6  ;;  %v6460_v63 = vld [vmem:[#allocation7 + $0x18c] ss:$16 sps:$4 sm:$0xff]   ;;  %v6584_v1 = vld [vmem:[#allocation8 + $0x160] ss:$16 sps:$4 sm:$0xff]   ;;  %v6592_v3 = vld [vmem:[#allocation8 + $0x184] ss:$16 sps:$4 sm:$0xff]  }
 0x1bc   : > { %v830_v13 = vmax.bf16 %v7452_v0, %v826_v8  ;;  %v7806_v14 = vmax.bf16 %v7452_v0, %v828_v9  ;;  %v6463_v4 = vld [vmem:[#allocation7 + $0x1ac] ss:$16 sps:$4 sm:$0xff]   ;;  %v6590_v5 = vld [vmem:[#allocation8 + $0x180] ss:$16 sps:$4 sm:$0xff]   ;;  %v6461_v6 = vld [vmem:[#allocation7 + $0x1a8] ss:$16 sps:$4 sm:$0xff]  }
 0x1bd   : > { %v6466_v7 = vld [vmem:[#allocation7 + $0x1cc] ss:$16 sps:$4 sm:$0xff]   ;;  %v6464_v8 = vld [vmem:[#allocation7 + $0x1c8] ss:$16 sps:$4 sm:$0xff]  }
 0x1be   : > { %1633 = vmatprep.mubr.bf16.mxu1 %v830_v13  ;;  %1676 = vmatprep.mubr.bf16.mxu0 %v7806_v14  ;;  %v6469_v9 = vld [vmem:[#allocation7 + $0x1ec] ss:$16 sps:$4 sm:$0xff]  }
 0x1bf   : > { %1634 = vmatmul.mubr.bf16.vlgmr.msra.gmra.mrb[4].mxu1 %v7809_v15  ;;  %1677 = vmatmul.mubr.bf16.vlgmr.msra.gmra.mrb[4].mxu0 %v7802_v11 }
 0x1c0   : > { %1688 = vmatpush1.bf16.msra.mxu1 %v6422_v10  ;;  %1719 = vmatprep.mubr.bf16.mxu1 %v830_v13  ;;  %v6467_v10 = vld [vmem:[#allocation7 + $0x1e8] ss:$16 sps:$4 sm:$0xff]  }
 0x1c1   : > { %1689 = vmatprep.subr.bf16.mxu1 %v6427_v12  ;;  %2608 = vmatpush1.bf16.msra.mxu0 %v6518_v16  ;;  %v6472_v12 = vld [vmem:[#allocation7 + $0x20c] ss:$16 sps:$4 sm:$0xff]   ;;  %v6470_v13 = vld [vmem:[#allocation7 + $0x208] ss:$16 sps:$4 sm:$0xff]  }
 0x1c2   : > { %2609 = vmatprep.subr.bf16.mxu0 %v6526_v19  ;;  %v6475_v16 = vld [vmem:[#allocation7 + $0x22c] ss:$16 sps:$4 sm:$0xff]   ;;  %v6476_v19 = vld [vmem:[#allocation7 + $0x248] ss:$16 sps:$4 sm:$0xff]  }
 0x1c4   : > { %1690 = vmatpush1.bf16.msra.mxu1 %v6425_v18  ;;  %v6478_v18 = vld [vmem:[#allocation7 + $0x24c] ss:$16 sps:$4 sm:$0xff]  }
 0x1c5   : > { %1691 = vmatprep.subr.bf16.mxu1 %v6430_v20  ;;  %2610 = vmatpush1.bf16.msra.mxu0 %v6524_v21  ;;  %v6481_v20 = vld [vmem:[#allocation7 + $0x26c] ss:$16 sps:$4 sm:$0xff]   ;;  %v6479_v21 = vld [vmem:[#allocation7 + $0x268] ss:$16 sps:$4 sm:$0xff]  }
 0x1c6   : > { %2611 = vmatprep.subr.bf16.mxu0 %v6532_v23  ;;  %v6482_v23 = vld [vmem:[#allocation7 + $0x288] ss:$16 sps:$4 sm:$0xff]  }
 0x1c8   : > { %1692 = vmatpush1.bf16.msra.mxu1 %v6428_v22  ;;  %v6484_v22 = vld [vmem:[#allocation7 + $0x28c] ss:$16 sps:$4 sm:$0xff]  }
 0x1c9   : > { %1693 = vmatprep.subr.bf16.mxu1 %v6433_v24  ;;  %2612 = vmatpush1.bf16.msra.mxu0 %v6530_v25  ;;  %v6487_v24 = vld [vmem:[#allocation7 + $0x2ac] ss:$16 sps:$4 sm:$0xff]  }
 0x1ca   : > { %2613 = vmatprep.subr.bf16.mxu0 %v6538_v27  ;;  %v6490_v25 = vld [vmem:[#allocation7 + $0x2cc] ss:$16 sps:$4 sm:$0xff]   ;;  %v6488_v27 = vld [vmem:[#allocation7 + $0x2c8] ss:$16 sps:$4 sm:$0xff]  }
 0x1cc   : > { %1694 = vmatpush1.bf16.msra.mxu1 %v6431_v26  ;;  %v6596_v26 = vld [vmem:[#allocation8 + $0x1a0] ss:$16 sps:$4 sm:$0xff]  }
 0x1cd   : > { %1695 = vmatprep.subr.bf16.mxu1 %v6436_v28  ;;  %2614 = vmatpush1.bf16.msra.mxu0 %v6536_v29  ;;  %v6493_v28 = vld [vmem:[#allocation7 + $0x2ec] ss:$16 sps:$4 sm:$0xff]   ;;  %v6604_v29 = vld [vmem:[#allocation8 + $0x1c4] ss:$16 sps:$4 sm:$0xff]  }
 0x1ce   : > { %2615 = vmatprep.subr.bf16.mxu0 %v6544_v31  ;;  %v6491_v31 = vld [vmem:[#allocation7 + $0x2e8] ss:$16 sps:$4 sm:$0xff]  }
 0x1d0   : > { %1696 = vmatpush1.bf16.msra.mxu1 %v6434_v30  ;;  %v6602_v30 = vld [vmem:[#allocation8 + $0x1c0] ss:$16 sps:$4 sm:$0xff]  }
 0x1d1   : > { %1697 = vmatprep.subr.bf16.mxu1 %v6439_v32  ;;  %2616 = vmatpush1.bf16.msra.mxu0 %v6542_v33  ;;  %v6496_v32 = vld [vmem:[#allocation7 + $0x30c] ss:$16 sps:$4 sm:$0xff]   ;;  %v6610_v33 = vld [vmem:[#allocation8 + $0x1e4] ss:$16 sps:$4 sm:$0xff]  }
 0x1d2   : > { %2617 = vmatprep.subr.bf16.mxu0 %v6550_v35  ;;  %v6494_v35 = vld [vmem:[#allocation7 + $0x308] ss:$16 sps:$4 sm:$0xff]  }
 0x1d4   : > { %1698 = vmatpush1.bf16.msra.mxu1 %v6437_v34  ;;  %v6608_v34 = vld [vmem:[#allocation8 + $0x1e0] ss:$16 sps:$4 sm:$0xff]  }
 0x1d5   : > { %1699 = vmatprep.subr.bf16.mxu1 %v6442_v36  ;;  %2618 = vmatpush1.bf16.msra.mxu0 %v6548_v37  ;;  %v6499_v36 = vld [vmem:[#allocation7 + $0x32c] ss:$16 sps:$4 sm:$0xff]   ;;  %v6616_v37 = vld [vmem:[#allocation8 + $0x204] ss:$16 sps:$4 sm:$0xff]  }
 0x1d6   : > { %2619 = vmatprep.subr.bf16.mxu0 %v6556_v39  ;;  %v6502_v39 = vld [vmem:[#allocation7 + $0x34c] ss:$16 sps:$4 sm:$0xff]  }
 0x1d8   : > { %1700 = vmatpush1.bf16.msra.mxu1 %v6440_v38  ;;  %v6497_v38 = vld [vmem:[#allocation7 + $0x328] ss:$16 sps:$4 sm:$0xff]  }
 0x1d9   : > { %1701 = vmatprep.subr.bf16.mxu1 %v6445_v40  ;;  %2620 = vmatpush1.bf16.msra.mxu0 %v6554_v43  ;;  %v6500_v40 = vld [vmem:[#allocation7 + $0x348] ss:$16 sps:$4 sm:$0xff]   ;;  %v6505_v43 = vld [vmem:[#allocation7 + $0x36c] ss:$16 sps:$4 sm:$0xff]  }
 0x1da   : > { %2621 = vmatprep.subr.bf16.mxu0 %v6562_v45  ;;  %v6508_v45 = vld [vmem:[#allocation7 + $0x38c] ss:$16 sps:$4 sm:$0xff]  }
 0x1dc   : > { %1702 = vmatpush1.bf16.msra.mxu1 %v6443_v44  ;;  %v6503_v44 = vld [vmem:[#allocation7 + $0x368] ss:$16 sps:$4 sm:$0xff]  }
 0x1dd   : > { %1703 = vmatprep.subr.bf16.mxu1 %v6448_v46  ;;  %2622 = vmatpush1.bf16.msra.mxu0 %v6560_v47  ;;  %v6506_v46 = vld [vmem:[#allocation7 + $0x388] ss:$16 sps:$4 sm:$0xff]   ;;  %v6511_v47 = vld [vmem:[#allocation7 + $0x3ac] ss:$16 sps:$4 sm:$0xff]  }
 0x1de   : > { %2623 = vmatprep.subr.bf16.mxu0 %v6568_v50  ;;  %v6514_v50 = vld [vmem:[#allocation7 + $0x3cc] ss:$16 sps:$4 sm:$0xff]  }
 0x1e0   : > { %1704 = vmatpush1.bf16.msra.mxu1 %v6446_v48  ;;  %v6509_v48 = vld [vmem:[#allocation7 + $0x3a8] ss:$16 sps:$4 sm:$0xff]  }
 0x1e1   : > { %1705 = vmatprep.subr.bf16.mxu1 %v6451_v51  ;;  %2624 = vmatpush1.bf16.msra.mxu0 %v6566_v52  ;;  %v6512_v51 = vld [vmem:[#allocation7 + $0x3c8] ss:$16 sps:$4 sm:$0xff]   ;;  %v6517_v52 = vld [vmem:[#allocation7 + $0x3ec] ss:$16 sps:$4 sm:$0xff]  }
 0x1e2   : > { %2625 = vmatprep.subr.bf16.mxu0 %v6574_v54  ;;  %v6523_v54 = vld [vmem:[#allocation8 + $0xc] ss:$16 sps:$4 sm:$0xff]  }
 0x1e4   : > { %1706 = vmatpush1.bf16.msra.mxu1 %v6449_v53  ;;  %v6515_v53 = vld [vmem:[#allocation7 + $0x3e8] ss:$16 sps:$4 sm:$0xff]  }
 0x1e5   : > { %1707 = vmatprep.subr.bf16.mxu1 %v6454_v55  ;;  %2626 = vmatpush1.bf16.msra.mxu0 %v6572_v56  ;;  %v6521_v55 = vld [vmem:[#allocation8 + $0x8] ss:$16 sps:$4 sm:$0xff]   ;;  %v6529_v56 = vld [vmem:[#allocation8 + $0x2c] ss:$16 sps:$4 sm:$0xff]  }
 0x1e6   : > { %2627 = vmatprep.subr.bf16.mxu0 %v6580_v58  ;;  %v6535_v58 = vld [vmem:[#allocation8 + $0x4c] ss:$16 sps:$4 sm:$0xff]  }
 0x1e8   : > { %1708 = vmatpush1.bf16.msra.mxu1 %v6452_v57  ;;  %v6527_v57 = vld [vmem:[#allocation8 + $0x28] ss:$16 sps:$4 sm:$0xff]  }
 0x1e9   : > { %1709 = vmatprep.subr.bf16.mxu1 %v6457_v59  ;;  %2628 = vmatpush1.bf16.msra.mxu0 %v6578_v60  ;;  %v6533_v59 = vld [vmem:[#allocation8 + $0x48] ss:$16 sps:$4 sm:$0xff]   ;;  %v6541_v60 = vld [vmem:[#allocation8 + $0x6c] ss:$16 sps:$4 sm:$0xff]  }
 0x1ea   : > { %2629 = vmatprep.subr.bf16.mxu0 %v6586_v62  ;;  %v6547_v62 = vld [vmem:[#allocation8 + $0x8c] ss:$16 sps:$4 sm:$0xff]  }
 0x1ec   : > { %1710 = vmatpush1.bf16.msra.mxu1 %v6455_v61  ;;  %v6539_v61 = vld [vmem:[#allocation8 + $0x68] ss:$16 sps:$4 sm:$0xff]  }
 0x1ed   : > { %1711 = vmatprep.subr.bf16.mxu1 %v6460_v63  ;;  %2630 = vmatpush1.bf16.msra.mxu0 %v6584_v1  ;;  %v6545_v63 = vld [vmem:[#allocation8 + $0x88] ss:$16 sps:$4 sm:$0xff]   ;;  %v6553_v1 = vld [vmem:[#allocation8 + $0xac] ss:$16 sps:$4 sm:$0xff]  }
 0x1ee   : > { %2631 = vmatprep.subr.bf16.mxu0 %v6592_v3  ;;  %v6557_v3 = vld [vmem:[#allocation8 + $0xc8] ss:$16 sps:$4 sm:$0xff]  }
 0x1f0   : > { %1712 = vmatpush1.bf16.msra.mxu1 %v6458_v2  ;;  %v6551_v2 = vld [vmem:[#allocation8 + $0xa8] ss:$16 sps:$4 sm:$0xff]  }
 0x1f1   : > { %1713 = vmatprep.subr.bf16.mxu1 %v6463_v4  ;;  %2632 = vmatpush1.bf16.msra.mxu0 %v6590_v5  ;;  %v6565_v4 = vld [vmem:[#allocation8 + $0xec] ss:$16 sps:$4 sm:$0xff]   ;;  %v6563_v5 = vld [vmem:[#allocation8 + $0xe8] ss:$16 sps:$4 sm:$0xff]  }
 0x1f4   : > { %1714 = vmatpush1.bf16.msra.mxu1 %v6461_v6  ;;  %v6571_v6 = vld [vmem:[#allocation8 + $0x10c] ss:$16 sps:$4 sm:$0xff]  }
 0x1f5   : > { %1715 = vmatprep.subr.bf16.mxu1 %v6466_v7  ;;  %v6569_v7 = vld [vmem:[#allocation8 + $0x108] ss:$16 sps:$4 sm:$0xff]  }
 0x1f8   : > { %1716 = vmatpush1.bf16.msra.mxu1 %v6464_v8  ;;  %v6577_v8 = vld [vmem:[#allocation8 + $0x12c] ss:$16 sps:$4 sm:$0xff]  }
 0x1f9   : > { %1717 = vmatprep.subr.bf16.mxu1 %v6469_v9  ;;  %v6575_v9 = vld [vmem:[#allocation8 + $0x128] ss:$16 sps:$4 sm:$0xff]  }
 0x1fc   : > { %1718 = vmatpush1.bf16.msra.mxu1 %v6467_v10  ;;  %v6583_v10 = vld [vmem:[#allocation8 + $0x14c] ss:$16 sps:$4 sm:$0xff]  }
 0x1fd   : > { %1730 = vmatprep.subr.bf16.mxu1 %v6472_v12  ;;  %v6581_v12 = vld [vmem:[#allocation8 + $0x148] ss:$16 sps:$4 sm:$0xff]  }
 0x1ff   : > { %1720 = vmatmul.mubr.bf16.vlgmr.msra.gmra.mrb[8].mxu1 %v7809_v15  ;;  %v6485_v15 = vld [vmem:[#allocation7 + $0x2a8] ss:$16 sps:$4 sm:$0xff]  }
 0x200   : > { %1731 = vmatpush1.bf16.msra.mxu1 %v6470_v13  ;;  %1762 = vmatprep.mubr.bf16.mxu1 %v7806_v14  ;;  %v6598_v14 = vld [vmem:[#allocation8 + $0x1a4] ss:$16 sps:$4 sm:$0xff]   ;;  %v6589_v13 = vld [vmem:[#allocation8 + $0x16c] ss:$16 sps:$4 sm:$0xff]  }
 0x201   : > { %1732 = vmatprep.subr.bf16.mxu1 %v6475_v16  ;;  %2633 = vmatprep.subr.bf16.mxu0 %v6598_v14  ;;  %v6587_v16 = vld [vmem:[#allocation8 + $0x168] ss:$16 sps:$4 sm:$0xff]  }
 0x202   : > { %2634 = vmatpush1.bf16.msra.mxu0 %v6596_v26 }
 0x203   : > { %2635 = vmatprep.subr.bf16.mxu0 %v6604_v29 }
 0x204   : > { %1733 = vmatpush1.bf16.msra.mxu1 %v6473_v17  ;;  %v6595_v17 = vld [vmem:[#allocation8 + $0x18c] ss:$16 sps:$4 sm:$0xff]  }
 0x205   : > { %1734 = vmatprep.subr.bf16.mxu1 %v6478_v18  ;;  %v6593_v18 = vld [vmem:[#allocation8 + $0x188] ss:$16 sps:$4 sm:$0xff]  }
 0x206   : > { %2636 = vmatpush1.bf16.msra.mxu0 %v6602_v30 }
 0x207   : > { %2637 = vmatprep.subr.bf16.mxu0 %v6610_v33 }
 0x208   : > { %1735 = vmatpush1.bf16.msra.mxu1 %v6476_v19  ;;  %v6601_v19 = vld [vmem:[#allocation8 + $0x1ac] ss:$16 sps:$4 sm:$0xff]  }
 0x209   : > { %1736 = vmatprep.subr.bf16.mxu1 %v6481_v20  ;;  %v6599_v20 = vld [vmem:[#allocation8 + $0x1a8] ss:$16 sps:$4 sm:$0xff]  }
 0x20a   : > { %2638 = vmatpush1.bf16.msra.mxu0 %v6608_v34 }
 0x20b   : > { %2650 = vmatprep.subr.bf16.mxu0 %v6616_v37 }
 0x20c   : > { %1737 = vmatpush1.bf16.msra.mxu1 %v6479_v21  ;;  %v6607_v21 = vld [vmem:[#allocation8 + $0x1cc] ss:$16 sps:$4 sm:$0xff]  }
 0x20d   : > { %1738 = vmatprep.subr.bf16.mxu1 %v6484_v22  ;;  %v6605_v22 = vld [vmem:[#allocation8 + $0x1c8] ss:$16 sps:$4 sm:$0xff]  }
 0x210   : > { %1739 = vmatpush1.bf16.msra.mxu1 %v6482_v23  ;;  %v6613_v23 = vld [vmem:[#allocation8 + $0x1ec] ss:$16 sps:$4 sm:$0xff]  }
 0x211   : > { %1740 = vmatprep.subr.bf16.mxu1 %v6487_v24  ;;  %v6611_v24 = vld [vmem:[#allocation8 + $0x1e8] ss:$16 sps:$4 sm:$0xff]  }
 0x214   : > { %1741 = vmatpush1.bf16.msra.mxu1 %v6485_v15  ;;  %v6619_v15 = vld [vmem:[#allocation8 + $0x20c] ss:$16 sps:$4 sm:$0xff]  }
 0x215   : > { %1742 = vmatprep.subr.bf16.mxu1 %v6490_v25  ;;  %v5651_v25 = vld.sshfl [vmem:[%s7981_s4] sm:$0x33 pattern:$0x75316420] }
 0x216   : > { %v1786_v14 = vcombine.high %v5651_v25, %v5651_v25  ;;  %v7821_v26 = vrot.slane %v5651_v25, %v7790_v42  ;;  %v6670_v25 = vld [vmem:[#allocation8 + $0x324] ss:$16 sps:$4 sm:$0xff]  }
 0x218   : > { %1743 = vmatpush1.bf16.msra.mxu1 %v6488_v27  ;;  %v7824_v27 = vrot.slane %v1786_v14, %v7790_v42  ;;  %v6673_v14 = vld [vmem:[#allocation8 + $0x32c] ss:$16 sps:$4 sm:$0xff]  }
 0x219   : > { %1744 = vmatprep.subr.bf16.mxu1 %v6493_v28  ;;  %v1804_v28 = vpack.i.b16 %v7821_v26, %v7821_v26 }
 0x21c   : > { %1745 = vmatpush1.bf16.msra.mxu1 %v6491_v31  ;;  %v1811_v31 = vpack.i.b16 %v7824_v27, %v7824_v27 }
 0x21d   : > { %1746 = vmatprep.subr.bf16.mxu1 %v6496_v32 }
 0x220   : > { %1747 = vmatpush1.bf16.msra.mxu1 %v6494_v35 }
 0x221   : > { %1748 = vmatprep.subr.bf16.mxu1 %v6499_v36 }
 0x224   : > { %1749 = vmatpush1.bf16.msra.mxu1 %v6497_v38 }
 0x225   : > { %1750 = vmatprep.subr.bf16.mxu1 %v6502_v39  ;;  %v1809_v39 = vrot.slane %v1804_v28, %v7795_v49  ;;  %v6668_v28 = vld [vmem:[#allocation8 + $0x320] ss:$16 sps:$4 sm:$0xff]  }
 0x228   : > { %1751 = vmatpush1.bf16.msra.mxu1 %v6500_v40 }
 0x229   : > { %1752 = vmatprep.subr.bf16.mxu1 %v6505_v43 }
 0x22c   : > { %1753 = vmatpush1.bf16.msra.mxu1 %v6503_v44 }
 0x22d   : > { %1754 = vmatprep.subr.bf16.mxu1 %v6508_v45  ;;  %v1816_v45 = vrot.slane %v1811_v31, %v7795_v49  ;;  %v6679_v31 = vld [vmem:[#allocation8 + $0x34c] ss:$16 sps:$4 sm:$0xff]  }
 0x230   : > { %1755 = vmatpush1.bf16.msra.mxu1 %v6506_v46 }
 0x231   : > { %1756 = vmatprep.subr.bf16.mxu1 %v6511_v47 }
 0x234   : > { %1757 = vmatpush1.bf16.msra.mxu1 %v6509_v48 }
 0x235   : > { %1758 = vmatprep.subr.bf16.mxu1 %v6514_v50 }
 0x238   : > { %1759 = vmatpush1.bf16.msra.mxu1 %v6512_v51 }
 0x239   : > { %1760 = vmatprep.subr.bf16.mxu1 %v6517_v52  ;;  %v6614_v52 = vld [vmem:[#allocation8 + $0x200] ss:$16 sps:$4 sm:$0xff]  }
 0x23c   : > { %1761 = vmatpush1.bf16.msra.mxu1 %v6515_v53  ;;  %v6617_v53 = vld [vmem:[#allocation8 + $0x208] ss:$16 sps:$4 sm:$0xff]  }
 0x23d   : > { %2693 = vmatprep.subr.bf16.mxu1 %v6523_v54 }
 0x23f   : > { %1763 = vmatmul.mubr.bf16.vlgmr.msra.gmra.mrb[8].mxu1 %v7802_v11  ;;  %v6559_v11 = vld [vmem:[#allocation8 + $0xcc] ss:$16 sps:$4 sm:$0xff]  }
 0x240   : > { %2694 = vmatpush1.bf16.msra.mxu1 %v6521_v55  ;;  %v6622_v55 = vld [vmem:[#allocation8 + $0x224] ss:$16 sps:$4 sm:$0xff]  }
 0x241   : > { %2695 = vmatprep.subr.bf16.mxu1 %v6529_v56  ;;  %v6625_v56 = vld [vmem:[#allocation8 + $0x22c] ss:$16 sps:$4 sm:$0xff]  }
 0x244   : > { %2696 = vmatpush1.bf16.msra.mxu1 %v6527_v57  ;;  %v6620_v57 = vld [vmem:[#allocation8 + $0x220] ss:$16 sps:$4 sm:$0xff]  }
 0x245   : > { %2697 = vmatprep.subr.bf16.mxu1 %v6535_v58  ;;  %v6623_v58 = vld [vmem:[#allocation8 + $0x228] ss:$16 sps:$4 sm:$0xff]  }
 0x248   : > { %2698 = vmatpush1.bf16.msra.mxu1 %v6533_v59  ;;  %v6628_v59 = vld [vmem:[#allocation8 + $0x244] ss:$16 sps:$4 sm:$0xff]  }
 0x249   : > { %2699 = vmatprep.subr.bf16.mxu1 %v6541_v60  ;;  %v6631_v60 = vld [vmem:[#allocation8 + $0x24c] ss:$16 sps:$4 sm:$0xff]  }
 0x24c   : > { %2700 = vmatpush1.bf16.msra.mxu1 %v6539_v61  ;;  %v6626_v61 = vld [vmem:[#allocation8 + $0x240] ss:$16 sps:$4 sm:$0xff]  }
 0x24d   : > { %2701 = vmatprep.subr.bf16.mxu1 %v6547_v62  ;;  %v6629_v62 = vld [vmem:[#allocation8 + $0x248] ss:$16 sps:$4 sm:$0xff]  }
 0x250   : > { %2702 = vmatpush1.bf16.msra.mxu1 %v6545_v63  ;;  %v6634_v63 = vld [vmem:[#allocation8 + $0x264] ss:$16 sps:$4 sm:$0xff]  }
 0x251   : > { %2703 = vmatprep.subr.bf16.mxu1 %v6553_v1  ;;  %v6637_v1 = vld [vmem:[#allocation8 + $0x26c] ss:$16 sps:$4 sm:$0xff]  }
 0x254   : > { %2704 = vmatpush1.bf16.msra.mxu1 %v6551_v2  ;;  %v6632_v2 = vld [vmem:[#allocation8 + $0x260] ss:$16 sps:$4 sm:$0xff]  }
 0x255   : > { %2705 = vmatprep.subr.bf16.mxu1 %v6559_v11  ;;  %v6635_v11 = vld [vmem:[#allocation8 + $0x268] ss:$16 sps:$4 sm:$0xff]  }
 0x258   : > { %2706 = vmatpush1.bf16.msra.mxu1 %v6557_v3  ;;  %v6640_v3 = vld [vmem:[#allocation8 + $0x284] ss:$16 sps:$4 sm:$0xff]  }
 0x259   : > { %2707 = vmatprep.subr.bf16.mxu1 %v6565_v4  ;;  %v6643_v4 = vld [vmem:[#allocation8 + $0x28c] ss:$16 sps:$4 sm:$0xff]  }
 0x25c   : > { %2708 = vmatpush1.bf16.msra.mxu1 %v6563_v5  ;;  %v6638_v5 = vld [vmem:[#allocation8 + $0x280] ss:$16 sps:$4 sm:$0xff]  }
 0x25d   : > { %2709 = vmatprep.subr.bf16.mxu1 %v6571_v6  ;;  %v6641_v6 = vld [vmem:[#allocation8 + $0x288] ss:$16 sps:$4 sm:$0xff]  }
 0x260   : > { %2710 = vmatpush1.bf16.msra.mxu1 %v6569_v7  ;;  %v6646_v7 = vld [vmem:[#allocation8 + $0x2a4] ss:$16 sps:$4 sm:$0xff]  }
 0x261   : > { %2711 = vmatprep.subr.bf16.mxu1 %v6577_v8  ;;  %v6649_v8 = vld [vmem:[#allocation8 + $0x2ac] ss:$16 sps:$4 sm:$0xff]  }
 0x264   : > { %2712 = vmatpush1.bf16.msra.mxu1 %v6575_v9  ;;  %v6644_v9 = vld [vmem:[#allocation8 + $0x2a0] ss:$16 sps:$4 sm:$0xff]  }
 0x265   : > { %2713 = vmatprep.subr.bf16.mxu1 %v6583_v10  ;;  %v6647_v10 = vld [vmem:[#allocation8 + $0x2a8] ss:$16 sps:$4 sm:$0xff]  }
 0x268   : > { %2714 = vmatpush1.bf16.msra.mxu1 %v6581_v12  ;;  %v6652_v12 = vld [vmem:[#allocation8 + $0x2c4] ss:$16 sps:$4 sm:$0xff]  }
 0x269   : > { %2715 = vmatprep.subr.bf16.mxu1 %v6589_v13  ;;  %v6655_v13 = vld [vmem:[#allocation8 + $0x2cc] ss:$16 sps:$4 sm:$0xff]  }
 0x26c   : > { %2716 = vmatpush1.bf16.msra.mxu1 %v6587_v16  ;;  %v6650_v16 = vld [vmem:[#allocation8 + $0x2c0] ss:$16 sps:$4 sm:$0xff]  }
 0x26d   : > { %2717 = vmatprep.subr.bf16.mxu1 %v6595_v17  ;;  %v6653_v17 = vld [vmem:[#allocation8 + $0x2c8] ss:$16 sps:$4 sm:$0xff]  }
 0x270   : > { %2718 = vmatpush1.bf16.msra.mxu1 %v6593_v18  ;;  %v6658_v18 = vld [vmem:[#allocation8 + $0x2e4] ss:$16 sps:$4 sm:$0xff]  }
 0x271   : > { %2719 = vmatprep.subr.bf16.mxu1 %v6601_v19  ;;  %v6661_v19 = vld [vmem:[#allocation8 + $0x2ec] ss:$16 sps:$4 sm:$0xff]  }
 0x274   : > { %2720 = vmatpush1.bf16.msra.mxu1 %v6599_v20  ;;  %v6656_v20 = vld [vmem:[#allocation8 + $0x2e0] ss:$16 sps:$4 sm:$0xff]  }
 0x275   : > { %2721 = vmatprep.subr.bf16.mxu1 %v6607_v21  ;;  %v6659_v21 = vld [vmem:[#allocation8 + $0x2e8] ss:$16 sps:$4 sm:$0xff]  }
 0x278   : > { %2722 = vmatpush1.bf16.msra.mxu1 %v6605_v22  ;;  %v6664_v22 = vld [vmem:[#allocation8 + $0x304] ss:$16 sps:$4 sm:$0xff]  }
 0x279   : > { %2723 = vmatprep.subr.bf16.mxu1 %v6613_v23  ;;  %v6667_v23 = vld [vmem:[#allocation8 + $0x30c] ss:$16 sps:$4 sm:$0xff]  }
 0x27c   : > { %2724 = vmatpush1.bf16.msra.mxu1 %v6611_v24  ;;  %v6662_v24 = vld [vmem:[#allocation8 + $0x300] ss:$16 sps:$4 sm:$0xff]  }
 0x27d   : > { %2736 = vmatprep.subr.bf16.mxu1 %v6619_v15  ;;  %v6665_v15 = vld [vmem:[#allocation8 + $0x308] ss:$16 sps:$4 sm:$0xff]  }
 0x292   : > { %v1635_v29 = vpop.f32.mrb[4].mxu1  ;;  %v1678_v30 = vpop.f32.mrb[4].mxu0 }
 0x293   : > { %v1679_v32 = vadd.f32 %v1678_v30, %v1635_v29  ;;  %v1637_v33 = vpop.f32.mrb[5].mxu1  ;;  %v1680_v34 = vpop.f32.mrb[5].mxu0  ;;  %v6671_v29 = vld [vmem:[#allocation8 + $0x328] ss:$16 sps:$4 sm:$0xff]   ;;  %v6676_v30 = vld [vmem:[#allocation8 + $0x344] ss:$16 sps:$4 sm:$0xff]  }
 0x294   : > { %v1681_v35 = vadd.f32 %v1680_v34, %v1637_v33  ;;  %v1639_v36 = vpop.f32.mrb[6].mxu1  ;;  %v1682_v37 = vpop.f32.mrb[6].mxu0  ;;  %v6677_v33 = vld [vmem:[#allocation8 + $0x348] ss:$16 sps:$4 sm:$0xff]   ;;  %v6682_v34 = vld [vmem:[#allocation8 + $0x364] ss:$16 sps:$4 sm:$0xff]  }
 0x295   : > { %v1683_v38 = vadd.f32 %v1682_v37, %v1639_v36  ;;  %v1641_v40 = vpop.f32.mrb[7].mxu1  ;;  %v1684_v43 = vpop.f32.mrb[7].mxu0  ;;  %v6680_v36 = vld [vmem:[#allocation8 + $0x360] ss:$16 sps:$4 sm:$0xff]   ;;  %v6683_v37 = vld [vmem:[#allocation8 + $0x368] ss:$16 sps:$4 sm:$0xff]  }
 0x296   : > { %v1685_v44 = vadd.f32 %v1684_v43, %v1641_v40  ;;  %v6686_v40 = vld [vmem:[#allocation8 + $0x380] ss:$16 sps:$4 sm:$0xff]   ;;  %v6689_v43 = vld [vmem:[#allocation8 + $0x388] ss:$16 sps:$4 sm:$0xff]  }
 0x297   : > { %v1773_v46 = vpack.c.bf16 %v1683_v38, %v1679_v32  ;;  %v6674_v32 = vld [vmem:[#allocation8 + $0x340] ss:$16 sps:$4 sm:$0xff]   ;;  %v6688_v38 = vld [vmem:[#allocation8 + $0x384] ss:$16 sps:$4 sm:$0xff]  }
 0x298   : > { %v1774_v47 = vpack.c.bf16 %v1685_v44, %v1681_v35  ;;  %v6685_v35 = vld [vmem:[#allocation8 + $0x36c] ss:$16 sps:$4 sm:$0xff]   ;;  %v6694_v44 = vld [vmem:[#allocation8 + $0x3a4] ss:$16 sps:$4 sm:$0xff]  }
 0x299   : > { %v1831_v48 = vadd.bf16 %v1809_v39, %v1773_v46  ;;  %v6691_v39 = vld [vmem:[#allocation8 + $0x38c] ss:$16 sps:$4 sm:$0xff]   ;;  %v6692_v46 = vld [vmem:[#allocation8 + $0x3a0] ss:$16 sps:$4 sm:$0xff]  }
 0x29a   : > { %v1832_v50 = vadd.bf16 %v1816_v45, %v1774_v47  ;;  %v6697_v45 = vld [vmem:[#allocation8 + $0x3ac] ss:$16 sps:$4 sm:$0xff]   ;;  %v6695_v47 = vld [vmem:[#allocation8 + $0x3a8] ss:$16 sps:$4 sm:$0xff]  }
 0x29b   : > { %v1835_v54 = vmax.bf16 %v7452_v0, %v1831_v48  ;;  %v6700_v48 = vld [vmem:[#allocation8 + $0x3c4] ss:$16 sps:$4 sm:$0xff]  }
 0x29c   : > { %v1836_v51 = vmax.bf16 %v7452_v0, %v1832_v50  ;;  %v6703_v50 = vld [vmem:[#allocation8 + $0x3cc] ss:$16 sps:$4 sm:$0xff]  }
 0x29e   : > { %2639 = vmatprep.mubr.bf16.mxu0 %v1836_v51  ;;  %2725 = vmatprep.mubr.bf16.mxu1 %v1836_v51  ;;  %v6698_v51 = vld [vmem:[#allocation8 + $0x3c0] ss:$16 sps:$4 sm:$0xff]  }
 0x29f   : > { %2640 = vmatmul.mubr.bf16.vlgmr.msra.gmra.mrb[8].mxu0 %v1835_v54  ;;  %2726 = vmatmul.mubr.bf16.vlgmr.msra.gmra.mrb[12].mxu1 %v1835_v54  ;;  %v6709_v54 = vld [vmem:[#allocation8 + $0x3ec] ss:$16 sps:$4 sm:$0xff]  }
 0x2a0   : > { %2651 = vmatpush1.bf16.msra.mxu0 %v6614_v52  ;;  %2737 = vmatpush1.bf16.msra.mxu1 %v6617_v53  ;;  %v6701_v52 = vld [vmem:[#allocation8 + $0x3c8] ss:$16 sps:$4 sm:$0xff]   ;;  %v6706_v53 = vld [vmem:[#allocation8 + $0x3e4] ss:$16 sps:$4 sm:$0xff]  }
 0x2a1   : > { %2652 = vmatprep.subr.bf16.mxu0 %v6622_v55  ;;  %2738 = vmatprep.subr.bf16.mxu1 %v6625_v56  ;;  %v6704_v55 = vld [vmem:[#allocation8 + $0x3e0] ss:$16 sps:$4 sm:$0xff]   ;;  %v6707_v56 = vld [vmem:[#allocation8 + $0x3e8] ss:$16 sps:$4 sm:$0xff]  }
 0x2a4   : > { %2653 = vmatpush1.bf16.msra.mxu0 %v6620_v57  ;;  %2739 = vmatpush1.bf16.msra.mxu1 %v6623_v58  ;;  %v6712_v57 = vld [vmem:[#allocation10 + $0x4] ss:$16 sps:$4 sm:$0xff]   ;;  %v6715_v58 = vld [vmem:[#allocation10 + $0xc] ss:$16 sps:$4 sm:$0xff]  }
 0x2a5   : > { %2654 = vmatprep.subr.bf16.mxu0 %v6628_v59  ;;  %2740 = vmatprep.subr.bf16.mxu1 %v6631_v60  ;;  %v1801_v59 = vcombine.high %v7821_v26, %v7821_v26  ;;  %v1802_v60 = vcombine.high %v7824_v27, %v7824_v27  ;;  %v6710_v26 = vld [vmem:[#allocation10] ss:$16 sps:$4 sm:$0xff]  }
 0x2a8   : > { %2655 = vmatpush1.bf16.msra.mxu0 %v6626_v61  ;;  %2741 = vmatpush1.bf16.msra.mxu1 %v6629_v62  ;;  %v1818_v61 = vpack.i.b16 %v1801_v59, %v1801_v59  ;;  %v1825_v62 = vpack.i.b16 %v1802_v60, %v1802_v60  ;;  %v6776_v59 = vld [vmem:[#allocation10 + $0x160] ss:$16 sps:$4 sm:$0xff]   ;;  %v6779_v60 = vld [vmem:[#allocation10 + $0x168] ss:$16 sps:$4 sm:$0xff]  }
 0x2a9   : > { %2656 = vmatprep.subr.bf16.mxu0 %v6634_v63  ;;  %2742 = vmatprep.subr.bf16.mxu1 %v6637_v1 }
 0x2ac   : > { %2657 = vmatpush1.bf16.msra.mxu0 %v6632_v2  ;;  %2743 = vmatpush1.bf16.msra.mxu1 %v6635_v11  ;;  %v1823_v2 = vrot.slane %v1818_v61, %v7795_v49  ;;  %v6784_v61 = vld [vmem:[#allocation10 + $0x184] ss:$16 sps:$4 sm:$0xff]  }
 0x2ad   : > { %2658 = vmatprep.subr.bf16.mxu0 %v6640_v3  ;;  %2744 = vmatprep.subr.bf16.mxu1 %v6643_v4  ;;  %v1830_v3 = vrot.slane %v1825_v62, %v7795_v49  ;;  %v6787_v62 = vld [vmem:[#allocation10 + $0x18c] ss:$16 sps:$4 sm:$0xff]  }
 0x2b0   : > { %2659 = vmatpush1.bf16.msra.mxu0 %v6638_v5  ;;  %2745 = vmatpush1.bf16.msra.mxu1 %v6641_v6 }
 0x2b1   : > { %2660 = vmatprep.subr.bf16.mxu0 %v6646_v7  ;;  %2746 = vmatprep.subr.bf16.mxu1 %v6649_v8 }
 0x2b4   : > { %2661 = vmatpush1.bf16.msra.mxu0 %v6644_v9  ;;  %2747 = vmatpush1.bf16.msra.mxu1 %v6647_v10  ;;  %v6713_v10 = vld [vmem:[#allocation10 + $0x8] ss:$16 sps:$4 sm:$0xff]  }
 0x2b5   : > { %2662 = vmatprep.subr.bf16.mxu0 %v6652_v12  ;;  %2748 = vmatprep.subr.bf16.mxu1 %v6655_v13  ;;  %v6718_v12 = vld [vmem:[#allocation10 + $0x24] ss:$16 sps:$4 sm:$0xff]   ;;  %v6721_v13 = vld [vmem:[#allocation10 + $0x2c] ss:$16 sps:$4 sm:$0xff]  }
 0x2b8   : > { %2663 = vmatpush1.bf16.msra.mxu0 %v6650_v16  ;;  %2749 = vmatpush1.bf16.msra.mxu1 %v6653_v17  ;;  %v6716_v16 = vld [vmem:[#allocation10 + $0x20] ss:$16 sps:$4 sm:$0xff]   ;;  %v6719_v17 = vld [vmem:[#allocation10 + $0x28] ss:$16 sps:$4 sm:$0xff]  }
 0x2b9   : > { %2664 = vmatprep.subr.bf16.mxu0 %v6658_v18  ;;  %2750 = vmatprep.subr.bf16.mxu1 %v6661_v19  ;;  %v6724_v18 = vld [vmem:[#allocation10 + $0x44] ss:$16 sps:$4 sm:$0xff]   ;;  %v6727_v19 = vld [vmem:[#allocation10 + $0x4c] ss:$16 sps:$4 sm:$0xff]  }
 0x2bc   : > { %2665 = vmatpush1.bf16.msra.mxu0 %v6656_v20  ;;  %2751 = vmatpush1.bf16.msra.mxu1 %v6659_v21  ;;  %v6722_v20 = vld [vmem:[#allocation10 + $0x40] ss:$16 sps:$4 sm:$0xff]   ;;  %v6725_v21 = vld [vmem:[#allocation10 + $0x48] ss:$16 sps:$4 sm:$0xff]  }
 0x2bd   : > { %2666 = vmatprep.subr.bf16.mxu0 %v6664_v22  ;;  %2752 = vmatprep.subr.bf16.mxu1 %v6667_v23  ;;  %v6730_v22 = vld [vmem:[#allocation10 + $0x64] ss:$16 sps:$4 sm:$0xff]   ;;  %v6733_v23 = vld [vmem:[#allocation10 + $0x6c] ss:$16 sps:$4 sm:$0xff]  }
 0x2c0   : > { %2667 = vmatpush1.bf16.msra.mxu0 %v6662_v24  ;;  %2753 = vmatpush1.bf16.msra.mxu1 %v6665_v15  ;;  %v6728_v24 = vld [vmem:[#allocation10 + $0x60] ss:$16 sps:$4 sm:$0xff]   ;;  %v6731_v15 = vld [vmem:[#allocation10 + $0x68] ss:$16 sps:$4 sm:$0xff]  }
 0x2c1   : > { %2668 = vmatprep.subr.bf16.mxu0 %v6670_v25  ;;  %2754 = vmatprep.subr.bf16.mxu1 %v6673_v14  ;;  %v6736_v25 = vld [vmem:[#allocation10 + $0x84] ss:$16 sps:$4 sm:$0xff]   ;;  %v6739_v14 = vld [vmem:[#allocation10 + $0x8c] ss:$16 sps:$4 sm:$0xff]  }
 0x2c4   : > { %2669 = vmatpush1.bf16.msra.mxu0 %v6668_v28  ;;  %2755 = vmatpush1.bf16.msra.mxu1 %v6671_v29  ;;  %v6734_v28 = vld [vmem:[#allocation10 + $0x80] ss:$16 sps:$4 sm:$0xff]   ;;  %v6737_v29 = vld [vmem:[#allocation10 + $0x88] ss:$16 sps:$4 sm:$0xff]  }
 0x2c5   : > { %2670 = vmatprep.subr.bf16.mxu0 %v6676_v30  ;;  %2756 = vmatprep.subr.bf16.mxu1 %v6679_v31  ;;  %v6742_v30 = vld [vmem:[#allocation10 + $0xa4] ss:$16 sps:$4 sm:$0xff]   ;;  %v6745_v31 = vld [vmem:[#allocation10 + $0xac] ss:$16 sps:$4 sm:$0xff]  }
 0x2c8   : > { %2671 = vmatpush1.bf16.msra.mxu0 %v6674_v32  ;;  %2757 = vmatpush1.bf16.msra.mxu1 %v6677_v33  ;;  %v6740_v32 = vld [vmem:[#allocation10 + $0xa0] ss:$16 sps:$4 sm:$0xff]   ;;  %v6743_v33 = vld [vmem:[#allocation10 + $0xa8] ss:$16 sps:$4 sm:$0xff]  }
 0x2c9   : > { %2672 = vmatprep.subr.bf16.mxu0 %v6682_v34  ;;  %2758 = vmatprep.subr.bf16.mxu1 %v6685_v35  ;;  %v6748_v34 = vld [vmem:[#allocation10 + $0xc4] ss:$16 sps:$4 sm:$0xff]   ;;  %v6751_v35 = vld [vmem:[#allocation10 + $0xcc] ss:$16 sps:$4 sm:$0xff]  }
 0x2cc   : > { %2673 = vmatpush1.bf16.msra.mxu0 %v6680_v36  ;;  %2759 = vmatpush1.bf16.msra.mxu1 %v6683_v37  ;;  %v6746_v36 = vld [vmem:[#allocation10 + $0xc0] ss:$16 sps:$4 sm:$0xff]   ;;  %v6749_v37 = vld [vmem:[#allocation10 + $0xc8] ss:$16 sps:$4 sm:$0xff]  }
 0x2cd   : > { %2674 = vmatprep.subr.bf16.mxu0 %v6688_v38  ;;  %2760 = vmatprep.subr.bf16.mxu1 %v6691_v39  ;;  %v6754_v38 = vld [vmem:[#allocation10 + $0xe4] ss:$16 sps:$4 sm:$0xff]   ;;  %v6757_v39 = vld [vmem:[#allocation10 + $0xec] ss:$16 sps:$4 sm:$0xff]  }
 0x2d0   : > { %2675 = vmatpush1.bf16.msra.mxu0 %v6686_v40  ;;  %2761 = vmatpush1.bf16.msra.mxu1 %v6689_v43  ;;  %v6752_v40 = vld [vmem:[#allocation10 + $0xe0] ss:$16 sps:$4 sm:$0xff]   ;;  %v6755_v43 = vld [vmem:[#allocation10 + $0xe8] ss:$16 sps:$4 sm:$0xff]  }
 0x2d1   : > { %2676 = vmatprep.subr.bf16.mxu0 %v6694_v44  ;;  %2762 = vmatprep.subr.bf16.mxu1 %v6697_v45  ;;  %v6760_v44 = vld [vmem:[#allocation10 + $0x104] ss:$16 sps:$4 sm:$0xff]   ;;  %v6763_v45 = vld [vmem:[#allocation10 + $0x10c] ss:$16 sps:$4 sm:$0xff]  }
 0x2d4   : > { %2677 = vmatpush1.bf16.msra.mxu0 %v6692_v46  ;;  %2763 = vmatpush1.bf16.msra.mxu1 %v6695_v47  ;;  %v6758_v46 = vld [vmem:[#allocation10 + $0x100] ss:$16 sps:$4 sm:$0xff]   ;;  %v6761_v47 = vld [vmem:[#allocation10 + $0x108] ss:$16 sps:$4 sm:$0xff]  }
 0x2d5   : > { %2678 = vmatprep.subr.bf16.mxu0 %v6700_v48  ;;  %2764 = vmatprep.subr.bf16.mxu1 %v6703_v50  ;;  %v6766_v48 = vld [vmem:[#allocation10 + $0x124] ss:$16 sps:$4 sm:$0xff]   ;;  %v6769_v50 = vld [vmem:[#allocation10 + $0x12c] ss:$16 sps:$4 sm:$0xff]  }
 0x2d8   : > { %2679 = vmatpush1.bf16.msra.mxu0 %v6698_v51  ;;  %2765 = vmatpush1.bf16.msra.mxu1 %v6701_v52  ;;  %v6764_v51 = vld [vmem:[#allocation10 + $0x120] ss:$16 sps:$4 sm:$0xff]   ;;  %v6767_v52 = vld [vmem:[#allocation10 + $0x128] ss:$16 sps:$4 sm:$0xff]  }
 0x2d9   : > { %2680 = vmatprep.subr.bf16.mxu0 %v6706_v53  ;;  %2766 = vmatprep.subr.bf16.mxu1 %v6709_v54  ;;  %v6772_v53 = vld [vmem:[#allocation10 + $0x144] ss:$16 sps:$4 sm:$0xff]   ;;  %v6775_v54 = vld [vmem:[#allocation10 + $0x14c] ss:$16 sps:$4 sm:$0xff]  }
 0x2dc   : > { %2681 = vmatpush1.bf16.msra.mxu0 %v6704_v55  ;;  %2767 = vmatpush1.bf16.msra.mxu1 %v6707_v56  ;;  %v6770_v55 = vld [vmem:[#allocation10 + $0x140] ss:$16 sps:$4 sm:$0xff]   ;;  %v6773_v56 = vld [vmem:[#allocation10 + $0x148] ss:$16 sps:$4 sm:$0xff]  }
 0x2dd   : > { %3613 = vmatprep.subr.bf16.mxu0 %v6712_v57  ;;  %3699 = vmatprep.subr.bf16.mxu1 %v6715_v58  ;;  %v6778_v57 = vld [vmem:[#allocation10 + $0x164] ss:$16 sps:$4 sm:$0xff]   ;;  %v6781_v58 = vld [vmem:[#allocation10 + $0x16c] ss:$16 sps:$4 sm:$0xff]  }
 0x312   : > { %v1764_v63 = vpop.f32.mrb[8].mxu1 }
 0x313   : > { %v1766_v1 = vpop.f32.mrb[9].mxu1 }
 0x314   : > { %v1768_v11 = vpop.f32.mrb[10].mxu1 }
 0x315   : > { %v1775_v4 = vpack.c.bf16 %v1768_v11, %v1764_v63  ;;  %v1770_v5 = vpop.f32.mrb[11].mxu1  ;;  %v6782_v63 = vld [vmem:[#allocation10 + $0x180] ss:$16 sps:$4 sm:$0xff]   ;;  %v6793_v11 = vld [vmem:[#allocation10 + $0x1ac] ss:$16 sps:$4 sm:$0xff]  }
 0x316   : > { %v1776_v6 = vpack.c.bf16 %v1770_v5, %v1766_v1  ;;  %v6785_v1 = vld [vmem:[#allocation10 + $0x188] ss:$16 sps:$4 sm:$0xff]   ;;  %v6796_v5 = vld [vmem:[#allocation10 + $0x1c4] ss:$16 sps:$4 sm:$0xff]  }
 0x317   : > { %v1833_v7 = vadd.bf16 %v1823_v2, %v1775_v4  ;;  %v6790_v2 = vld [vmem:[#allocation10 + $0x1a4] ss:$16 sps:$4 sm:$0xff]   ;;  %v6791_v4 = vld [vmem:[#allocation10 + $0x1a8] ss:$16 sps:$4 sm:$0xff]  }
 0x318   : > { %v1834_v8 = vadd.bf16 %v1830_v3, %v1776_v6  ;;  %v6788_v3 = vld [vmem:[#allocation10 + $0x1a0] ss:$16 sps:$4 sm:$0xff]   ;;  %v6799_v6 = vld [vmem:[#allocation10 + $0x1cc] ss:$16 sps:$4 sm:$0xff]  }
 0x319   : > { %v1837_v27 = vmax.bf16 %v7452_v0, %v1833_v7  ;;  %v6794_v7 = vld [vmem:[#allocation10 + $0x1c0] ss:$16 sps:$4 sm:$0xff]  }
 0x31a   : > { %v1838_v9 = vmax.bf16 %v7452_v0, %v1834_v8  ;;  %v6797_v8 = vld [vmem:[#allocation10 + $0x1c8] ss:$16 sps:$4 sm:$0xff]  }
 0x31c   : > { %2682 = vmatprep.mubr.bf16.mxu0 %v1838_v9  ;;  %2768 = vmatprep.mubr.bf16.mxu1 %v1838_v9  ;;  %v6802_v9 = vld [vmem:[#allocation10 + $0x1e4] ss:$16 sps:$4 sm:$0xff]  }
 0x31d   : > { %2683 = vmatmul.mubr.bf16.vlgmr.msra.gmra.mrb[8].mxu0 %v1837_v27  ;;  %2769 = vmatmul.mubr.bf16.vlgmr.msra.gmra.mrb[12].mxu1 %v1837_v27  ;;  %v6803_v27 = vld [vmem:[#allocation10 + $0x1e8] ss:$16 sps:$4 sm:$0xff]  }
 0x31e   : > { %3614 = vmatpush1.bf16.msra.mxu0 %v6710_v26  ;;  %3700 = vmatpush1.bf16.msra.mxu1 %v6713_v10  ;;  %v6805_v26 = vld [vmem:[#allocation10 + $0x1ec] ss:$16 sps:$4 sm:$0xff]   ;;  %v6800_v10 = vld [vmem:[#allocation10 + $0x1e0] ss:$16 sps:$4 sm:$0xff]  }
 0x31f   : > { %3615 = vmatprep.subr.bf16.mxu0 %v6718_v12  ;;  %3701 = vmatprep.subr.bf16.mxu1 %v6721_v13  ;;  %v6808_v12 = vld [vmem:[#allocation10 + $0x204] ss:$16 sps:$4 sm:$0xff]   ;;  %v6811_v13 = vld [vmem:[#allocation10 + $0x20c] ss:$16 sps:$4 sm:$0xff]  }
 0x322   : > { %3616 = vmatpush1.bf16.msra.mxu0 %v6716_v16  ;;  %3702 = vmatpush1.bf16.msra.mxu1 %v6719_v17  ;;  %v5780_v16 = vld.sshfl [vmem:[%s7983_s6] sm:$0x33 pattern:$0x75316420] }
 0x323   : > { %3617 = vmatprep.subr.bf16.mxu0 %v6724_v18  ;;  %3703 = vmatprep.subr.bf16.mxu1 %v6727_v19  ;;  %v2792_v17 = vcombine.high %v5780_v16, %v5780_v16  ;;  %v7847_v19 = vrot.slane %v5780_v16, %v7790_v42  ;;  %v6859_v16 = vld [vmem:[#allocation10 + $0x30c] ss:$16 sps:$4 sm:$0xff]  }
 0x325   : > { %v2806_v18 = vrot.slane %v2792_v17, %v7790_v42  ;;  %v6854_v17 = vld [vmem:[#allocation10 + $0x300] ss:$16 sps:$4 sm:$0xff]  }
 0x326   : > { %3618 = vmatpush1.bf16.msra.mxu0 %v6722_v20  ;;  %3704 = vmatpush1.bf16.msra.mxu1 %v6725_v21  ;;  %v2810_v21 = vpack.i.b16 %v7847_v19, %v7847_v19 }
 0x327   : > { %3619 = vmatprep.subr.bf16.mxu0 %v6730_v22  ;;  %3705 = vmatprep.subr.bf16.mxu1 %v6733_v23  ;;  %v2808_v20 = vcombine.high %v2806_v18, %v2806_v18  ;;  %v2817_v22 = vpack.i.b16 %v2806_v18, %v2806_v18  ;;  %v6857_v18 = vld [vmem:[#allocation10 + $0x308] ss:$16 sps:$4 sm:$0xff]  }
 0x329   : > { %v2831_v23 = vpack.i.b16 %v2808_v20, %v2808_v20  ;;  %v6862_v20 = vld [vmem:[#allocation10 + $0x324] ss:$16 sps:$4 sm:$0xff]  }
 0x32a   : > { %3620 = vmatpush1.bf16.msra.mxu0 %v6728_v24  ;;  %3706 = vmatpush1.bf16.msra.mxu1 %v6731_v15 }
 0x32b   : > { %3621 = vmatprep.subr.bf16.mxu0 %v6736_v25  ;;  %3707 = vmatprep.subr.bf16.mxu1 %v6739_v14 }
 0x32e   : > { %3622 = vmatpush1.bf16.msra.mxu0 %v6734_v28  ;;  %3708 = vmatpush1.bf16.msra.mxu1 %v6737_v29  ;;  %v2815_v28 = vrot.slane %v2810_v21, %v7795_v49  ;;  %v6865_v21 = vld [vmem:[#allocation10 + $0x32c] ss:$16 sps:$4 sm:$0xff]  }
 0x32f   : > { %3623 = vmatprep.subr.bf16.mxu0 %v6742_v30  ;;  %3709 = vmatprep.subr.bf16.mxu1 %v6745_v31  ;;  %v2822_v31 = vrot.slane %v2817_v22, %v7795_v49  ;;  %v6860_v22 = vld [vmem:[#allocation10 + $0x320] ss:$16 sps:$4 sm:$0xff]  }
 0x332   : > { %3624 = vmatpush1.bf16.msra.mxu0 %v6740_v32  ;;  %3710 = vmatpush1.bf16.msra.mxu1 %v6743_v33 }
 0x333   : > { %3625 = vmatprep.subr.bf16.mxu0 %v6748_v34  ;;  %3711 = vmatprep.subr.bf16.mxu1 %v6751_v35 }
 0x336   : > { %3626 = vmatpush1.bf16.msra.mxu0 %v6746_v36  ;;  %3712 = vmatpush1.bf16.msra.mxu1 %v6749_v37  ;;  %v2836_v36 = vrot.slane %v2831_v23, %v7795_v49  ;;  %v6863_v23 = vld [vmem:[#allocation10 + $0x328] ss:$16 sps:$4 sm:$0xff]  }
 0x337   : > { %3627 = vmatprep.subr.bf16.mxu0 %v6754_v38  ;;  %3713 = vmatprep.subr.bf16.mxu1 %v6757_v39 }
 0x33a   : > { %3628 = vmatpush1.bf16.msra.mxu0 %v6752_v40  ;;  %3714 = vmatpush1.bf16.msra.mxu1 %v6755_v43 }
 0x33b   : > { %3629 = vmatprep.subr.bf16.mxu0 %v6760_v44  ;;  %3715 = vmatprep.subr.bf16.mxu1 %v6763_v45  ;;  %v6806_v45 = vld [vmem:[#allocation10 + $0x200] ss:$16 sps:$4 sm:$0xff]  }
 0x33e   : > { %3630 = vmatpush1.bf16.msra.mxu0 %v6758_v46  ;;  %3716 = vmatpush1.bf16.msra.mxu1 %v6761_v47  ;;  %v6809_v46 = vld [vmem:[#allocation10 + $0x208] ss:$16 sps:$4 sm:$0xff]  }
 0x33f   : > { %3631 = vmatprep.subr.bf16.mxu0 %v6766_v48  ;;  %3717 = vmatprep.subr.bf16.mxu1 %v6769_v50  ;;  %v6814_v48 = vld [vmem:[#allocation10 + $0x224] ss:$16 sps:$4 sm:$0xff]   ;;  %v6817_v50 = vld [vmem:[#allocation10 + $0x22c] ss:$16 sps:$4 sm:$0xff]  }
 0x342   : > { %3632 = vmatpush1.bf16.msra.mxu0 %v6764_v51  ;;  %3718 = vmatpush1.bf16.msra.mxu1 %v6767_v52  ;;  %v6812_v52 = vld [vmem:[#allocation10 + $0x220] ss:$16 sps:$4 sm:$0xff]  }
 0x343   : > { %3633 = vmatprep.subr.bf16.mxu0 %v6772_v53  ;;  %3719 = vmatprep.subr.bf16.mxu1 %v6775_v54  ;;  %v6815_v53 = vld [vmem:[#allocation10 + $0x228] ss:$16 sps:$4 sm:$0xff]   ;;  %v6820_v54 = vld [vmem:[#allocation10 + $0x244] ss:$16 sps:$4 sm:$0xff]  }
 0x346   : > { %3634 = vmatpush1.bf16.msra.mxu0 %v6770_v55  ;;  %3720 = vmatpush1.bf16.msra.mxu1 %v6773_v56  ;;  %v6823_v55 = vld [vmem:[#allocation10 + $0x24c] ss:$16 sps:$4 sm:$0xff]   ;;  %v6818_v56 = vld [vmem:[#allocation10 + $0x240] ss:$16 sps:$4 sm:$0xff]  }
 0x347   : > { %3635 = vmatprep.subr.bf16.mxu0 %v6778_v57  ;;  %3721 = vmatprep.subr.bf16.mxu1 %v6781_v58  ;;  %v6821_v57 = vld [vmem:[#allocation10 + $0x248] ss:$16 sps:$4 sm:$0xff]   ;;  %v6826_v58 = vld [vmem:[#allocation10 + $0x264] ss:$16 sps:$4 sm:$0xff]  }
 0x34a   : > { %3636 = vmatpush1.bf16.msra.mxu0 %v6776_v59  ;;  %3722 = vmatpush1.bf16.msra.mxu1 %v6779_v60  ;;  %v6829_v59 = vld [vmem:[#allocation10 + $0x26c] ss:$16 sps:$4 sm:$0xff]   ;;  %v6824_v60 = vld [vmem:[#allocation10 + $0x260] ss:$16 sps:$4 sm:$0xff]  }
 0x34b   : > { %3637 = vmatprep.subr.bf16.mxu0 %v6784_v61  ;;  %3723 = vmatprep.subr.bf16.mxu1 %v6787_v62  ;;  %v6827_v61 = vld [vmem:[#allocation10 + $0x268] ss:$16 sps:$4 sm:$0xff]   ;;  %v6832_v62 = vld [vmem:[#allocation10 + $0x284] ss:$16 sps:$4 sm:$0xff]  }
 0x34e   : > { %3638 = vmatpush1.bf16.msra.mxu0 %v6782_v63  ;;  %3724 = vmatpush1.bf16.msra.mxu1 %v6785_v1  ;;  %v6835_v63 = vld [vmem:[#allocation10 + $0x28c] ss:$16 sps:$4 sm:$0xff]   ;;  %v6830_v1 = vld [vmem:[#allocation10 + $0x280] ss:$16 sps:$4 sm:$0xff]  }
 0x34f   : > { %3639 = vmatprep.subr.bf16.mxu0 %v6790_v2  ;;  %3725 = vmatprep.subr.bf16.mxu1 %v6793_v11  ;;  %v6833_v2 = vld [vmem:[#allocation10 + $0x288] ss:$16 sps:$4 sm:$0xff]   ;;  %v6838_v11 = vld [vmem:[#allocation10 + $0x2a4] ss:$16 sps:$4 sm:$0xff]  }
 0x352   : > { %3640 = vmatpush1.bf16.msra.mxu0 %v6788_v3  ;;  %3726 = vmatpush1.bf16.msra.mxu1 %v6791_v4  ;;  %v6841_v3 = vld [vmem:[#allocation10 + $0x2ac] ss:$16 sps:$4 sm:$0xff]   ;;  %v6836_v4 = vld [vmem:[#allocation10 + $0x2a0] ss:$16 sps:$4 sm:$0xff]  }
 0x353   : > { %3641 = vmatprep.subr.bf16.mxu0 %v6796_v5  ;;  %3727 = vmatprep.subr.bf16.mxu1 %v6799_v6  ;;  %v6839_v5 = vld [vmem:[#allocation10 + $0x2a8] ss:$16 sps:$4 sm:$0xff]   ;;  %v6844_v6 = vld [vmem:[#allocation10 + $0x2c4] ss:$16 sps:$4 sm:$0xff]  }
 0x356   : > { %3642 = vmatpush1.bf16.msra.mxu0 %v6794_v7  ;;  %3728 = vmatpush1.bf16.msra.mxu1 %v6797_v8  ;;  %v6847_v7 = vld [vmem:[#allocation10 + $0x2cc] ss:$16 sps:$4 sm:$0xff]   ;;  %v6842_v8 = vld [vmem:[#allocation10 + $0x2c0] ss:$16 sps:$4 sm:$0xff]  }
 0x357   : > { %3643 = vmatprep.subr.bf16.mxu0 %v6802_v9  ;;  %3729 = vmatprep.subr.bf16.mxu1 %v6805_v26  ;;  %v6845_v9 = vld [vmem:[#allocation10 + $0x2c8] ss:$16 sps:$4 sm:$0xff]   ;;  %v6850_v26 = vld [vmem:[#allocation10 + $0x2e4] ss:$16 sps:$4 sm:$0xff]  }
 0x35a   : > { %3644 = vmatpush1.bf16.msra.mxu0 %v6800_v10  ;;  %3730 = vmatpush1.bf16.msra.mxu1 %v6803_v27  ;;  %v6853_v10 = vld [vmem:[#allocation10 + $0x2ec] ss:$16 sps:$4 sm:$0xff]   ;;  %v6848_v27 = vld [vmem:[#allocation10 + $0x2e0] ss:$16 sps:$4 sm:$0xff]  }
 0x35b   : > { %3656 = vmatprep.subr.bf16.mxu0 %v6808_v12  ;;  %3742 = vmatprep.subr.bf16.mxu1 %v6811_v13  ;;  %v6851_v12 = vld [vmem:[#allocation10 + $0x2e8] ss:$16 sps:$4 sm:$0xff]   ;;  %v6856_v13 = vld [vmem:[#allocation10 + $0x304] ss:$16 sps:$4 sm:$0xff]  }
 0x3f0   : > { %v2684_v24 = vpop.f32.mrb[8].mxu0  ;;  %v7851_v15 = vpop.f32.mrb[12].mxu1 }
 0x3f1   : > { %v2686_v25 = vpop.f32.mrb[9].mxu0  ;;  %v2772_v14 = vpop.f32.mrb[13].mxu1 }
 0x3f2   : > { %v2688_v29 = vpop.f32.mrb[10].mxu0  ;;  %v7854_v30 = vpop.f32.mrb[14].mxu1 }
 0x3f3   : > { %v2779_v32 = vpack.c.bf16 %v2688_v29, %v2684_v24  ;;  %v2781_v33 = vpack.c.bf16 %v7854_v30, %v7851_v15  ;;  %v2690_v34 = vpop.f32.mrb[11].mxu0  ;;  %v2776_v35 = vpop.f32.mrb[15].mxu1  ;;  %v6868_v24 = vld [vmem:[#allocation10 + $0x344] ss:$16 sps:$4 sm:$0xff]   ;;  %v6908_v15 = vld [vmem:[#allocation11 + $0x30] ss:$24 sps:$4 sm:$0xff]  }
 0x3f4   : > { %v2780_v37 = vpack.c.bf16 %v2690_v34, %v2686_v25  ;;  %v2782_v38 = vpack.c.bf16 %v2776_v35, %v2772_v14  ;;  %v6871_v25 = vld [vmem:[#allocation10 + $0x34c] ss:$16 sps:$4 sm:$0xff]   ;;  %v6866_v14 = vld [vmem:[#allocation10 + $0x340] ss:$16 sps:$4 sm:$0xff]   ;;  %v6874_v29 = vld [vmem:[#allocation10 + $0x364] ss:$16 sps:$4 sm:$0xff]  }
 0x3f5   : > { %v2837_v39 = vadd.bf16 %v2815_v28, %v2779_v32  ;;  %v6869_v28 = vld [vmem:[#allocation10 + $0x348] ss:$16 sps:$4 sm:$0xff]   ;;  %v6872_v32 = vld [vmem:[#allocation10 + $0x360] ss:$16 sps:$4 sm:$0xff]   ;;  %v6880_v35 = vld [vmem:[#allocation10 + $0x384] ss:$16 sps:$4 sm:$0xff]  }
 0x3f6   : > { %v2838_v40 = vadd.bf16 %v2822_v31, %v2780_v37  ;;  %v2840_v43 = vadd.bf16 %v2836_v36, %v2782_v38  ;;  %v6877_v31 = vld [vmem:[#allocation10 + $0x36c] ss:$16 sps:$4 sm:$0xff]   ;;  %v6875_v34 = vld [vmem:[#allocation10 + $0x368] ss:$16 sps:$4 sm:$0xff]   ;;  %v6878_v37 = vld [vmem:[#allocation10 + $0x380] ss:$16 sps:$4 sm:$0xff]  }
 0x3f7   : > { %v2841_v47 = vmax.bf16 %v7452_v0, %v2837_v39  ;;  %v6883_v36 = vld [vmem:[#allocation10 + $0x38c] ss:$16 sps:$4 sm:$0xff]   ;;  %v6881_v38 = vld [vmem:[#allocation10 + $0x388] ss:$16 sps:$4 sm:$0xff]   ;;  %v2807_v39 = vcombine.high %v7847_v19, %v7847_v19  ;;  %v6898_v19 = vld [vmem:[#allocation10 + $0x3e4] ss:$16 sps:$4 sm:$0xff]  }
 0x3f8   : > { %v2842_v44 = vmax.bf16 %v7452_v0, %v2838_v40  ;;  %v2844_v51 = vmax.bf16 %v7452_v0, %v2840_v43  ;;  %v6886_v40 = vld [vmem:[#allocation10 + $0x3a4] ss:$16 sps:$4 sm:$0xff]   ;;  %v6889_v43 = vld [vmem:[#allocation10 + $0x3ac] ss:$16 sps:$4 sm:$0xff]   ;;  %v6911_v30 = vld [vmem:[#allocation11 + $0x38] ss:$24 sps:$4 sm:$0xff]  }
 0x3fa   : > { %3645 = vmatprep.mubr.bf16.mxu0 %v2842_v44  ;;  %3731 = vmatprep.mubr.bf16.mxu1 %v2842_v44  ;;  %v6884_v44 = vld [vmem:[#allocation10 + $0x3a0] ss:$16 sps:$4 sm:$0xff]  }
 0x3fb   : > { %3646 = vmatmul.mubr.bf16.vlgmr.msra.gmra.mrb[12].mxu0 %v2841_v47  ;;  %3732 = vmatmul.mubr.bf16.vlgmr.msra.gmra.mrb[16].mxu1 %v2841_v47  ;;  %v6892_v47 = vld [vmem:[#allocation10 + $0x3c4] ss:$16 sps:$4 sm:$0xff]  }
 0x3fc   : > { %3657 = vmatpush1.bf16.msra.mxu0 %v6806_v45  ;;  %3743 = vmatpush1.bf16.msra.mxu1 %v6809_v46  ;;  %v6887_v45 = vld [vmem:[#allocation10 + $0x3a8] ss:$16 sps:$4 sm:$0xff]   ;;  %v2824_v46 = vpack.i.b16 %v2807_v39, %v2807_v39 }
 0x3fd   : > { %3688 = vmatprep.mubr.bf16.mxu0 %v2844_v51  ;;  %3774 = vmatprep.mubr.bf16.mxu1 %v2844_v51  ;;  %v6893_v51 = vld [vmem:[#allocation10 + $0x3c8] ss:$16 sps:$4 sm:$0xff]  }
 0x3fe   : > { %3658 = vmatprep.subr.bf16.mxu0 %v6814_v48  ;;  %3744 = vmatprep.subr.bf16.mxu1 %v6817_v50  ;;  %v6895_v48 = vld [vmem:[#allocation10 + $0x3cc] ss:$16 sps:$4 sm:$0xff]   ;;  %v6890_v50 = vld [vmem:[#allocation10 + $0x3c0] ss:$16 sps:$4 sm:$0xff]  }
 0x3ff   : > { %v6965_v39 = vld [vmem:[#allocation11 + $0x1e8] ss:$24 sps:$4 sm:$0xff]  }
 0x400   : > { %3659 = vmatpush1.bf16.msra.mxu0 %v6812_v52  ;;  %3745 = vmatpush1.bf16.msra.mxu1 %v6815_v53  ;;  %v2829_v52 = vrot.slane %v2824_v46, %v7795_v49  ;;  %v6901_v53 = vld [vmem:[#allocation10 + $0x3ec] ss:$16 sps:$4 sm:$0xff]  }
 0x401   : > { %3660 = vmatprep.subr.bf16.mxu0 %v6820_v54  ;;  %3746 = vmatprep.subr.bf16.mxu1 %v6823_v55  ;;  %v6896_v54 = vld [vmem:[#allocation10 + $0x3e0] ss:$16 sps:$4 sm:$0xff]   ;;  %v6899_v55 = vld [vmem:[#allocation10 + $0x3e8] ss:$16 sps:$4 sm:$0xff]   ;;  %v6976_v46 = vld [vmem:[#allocation11 + $0x244] ss:$24 sps:$4 sm:$0xff]  }
 0x404   : > { %3661 = vmatpush1.bf16.msra.mxu0 %v6818_v56  ;;  %3747 = vmatpush1.bf16.msra.mxu1 %v6821_v57  ;;  %v2839_v56 = vadd.bf16 %v2829_v52, %v2781_v33  ;;  %v6904_v57 = vld [vmem:[#allocation11 + $0x4] ss:$24 sps:$4 sm:$0xff]  }
 0x405   : > { %3662 = vmatprep.subr.bf16.mxu0 %v6826_v58  ;;  %3748 = vmatprep.subr.bf16.mxu1 %v6829_v59  ;;  %v6907_v58 = vld [vmem:[#allocation11 + $0xc] ss:$24 sps:$4 sm:$0xff]   ;;  %v6902_v59 = vld [vmem:[#allocation11] ss:$24 sps:$4 sm:$0xff]   ;;  %v6985_v52 = vld [vmem:[#allocation11 + $0x27c] ss:$24 sps:$4 sm:$0xff]  }
 0x406   : > { %v6916_v33 = vld [vmem:[#allocation11 + $0x64] ss:$24 sps:$4 sm:$0xff]  }
 0x408   : > { %3663 = vmatpush1.bf16.msra.mxu0 %v6824_v60  ;;  %3749 = vmatpush1.bf16.msra.mxu1 %v6827_v61  ;;  %v6905_v60 = vld [vmem:[#allocation11 + $0x8] ss:$24 sps:$4 sm:$0xff]   ;;  %v2843_v61 = vmax.bf16 %v7452_v0, %v2839_v56 }
 0x409   : > { %3664 = vmatprep.subr.bf16.mxu0 %v6832_v62  ;;  %3750 = vmatprep.subr.bf16.mxu1 %v6835_v63  ;;  %v6910_v62 = vld [vmem:[#allocation11 + $0x34] ss:$24 sps:$4 sm:$0xff]   ;;  %v6986_v56 = vld [vmem:[#allocation11 + $0x2a0] ss:$24 sps:$4 sm:$0xff]  }
 0x40a   : > { %v6913_v63 = vld [vmem:[#allocation11 + $0x3c] ss:$24 sps:$4 sm:$0xff]  }
 0x40c   : > { %3665 = vmatpush1.bf16.msra.mxu0 %v6830_v1  ;;  %3751 = vmatpush1.bf16.msra.mxu1 %v6833_v2  ;;  %v6919_v1 = vld [vmem:[#allocation11 + $0x6c] ss:$24 sps:$4 sm:$0xff]   ;;  %v6914_v2 = vld [vmem:[#allocation11 + $0x60] ss:$24 sps:$4 sm:$0xff]  }
 0x40d   : > { %3666 = vmatprep.subr.bf16.mxu0 %v6838_v11  ;;  %3752 = vmatprep.subr.bf16.mxu1 %v6841_v3  ;;  %v6917_v11 = vld [vmem:[#allocation11 + $0x68] ss:$24 sps:$4 sm:$0xff]   ;;  %v6922_v3 = vld [vmem:[#allocation11 + $0x94] ss:$24 sps:$4 sm:$0xff]  }
 0x410   : > { %3667 = vmatpush1.bf16.msra.mxu0 %v6836_v4  ;;  %3753 = vmatpush1.bf16.msra.mxu1 %v6839_v5  ;;  %v6925_v4 = vld [vmem:[#allocation11 + $0x9c] ss:$24 sps:$4 sm:$0xff]   ;;  %v6920_v5 = vld [vmem:[#allocation11 + $0x90] ss:$24 sps:$4 sm:$0xff]  }
 0x411   : > { %3668 = vmatprep.subr.bf16.mxu0 %v6844_v6  ;;  %3754 = vmatprep.subr.bf16.mxu1 %v6847_v7  ;;  %v6923_v6 = vld [vmem:[#allocation11 + $0x98] ss:$24 sps:$4 sm:$0xff]   ;;  %v6928_v7 = vld [vmem:[#allocation11 + $0xc4] ss:$24 sps:$4 sm:$0xff]  }
 0x414   : > { %3669 = vmatpush1.bf16.msra.mxu0 %v6842_v8  ;;  %3755 = vmatpush1.bf16.msra.mxu1 %v6845_v9  ;;  %v6931_v8 = vld [vmem:[#allocation11 + $0xcc] ss:$24 sps:$4 sm:$0xff]   ;;  %v6926_v9 = vld [vmem:[#allocation11 + $0xc0] ss:$24 sps:$4 sm:$0xff]  }
 0x415   : > { %3670 = vmatprep.subr.bf16.mxu0 %v6850_v26  ;;  %3756 = vmatprep.subr.bf16.mxu1 %v6853_v10  ;;  %v6929_v26 = vld [vmem:[#allocation11 + $0xc8] ss:$24 sps:$4 sm:$0xff]   ;;  %v6934_v10 = vld [vmem:[#allocation11 + $0xf4] ss:$24 sps:$4 sm:$0xff]  }
 0x418   : > { %3671 = vmatpush1.bf16.msra.mxu0 %v6848_v27  ;;  %3757 = vmatpush1.bf16.msra.mxu1 %v6851_v12  ;;  %v6937_v27 = vld [vmem:[#allocation11 + $0xfc] ss:$24 sps:$4 sm:$0xff]   ;;  %v6932_v12 = vld [vmem:[#allocation11 + $0xf0] ss:$24 sps:$4 sm:$0xff]  }
 0x419   : > { %3672 = vmatprep.subr.bf16.mxu0 %v6856_v13  ;;  %3758 = vmatprep.subr.bf16.mxu1 %v6859_v16  ;;  %v6935_v13 = vld [vmem:[#allocation11 + $0xf8] ss:$24 sps:$4 sm:$0xff]   ;;  %v6940_v16 = vld [vmem:[#allocation11 + $0x124] ss:$24 sps:$4 sm:$0xff]  }
 0x41c   : > { %3673 = vmatpush1.bf16.msra.mxu0 %v6854_v17  ;;  %3759 = vmatpush1.bf16.msra.mxu1 %v6857_v18  ;;  %v6943_v17 = vld [vmem:[#allocation11 + $0x12c] ss:$24 sps:$4 sm:$0xff]   ;;  %v6938_v18 = vld [vmem:[#allocation11 + $0x120] ss:$24 sps:$4 sm:$0xff]  }
 0x41d   : > { %3674 = vmatprep.subr.bf16.mxu0 %v6862_v20  ;;  %3760 = vmatprep.subr.bf16.mxu1 %v6865_v21  ;;  %v6941_v20 = vld [vmem:[#allocation11 + $0x128] ss:$24 sps:$4 sm:$0xff]   ;;  %v6946_v21 = vld [vmem:[#allocation11 + $0x154] ss:$24 sps:$4 sm:$0xff]  }
 0x420   : > { %3675 = vmatpush1.bf16.msra.mxu0 %v6860_v22  ;;  %3761 = vmatpush1.bf16.msra.mxu1 %v6863_v23  ;;  %v6949_v22 = vld [vmem:[#allocation11 + $0x15c] ss:$24 sps:$4 sm:$0xff]   ;;  %v6944_v23 = vld [vmem:[#allocation11 + $0x150] ss:$24 sps:$4 sm:$0xff]  }
 0x421   : > { %3676 = vmatprep.subr.bf16.mxu0 %v6868_v24  ;;  %3762 = vmatprep.subr.bf16.mxu1 %v6871_v25  ;;  %v6947_v24 = vld [vmem:[#allocation11 + $0x158] ss:$24 sps:$4 sm:$0xff]   ;;  %v6952_v25 = vld [vmem:[#allocation11 + $0x184] ss:$24 sps:$4 sm:$0xff]  }
 0x424   : > { %3677 = vmatpush1.bf16.msra.mxu0 %v6866_v14  ;;  %3763 = vmatpush1.bf16.msra.mxu1 %v6869_v28  ;;  %v6955_v14 = vld [vmem:[#allocation11 + $0x18c] ss:$24 sps:$4 sm:$0xff]   ;;  %v6950_v28 = vld [vmem:[#allocation11 + $0x180] ss:$24 sps:$4 sm:$0xff]  }
 0x425   : > { %3678 = vmatprep.subr.bf16.mxu0 %v6874_v29  ;;  %3764 = vmatprep.subr.bf16.mxu1 %v6877_v31  ;;  %v6953_v29 = vld [vmem:[#allocation11 + $0x188] ss:$24 sps:$4 sm:$0xff]   ;;  %v6958_v31 = vld [vmem:[#allocation11 + $0x1b4] ss:$24 sps:$4 sm:$0xff]  }
 0x428   : > { %3679 = vmatpush1.bf16.msra.mxu0 %v6872_v32  ;;  %3765 = vmatpush1.bf16.msra.mxu1 %v6875_v34  ;;  %v6961_v32 = vld [vmem:[#allocation11 + $0x1bc] ss:$24 sps:$4 sm:$0xff]   ;;  %v6956_v34 = vld [vmem:[#allocation11 + $0x1b0] ss:$24 sps:$4 sm:$0xff]  }
 0x429   : > { %3680 = vmatprep.subr.bf16.mxu0 %v6880_v35  ;;  %3766 = vmatprep.subr.bf16.mxu1 %v6883_v36  ;;  %v6959_v35 = vld [vmem:[#allocation11 + $0x1b8] ss:$24 sps:$4 sm:$0xff]   ;;  %v6964_v36 = vld [vmem:[#allocation11 + $0x1e4] ss:$24 sps:$4 sm:$0xff]  }
 0x42c   : > { %3681 = vmatpush1.bf16.msra.mxu0 %v6878_v37  ;;  %3767 = vmatpush1.bf16.msra.mxu1 %v6881_v38  ;;  %v6967_v37 = vld [vmem:[#allocation11 + $0x1ec] ss:$24 sps:$4 sm:$0xff]   ;;  %v6962_v38 = vld [vmem:[#allocation11 + $0x1e0] ss:$24 sps:$4 sm:$0xff]  }
 0x42d   : > { %3682 = vmatprep.subr.bf16.mxu0 %v6886_v40  ;;  %3768 = vmatprep.subr.bf16.mxu1 %v6889_v43  ;;  %v6970_v40 = vld [vmem:[#allocation11 + $0x214] ss:$24 sps:$4 sm:$0xff]  }
 0x42e   : > { %v6973_v43 = vld [vmem:[#allocation11 + $0x21c] ss:$24 sps:$4 sm:$0xff]  }
 0x430   : > { %3683 = vmatpush1.bf16.msra.mxu0 %v6884_v44  ;;  %3769 = vmatpush1.bf16.msra.mxu1 %v6887_v45  ;;  %v6968_v44 = vld [vmem:[#allocation11 + $0x210] ss:$24 sps:$4 sm:$0xff]  }
 0x431   : > { %3684 = vmatprep.subr.bf16.mxu0 %v6892_v47  ;;  %3770 = vmatprep.subr.bf16.mxu1 %v6895_v48  ;;  %v6971_v45 = vld [vmem:[#allocation11 + $0x218] ss:$24 sps:$4 sm:$0xff]   ;;  %v6979_v47 = vld [vmem:[#allocation11 + $0x24c] ss:$24 sps:$4 sm:$0xff]  }
 0x432   : > { %v6974_v48 = vld [vmem:[#allocation11 + $0x240] ss:$24 sps:$4 sm:$0xff]  }
 0x434   : > { %3685 = vmatpush1.bf16.msra.mxu0 %v6890_v50  ;;  %3771 = vmatpush1.bf16.msra.mxu1 %v6893_v51  ;;  %v6977_v50 = vld [vmem:[#allocation11 + $0x248] ss:$24 sps:$4 sm:$0xff]   ;;  %v6982_v51 = vld [vmem:[#allocation11 + $0x274] ss:$24 sps:$4 sm:$0xff]  }
 0x435   : > { %3686 = vmatprep.subr.bf16.mxu0 %v6898_v19  ;;  %3772 = vmatprep.subr.bf16.mxu1 %v6901_v53  ;;  %v6980_v19 = vld [vmem:[#allocation11 + $0x270] ss:$24 sps:$4 sm:$0xff]  }
 0x436   : > { %v6983_v53 = vld [vmem:[#allocation11 + $0x278] ss:$24 sps:$4 sm:$0xff]  }
 0x438   : > { %3687 = vmatpush1.bf16.msra.mxu0 %v6896_v54  ;;  %3773 = vmatpush1.bf16.msra.mxu1 %v6899_v55  ;;  %v6988_v54 = vld [vmem:[#allocation11 + $0x2a4] ss:$24 sps:$4 sm:$0xff]  }
 0x439   : > { %5035 = vmatprep.subr.bf16.mxu0 %v6904_v57  ;;  %5121 = vmatprep.subr.bf16.mxu1 %v6907_v58  ;;  %v6991_v55 = vld [vmem:[#allocation11 + $0x2ac] ss:$24 sps:$4 sm:$0xff]   ;;  %v6989_v57 = vld [vmem:[#allocation11 + $0x2a8] ss:$24 sps:$4 sm:$0xff]  }
 0x43a   : > { %v6994_v58 = vld [vmem:[#allocation11 + $0x2d4] ss:$24 sps:$4 sm:$0xff]  }
 0x43b   : > { %3689 = vmatmul.mubr.bf16.vlgmr.msra.gmra.mrb[12].mxu0 %v2843_v61  ;;  %3775 = vmatmul.mubr.bf16.vlgmr.msra.gmra.mrb[16].mxu1 %v2843_v61  ;;  %v6995_v61 = vld [vmem:[#allocation11 + $0x2d8] ss:$24 sps:$4 sm:$0xff]  }
 0x43c   : > { %5036 = vmatpush1.bf16.msra.mxu0 %v6902_v59  ;;  %5122 = vmatpush1.bf16.msra.mxu1 %v6905_v60  ;;  %v6997_v59 = vld [vmem:[#allocation11 + $0x2dc] ss:$24 sps:$4 sm:$0xff]   ;;  %v6992_v60 = vld [vmem:[#allocation11 + $0x2d0] ss:$24 sps:$4 sm:$0xff]  }
 0x43d   : > { %5037 = vmatprep.subr.bf16.mxu0 %v6910_v62  ;;  %5123 = vmatprep.subr.bf16.mxu1 %v6913_v63  ;;  %v7000_v62 = vld [vmem:[#allocation11 + $0x304] ss:$24 sps:$4 sm:$0xff]  }
 0x43e   : > { %v7003_v63 = vld [vmem:[#allocation11 + $0x30c] ss:$24 sps:$4 sm:$0xff]  }
 0x440   : > { %5038 = vmatpush1.bf16.msra.mxu0 %v6908_v15  ;;  %5124 = vmatpush1.bf16.msra.mxu1 %v6911_v30  ;;  %v5909_v15 = vld.sshfl [vmem:[%s8013_s8] sm:$0x33 pattern:$0x75316420]  ;;  %s7454_s8 = smov [#allocation13]  }
 0x441   : > { %5039 = vmatprep.subr.bf16.mxu0 %v6916_v33  ;;  %5125 = vmatprep.subr.bf16.mxu1 %v6919_v1  ;;  %v3798_v30 = vcombine.high %v5909_v15, %v5909_v15  ;;  %v7875_v1 = vrot.slane %v5909_v15, %v7790_v42  ;;  %v7046_v15 = vld [vmem:[#allocation11 + $0x480] ss:$24 sps:$4 sm:$0xff]   ;;  %s7364_s28 = sshll.u32 %s7454_s8, 4  ;;  %s7365_s28 = int_to_ptr.vmem [resolvable:$false] %s7364_s28 }
 0x442   : > { %s7366_s22 = scalar_lea.vmem %s7365_s28, 1536  ;;  %p7367_p13 = scmp.lt.s32.totalorder %s7929_s27, %s7365_s28 }
 0x443   : > { %v3812_v33 = vrot.slane %v3798_v30, %v7790_v42  ;;  %v7049_v30 = vld [vmem:[#allocation11 + $0x488] ss:$24 sps:$4 sm:$0xff]   ;;  %p7368_p0 = scmp.lt.s32.totalorder %s7366_s22, %s7360_s25 }
 0x444   : > { %5040 = vmatpush1.bf16.msra.mxu0 %v6914_v2  ;;  %5126 = vmatpush1.bf16.msra.mxu1 %v6917_v11  ;;  %v3816_v11 = vpack.i.b16 %v7875_v1, %v7875_v1 }
 0x445   : > { %5041 = vmatprep.subr.bf16.mxu0 %v6922_v3  ;;  %5127 = vmatprep.subr.bf16.mxu1 %v6925_v4  ;;  %v3814_v2 = vcombine.high %v3812_v33, %v3812_v33  ;;  %v3823_v3 = vpack.i.b16 %v3812_v33, %v3812_v33  ;;  %v7054_v33 = vld [vmem:[#allocation11 + $0x4b4] ss:$24 sps:$4 sm:$0xff]   ;;  %p7369_p2 = por %p7368_p0, %p7367_p13 }
 0x447   : > { %v3837_v4 = vpack.i.b16 %v3814_v2, %v3814_v2  ;;  %v7057_v2 = vld [vmem:[#allocation11 + $0x4bc] ss:$24 sps:$4 sm:$0xff]   ;;  %p7370_p7 = pnand %p7369_p2, %p7363_p1 }
 0x448   : > { %5042 = vmatpush1.bf16.msra.mxu0 %v6920_v5  ;;  %5128 = vmatpush1.bf16.msra.mxu1 %v6923_v6 }
 0x449   : > { %5043 = vmatprep.subr.bf16.mxu0 %v6928_v7  ;;  %5129 = vmatprep.subr.bf16.mxu1 %v6931_v8 }
 0x44c   : > { %5044 = vmatpush1.bf16.msra.mxu0 %v6926_v9  ;;  %5130 = vmatpush1.bf16.msra.mxu1 %v6929_v26  ;;  %v3821_v9 = vrot.slane %v3816_v11, %v7795_v49  ;;  %v7052_v11 = vld [vmem:[#allocation11 + $0x4b0] ss:$24 sps:$4 sm:$0xff]  }
 0x44d   : > { %5045 = vmatprep.subr.bf16.mxu0 %v6934_v10  ;;  %5131 = vmatprep.subr.bf16.mxu1 %v6937_v27  ;;  %v3828_v27 = vrot.slane %v3823_v3, %v7795_v49  ;;  %v7055_v3 = vld [vmem:[#allocation11 + $0x4b8] ss:$24 sps:$4 sm:$0xff]  }
 0x450   : > { %5046 = vmatpush1.bf16.msra.mxu0 %v6932_v12  ;;  %5132 = vmatpush1.bf16.msra.mxu1 %v6935_v13 }
 0x451   : > { %5047 = vmatprep.subr.bf16.mxu0 %v6940_v16  ;;  %5133 = vmatprep.subr.bf16.mxu1 %v6943_v17  ;;  %v3842_v17 = vrot.slane %v3837_v4, %v7795_v49  ;;  %v7060_v4 = vld [vmem:[#allocation11 + $0x4e4] ss:$24 sps:$4 sm:$0xff]  }
 0x454   : > { %5048 = vmatpush1.bf16.msra.mxu0 %v6938_v18  ;;  %5134 = vmatpush1.bf16.msra.mxu1 %v6941_v20 }
 0x455   : > { %5049 = vmatprep.subr.bf16.mxu0 %v6946_v21  ;;  %5135 = vmatprep.subr.bf16.mxu1 %v6949_v22 }
 0x458   : > { %5050 = vmatpush1.bf16.msra.mxu0 %v6944_v23  ;;  %5136 = vmatpush1.bf16.msra.mxu1 %v6947_v24 }
 0x459   : > { %5051 = vmatprep.subr.bf16.mxu0 %v6952_v25  ;;  %5137 = vmatprep.subr.bf16.mxu1 %v6955_v14  ;;  %v6998_v25 = vld [vmem:[#allocation11 + $0x300] ss:$24 sps:$4 sm:$0xff]  }
 0x45a   : > { %v7001_v14 = vld [vmem:[#allocation11 + $0x308] ss:$24 sps:$4 sm:$0xff]  }
 0x45c   : > { %5052 = vmatpush1.bf16.msra.mxu0 %v6950_v28  ;;  %5138 = vmatpush1.bf16.msra.mxu1 %v6953_v29  ;;  %v7006_v29 = vld [vmem:[#allocation11 + $0x334] ss:$24 sps:$4 sm:$0xff]  }
 0x45d   : > { %5053 = vmatprep.subr.bf16.mxu0 %v6958_v31  ;;  %5139 = vmatprep.subr.bf16.mxu1 %v6961_v32  ;;  %v7009_v31 = vld [vmem:[#allocation11 + $0x33c] ss:$24 sps:$4 sm:$0xff]  }
 0x460   : > { %5054 = vmatpush1.bf16.msra.mxu0 %v6956_v34  ;;  %5140 = vmatpush1.bf16.msra.mxu1 %v6959_v35  ;;  %v7004_v34 = vld [vmem:[#allocation11 + $0x330] ss:$24 sps:$4 sm:$0xff]  }
 0x461   : > { %5055 = vmatprep.subr.bf16.mxu0 %v6964_v36  ;;  %5141 = vmatprep.subr.bf16.mxu1 %v6967_v37  ;;  %v7007_v35 = vld [vmem:[#allocation11 + $0x338] ss:$24 sps:$4 sm:$0xff]   ;;  %v7012_v36 = vld [vmem:[#allocation11 + $0x364] ss:$24 sps:$4 sm:$0xff]  }
 0x462   : > { %v7015_v37 = vld [vmem:[#allocation11 + $0x36c] ss:$24 sps:$4 sm:$0xff]  }
 0x464   : > { %5056 = vmatpush1.bf16.msra.mxu0 %v6962_v38  ;;  %5142 = vmatpush1.bf16.msra.mxu1 %v6965_v39  ;;  %v7010_v38 = vld [vmem:[#allocation11 + $0x360] ss:$24 sps:$4 sm:$0xff]  }
 0x465   : > { %5057 = vmatprep.subr.bf16.mxu0 %v6970_v40  ;;  %5143 = vmatprep.subr.bf16.mxu1 %v6973_v43  ;;  %v7013_v39 = vld [vmem:[#allocation11 + $0x368] ss:$24 sps:$4 sm:$0xff]   ;;  %v7018_v40 = vld [vmem:[#allocation11 + $0x394] ss:$24 sps:$4 sm:$0xff]  }
 0x466   : > { %v7021_v43 = vld [vmem:[#allocation11 + $0x39c] ss:$24 sps:$4 sm:$0xff]  }
 0x468   : > { %5058 = vmatpush1.bf16.msra.mxu0 %v6968_v44  ;;  %5144 = vmatpush1.bf16.msra.mxu1 %v6971_v45  ;;  %v7016_v44 = vld [vmem:[#allocation11 + $0x390] ss:$24 sps:$4 sm:$0xff]  }
 0x469   : > { %5059 = vmatprep.subr.bf16.mxu0 %v6976_v46  ;;  %5145 = vmatprep.subr.bf16.mxu1 %v6979_v47  ;;  %v7019_v45 = vld [vmem:[#allocation11 + $0x398] ss:$24 sps:$4 sm:$0xff]   ;;  %v7024_v46 = vld [vmem:[#allocation11 + $0x3c4] ss:$24 sps:$4 sm:$0xff]  }
 0x46a   : > { %v7027_v47 = vld [vmem:[#allocation11 + $0x3cc] ss:$24 sps:$4 sm:$0xff]  }
 0x46c   : > { %5060 = vmatpush1.bf16.msra.mxu0 %v6974_v48  ;;  %5146 = vmatpush1.bf16.msra.mxu1 %v6977_v50  ;;  %v7022_v48 = vld [vmem:[#allocation11 + $0x3c0] ss:$24 sps:$4 sm:$0xff]  }
 0x46d   : > { %5061 = vmatprep.subr.bf16.mxu0 %v6982_v51  ;;  %5147 = vmatprep.subr.bf16.mxu1 %v6985_v52  ;;  %v7025_v50 = vld [vmem:[#allocation11 + $0x3c8] ss:$24 sps:$4 sm:$0xff]   ;;  %v7030_v51 = vld [vmem:[#allocation11 + $0x3f4] ss:$24 sps:$4 sm:$0xff]  }
 0x46e   : > { %v7033_v52 = vld [vmem:[#allocation11 + $0x3fc] ss:$24 sps:$4 sm:$0xff]  }
 0x470   : > { %5062 = vmatpush1.bf16.msra.mxu0 %v6980_v19  ;;  %5148 = vmatpush1.bf16.msra.mxu1 %v6983_v53  ;;  %v7028_v19 = vld [vmem:[#allocation11 + $0x3f0] ss:$24 sps:$4 sm:$0xff]  }
 0x471   : > { %5063 = vmatprep.subr.bf16.mxu0 %v6988_v54  ;;  %5149 = vmatprep.subr.bf16.mxu1 %v6991_v55  ;;  %v7031_v53 = vld [vmem:[#allocation11 + $0x3f8] ss:$24 sps:$4 sm:$0xff]   ;;  %v7036_v54 = vld [vmem:[#allocation11 + $0x424] ss:$24 sps:$4 sm:$0xff]  }
 0x472   : > { %v7039_v55 = vld [vmem:[#allocation11 + $0x42c] ss:$24 sps:$4 sm:$0xff]  }
 0x474   : > { %5064 = vmatpush1.bf16.msra.mxu0 %v6986_v56  ;;  %5150 = vmatpush1.bf16.msra.mxu1 %v6989_v57  ;;  %v7034_v56 = vld [vmem:[#allocation11 + $0x420] ss:$24 sps:$4 sm:$0xff]  }
 0x475   : > { %5065 = vmatprep.subr.bf16.mxu0 %v6994_v58  ;;  %5151 = vmatprep.subr.bf16.mxu1 %v6997_v59  ;;  %v7037_v57 = vld [vmem:[#allocation11 + $0x428] ss:$24 sps:$4 sm:$0xff]   ;;  %v7042_v58 = vld [vmem:[#allocation11 + $0x454] ss:$24 sps:$4 sm:$0xff]  }
 0x476   : > { %v7045_v59 = vld [vmem:[#allocation11 + $0x45c] ss:$24 sps:$4 sm:$0xff]  }
 0x478   : > { %5066 = vmatpush1.bf16.msra.mxu0 %v6992_v60  ;;  %5152 = vmatpush1.bf16.msra.mxu1 %v6995_v61  ;;  %v7040_v60 = vld [vmem:[#allocation11 + $0x450] ss:$24 sps:$4 sm:$0xff]  }
 0x479   : > { %5078 = vmatprep.subr.bf16.mxu0 %v7000_v62  ;;  %5164 = vmatprep.subr.bf16.mxu1 %v7003_v63  ;;  %v7043_v61 = vld [vmem:[#allocation11 + $0x458] ss:$24 sps:$4 sm:$0xff]   ;;  %v7048_v62 = vld [vmem:[#allocation11 + $0x484] ss:$24 sps:$4 sm:$0xff]  }
 0x47a   : > { %v7051_v63 = vld [vmem:[#allocation11 + $0x48c] ss:$24 sps:$4 sm:$0xff]  }
 0x50e   : > { %v3690_v5 = vpop.f32.mrb[12].mxu0  ;;  %v7879_v6 = vpop.f32.mrb[16].mxu1 }
 0x50f   : > { %v3692_v7 = vpop.f32.mrb[13].mxu0  ;;  %v3778_v8 = vpop.f32.mrb[17].mxu1 }
 0x510   : > { %v3694_v26 = vpop.f32.mrb[14].mxu0  ;;  %v7882_v10 = vpop.f32.mrb[18].mxu1 }
 0x511   : > { %v3785_v42 = vpack.c.bf16 %v3694_v26, %v3690_v5  ;;  %v3787_v12 = vpack.c.bf16 %v7882_v10, %v7879_v6  ;;  %v3696_v13 = vpop.f32.mrb[15].mxu0  ;;  %v3782_v16 = vpop.f32.mrb[19].mxu1  ;;  %v7063_v5 = vld [vmem:[#allocation11 + $0x4ec] ss:$24 sps:$4 sm:$0xff]   ;;  %v7069_v26 = vld [vmem:[#allocation11 + $0x51c] ss:$24 sps:$4 sm:$0xff]  }
 0x512   : > { %v3786_v18 = vpack.c.bf16 %v3696_v13, %v3692_v7  ;;  %v3788_v20 = vpack.c.bf16 %v3782_v16, %v3778_v8  ;;  %v7058_v7 = vld [vmem:[#allocation11 + $0x4e0] ss:$24 sps:$4 sm:$0xff]   ;;  %v7072_v13 = vld [vmem:[#allocation11 + $0x544] ss:$24 sps:$4 sm:$0xff]   ;;  %v7102_v10 = vld [vmem:[#allocation11 + $0x74] ss:$24 sps:$4 sm:$0xff]  }
 0x513   : > { %v3843_v21 = vadd.bf16 %v3821_v9, %v3785_v42  ;;  %v7061_v8 = vld [vmem:[#allocation11 + $0x4e8] ss:$24 sps:$4 sm:$0xff]   ;;  %v7066_v9 = vld [vmem:[#allocation11 + $0x514] ss:$24 sps:$4 sm:$0xff]   ;;  %v7067_v42 = vld [vmem:[#allocation11 + $0x518] ss:$24 sps:$4 sm:$0xff]  }
 0x514   : > { %v3844_v22 = vadd.bf16 %v3828_v27, %v3786_v18  ;;  %v3846_v23 = vadd.bf16 %v3842_v17, %v3788_v20  ;;  %v7064_v27 = vld [vmem:[#allocation11 + $0x510] ss:$24 sps:$4 sm:$0xff]   ;;  %v7075_v16 = vld [vmem:[#allocation11 + $0x54c] ss:$24 sps:$4 sm:$0xff]   ;;  %v7070_v17 = vld [vmem:[#allocation11 + $0x540] ss:$24 sps:$4 sm:$0xff]   ;;  %v3813_v20 = vcombine.high %v7875_v1, %v7875_v1 }
 0x515   : > { %v7892_v28 = vmax.bf16 %v7452_v0, %v3843_v21  ;;  %v7073_v18 = vld [vmem:[#allocation11 + $0x548] ss:$24 sps:$4 sm:$0xff]   ;;  %v7078_v21 = vld [vmem:[#allocation11 + $0x574] ss:$24 sps:$4 sm:$0xff]  }
 0x516   : > { %v7889_v24 = vmax.bf16 %v7452_v0, %v3844_v22  ;;  %v7899_v32 = vmax.bf16 %v7452_v0, %v3846_v23  ;;  %v7081_v22 = vld [vmem:[#allocation11 + $0x57c] ss:$24 sps:$4 sm:$0xff]   ;;  %v7076_v23 = vld [vmem:[#allocation11 + $0x570] ss:$24 sps:$4 sm:$0xff]   ;;  %v7097_v6 = vld [vmem:[#allocation11 + $0x40] ss:$24 sps:$4 sm:$0xff]  }
 0x517   : > { %v7090_v1 = vld [vmem:[#allocation11 + $0x5d4] ss:$24 sps:$4 sm:$0xff]  }
 0x518   : > { %5067 = vmatprep.mubr.bf16.mxu0 %v7889_v24  ;;  %5153 = vmatprep.mubr.bf16.mxu1 %v7889_v24 }
 0x519   : > { %5068 = vmatmul.mubr.bf16.vlgmr.msra.gmra.mrb[16].mxu0 %v7892_v28  ;;  %5154 = vmatmul.mubr.bf16.vlgmr.msra.gmra.mrb[20].mxu1 %v7892_v28 }
 0x51a   : > { %5079 = vmatpush1.bf16.msra.mxu0 %v6998_v25  ;;  %5165 = vmatpush1.bf16.msra.mxu1 %v7001_v14  ;;  %v7079_v25 = vld [vmem:[#allocation11 + $0x578] ss:$24 sps:$4 sm:$0xff]   ;;  %v3830_v14 = vpack.i.b16 %v3813_v20, %v3813_v20  ;;  %v7162_v20 = vld [vmem:[#allocation11 + $0x434] ss:$24 sps:$4 sm:$0xff]  }
 0x51b   : > { %5110 = vmatprep.mubr.bf16.mxu0 %v7899_v32  ;;  %5196 = vmatprep.mubr.bf16.mxu1 %v7899_v32 }
 0x51c   : > { %5080 = vmatprep.subr.bf16.mxu0 %v7006_v29  ;;  %5166 = vmatprep.subr.bf16.mxu1 %v7009_v31  ;;  %v7084_v29 = vld [vmem:[#allocation11 + $0x5a4] ss:$24 sps:$4 sm:$0xff]  }
 0x51d   : > { %v7087_v31 = vld [vmem:[#allocation11 + $0x5ac] ss:$24 sps:$4 sm:$0xff]  }
 0x51e   : > { %5081 = vmatpush1.bf16.msra.mxu0 %v7004_v34  ;;  %5167 = vmatpush1.bf16.msra.mxu1 %v7007_v35  ;;  %v7082_v34 = vld [vmem:[#allocation11 + $0x5a0] ss:$24 sps:$4 sm:$0xff]  }
 0x51f   : > { %5082 = vmatprep.subr.bf16.mxu0 %v7012_v36  ;;  %5168 = vmatprep.subr.bf16.mxu1 %v7015_v37  ;;  %v7085_v35 = vld [vmem:[#allocation11 + $0x5a8] ss:$24 sps:$4 sm:$0xff]   ;;  %v3835_v36 = vrot.slane %v3830_v14, %v7795_v49  ;;  %v7093_v37 = vld [vmem:[#allocation11 + $0x5dc] ss:$24 sps:$4 sm:$0xff]  }
 0x520   : > { %v7171_v14 = vld [vmem:[#allocation11 + $0x4c4] ss:$24 sps:$4 sm:$0xff]  }
 0x522   : > { %5083 = vmatpush1.bf16.msra.mxu0 %v7010_v38  ;;  %5169 = vmatpush1.bf16.msra.mxu1 %v7013_v39  ;;  %v7088_v38 = vld [vmem:[#allocation11 + $0x5d0] ss:$24 sps:$4 sm:$0xff]  }
 0x523   : > { %5084 = vmatprep.subr.bf16.mxu0 %v7018_v40  ;;  %5170 = vmatprep.subr.bf16.mxu1 %v7021_v43  ;;  %v7091_v39 = vld [vmem:[#allocation11 + $0x5d8] ss:$24 sps:$4 sm:$0xff]   ;;  %v3845_v40 = vadd.bf16 %v3835_v36, %v3787_v12  ;;  %v7096_v43 = vld [vmem:[#allocation11 + $0x14] ss:$24 sps:$4 sm:$0xff]  }
 0x524   : > { %v7100_v12 = vld [vmem:[#allocation11 + $0x70] ss:$24 sps:$4 sm:$0xff]   ;;  %v7175_v36 = vld [vmem:[#allocation11 + $0x520] ss:$24 sps:$4 sm:$0xff]  }
 0x526   : > { %5085 = vmatpush1.bf16.msra.mxu0 %v7016_v44  ;;  %5171 = vmatpush1.bf16.msra.mxu1 %v7019_v45  ;;  %v7094_v44 = vld [vmem:[#allocation11 + $0x10] ss:$24 sps:$4 sm:$0xff]   ;;  %v7910_v45 = vmax.bf16 %v7452_v0, %v3845_v40  ;;  %v7108_v0 = vld [vmem:[#allocation11 + $0xd4] ss:$24 sps:$4 sm:$0xff]  }
 0x527   : > { %5086 = vmatprep.subr.bf16.mxu0 %v7024_v46  ;;  %5172 = vmatprep.subr.bf16.mxu1 %v7027_v47  ;;  %v7099_v46 = vld [vmem:[#allocation11 + $0x44] ss:$24 sps:$4 sm:$0xff]   ;;  %v7186_v40 = vld [vmem:[#allocation11 + $0x5b4] ss:$24 sps:$4 sm:$0xff]  }
 0x528   : > { %v7105_v47 = vld [vmem:[#allocation11 + $0xa4] ss:$24 sps:$4 sm:$0xff]  }
 0x52a   : > { %5087 = vmatpush1.bf16.msra.mxu0 %v7022_v48  ;;  %5173 = vmatpush1.bf16.msra.mxu1 %v7025_v50  ;;  %v7103_v48 = vld [vmem:[#allocation11 + $0xa0] ss:$24 sps:$4 sm:$0xff]   ;;  %v7106_v50 = vld [vmem:[#allocation11 + $0xd0] ss:$24 sps:$4 sm:$0xff]  }
 0x52b   : > { %5088 = vmatprep.subr.bf16.mxu0 %v7030_v51  ;;  %5174 = vmatprep.subr.bf16.mxu1 %v7033_v52  ;;  %v7111_v51 = vld [vmem:[#allocation11 + $0x104] ss:$24 sps:$4 sm:$0xff]   ;;  %v7109_v52 = vld [vmem:[#allocation11 + $0x100] ss:$24 sps:$4 sm:$0xff]  }
 0x52e   : > { %5089 = vmatpush1.bf16.msra.mxu0 %v7028_v19  ;;  %5175 = vmatpush1.bf16.msra.mxu1 %v7031_v53  ;;  %v7114_v19 = vld [vmem:[#allocation11 + $0x134] ss:$24 sps:$4 sm:$0xff]   ;;  %v7117_v53 = vld [vmem:[#allocation11 + $0x164] ss:$24 sps:$4 sm:$0xff]  }
 0x52f   : > { %5090 = vmatprep.subr.bf16.mxu0 %v7036_v54  ;;  %5176 = vmatprep.subr.bf16.mxu1 %v7039_v55  ;;  %v7115_v54 = vld [vmem:[#allocation11 + $0x160] ss:$24 sps:$4 sm:$0xff]   ;;  %v7120_v55 = vld [vmem:[#allocation11 + $0x194] ss:$24 sps:$4 sm:$0xff]  }
 0x532   : > { %5091 = vmatpush1.bf16.msra.mxu0 %v7034_v56  ;;  %5177 = vmatpush1.bf16.msra.mxu1 %v7037_v57  ;;  %v7118_v56 = vld [vmem:[#allocation11 + $0x190] ss:$24 sps:$4 sm:$0xff]   ;;  %v7123_v57 = vld [vmem:[#allocation11 + $0x1c4] ss:$24 sps:$4 sm:$0xff]  }
 0x533   : > { %5092 = vmatprep.subr.bf16.mxu0 %v7042_v58  ;;  %5178 = vmatprep.subr.bf16.mxu1 %v7045_v59  ;;  %v7121_v58 = vld [vmem:[#allocation11 + $0x1c0] ss:$24 sps:$4 sm:$0xff]   ;;  %v7126_v59 = vld [vmem:[#allocation11 + $0x1f4] ss:$24 sps:$4 sm:$0xff]  }
 0x536   : > { %5093 = vmatpush1.bf16.msra.mxu0 %v7040_v60  ;;  %5179 = vmatpush1.bf16.msra.mxu1 %v7043_v61  ;;  %v7124_v60 = vld [vmem:[#allocation11 + $0x1f0] ss:$24 sps:$4 sm:$0xff]   ;;  %v7129_v61 = vld [vmem:[#allocation11 + $0x224] ss:$24 sps:$4 sm:$0xff]  }
 0x537   : > { %5094 = vmatprep.subr.bf16.mxu0 %v7048_v62  ;;  %5180 = vmatprep.subr.bf16.mxu1 %v7051_v63  ;;  %v7127_v62 = vld [vmem:[#allocation11 + $0x220] ss:$24 sps:$4 sm:$0xff]   ;;  %v7132_v63 = vld [vmem:[#allocation11 + $0x254] ss:$24 sps:$4 sm:$0xff]  }
 0x53a   : > { %5095 = vmatpush1.bf16.msra.mxu0 %v7046_v15  ;;  %5181 = vmatpush1.bf16.msra.mxu1 %v7049_v30  ;;  %v7130_v15 = vld [vmem:[#allocation11 + $0x250] ss:$24 sps:$4 sm:$0xff]   ;;  %v7135_v30 = vld [vmem:[#allocation11 + $0x284] ss:$24 sps:$4 sm:$0xff]  }
 0x53b   : > { %5096 = vmatprep.subr.bf16.mxu0 %v7054_v33  ;;  %5182 = vmatprep.subr.bf16.mxu1 %v7057_v2  ;;  %v7133_v33 = vld [vmem:[#allocation11 + $0x280] ss:$24 sps:$4 sm:$0xff]   ;;  %v7138_v2 = vld [vmem:[#allocation11 + $0x2b4] ss:$24 sps:$4 sm:$0xff]  }
 0x53e   : > { %5097 = vmatpush1.bf16.msra.mxu0 %v7052_v11  ;;  %5183 = vmatpush1.bf16.msra.mxu1 %v7055_v3  ;;  %v7136_v11 = vld [vmem:[#allocation11 + $0x2b0] ss:$24 sps:$4 sm:$0xff]   ;;  %v7141_v3 = vld [vmem:[#allocation11 + $0x2e4] ss:$24 sps:$4 sm:$0xff]  }
 0x53f   : > { %5098 = vmatprep.subr.bf16.mxu0 %v7060_v4  ;;  %5184 = vmatprep.subr.bf16.mxu1 %v7063_v5  ;;  %v7139_v4 = vld [vmem:[#allocation11 + $0x2e0] ss:$24 sps:$4 sm:$0xff]   ;;  %v7144_v5 = vld [vmem:[#allocation11 + $0x314] ss:$24 sps:$4 sm:$0xff]  }
 0x542   : > { %5099 = vmatpush1.bf16.msra.mxu0 %v7058_v7  ;;  %5185 = vmatpush1.bf16.msra.mxu1 %v7061_v8  ;;  %v7142_v7 = vld [vmem:[#allocation11 + $0x310] ss:$24 sps:$4 sm:$0xff]   ;;  %v7147_v8 = vld [vmem:[#allocation11 + $0x344] ss:$24 sps:$4 sm:$0xff]  }
 0x543   : > { %5100 = vmatprep.subr.bf16.mxu0 %v7066_v9  ;;  %5186 = vmatprep.subr.bf16.mxu1 %v7069_v26  ;;  %v7145_v9 = vld [vmem:[#allocation11 + $0x340] ss:$24 sps:$4 sm:$0xff]   ;;  %v7150_v26 = vld [vmem:[#allocation11 + $0x374] ss:$24 sps:$4 sm:$0xff]  }
 0x546   : > { %5101 = vmatpush1.bf16.msra.mxu0 %v7064_v27  ;;  %5187 = vmatpush1.bf16.msra.mxu1 %v7067_v42  ;;  %v7148_v27 = vld [vmem:[#allocation11 + $0x370] ss:$24 sps:$4 sm:$0xff]   ;;  %v7153_v42 = vld [vmem:[#allocation11 + $0x3a4] ss:$24 sps:$4 sm:$0xff]  }
 0x547   : > { %5102 = vmatprep.subr.bf16.mxu0 %v7072_v13  ;;  %5188 = vmatprep.subr.bf16.mxu1 %v7075_v16  ;;  %v7151_v13 = vld [vmem:[#allocation11 + $0x3a0] ss:$24 sps:$4 sm:$0xff]   ;;  %v7156_v16 = vld [vmem:[#allocation11 + $0x3d4] ss:$24 sps:$4 sm:$0xff]  }
 0x54a   : > { %5103 = vmatpush1.bf16.msra.mxu0 %v7070_v17  ;;  %5189 = vmatpush1.bf16.msra.mxu1 %v7073_v18  ;;  %v7154_v17 = vld [vmem:[#allocation11 + $0x3d0] ss:$24 sps:$4 sm:$0xff]   ;;  %v7159_v18 = vld [vmem:[#allocation11 + $0x404] ss:$24 sps:$4 sm:$0xff]  }
 0x54b   : > { %5104 = vmatprep.subr.bf16.mxu0 %v7078_v21  ;;  %5190 = vmatprep.subr.bf16.mxu1 %v7081_v22  ;;  %v7165_v21 = vld [vmem:[#allocation11 + $0x464] ss:$24 sps:$4 sm:$0xff]   ;;  %v7163_v22 = vld [vmem:[#allocation11 + $0x460] ss:$24 sps:$4 sm:$0xff]  }
 0x54e   : > { %5105 = vmatpush1.bf16.msra.mxu0 %v7076_v23  ;;  %5191 = vmatpush1.bf16.msra.mxu1 %v7079_v25  ;;  %v7168_v23 = vld [vmem:[#allocation11 + $0x494] ss:$24 sps:$4 sm:$0xff]   ;;  %v7166_v25 = vld [vmem:[#allocation11 + $0x490] ss:$24 sps:$4 sm:$0xff]  }
 0x54f   : > { %5106 = vmatprep.subr.bf16.mxu0 %v7084_v29  ;;  %5192 = vmatprep.subr.bf16.mxu1 %v7087_v31  ;;  %v7169_v29 = vld [vmem:[#allocation11 + $0x4c0] ss:$24 sps:$4 sm:$0xff]   ;;  %v7174_v31 = vld [vmem:[#allocation11 + $0x4f4] ss:$24 sps:$4 sm:$0xff]  }
 0x552   : > { %5107 = vmatpush1.bf16.msra.mxu0 %v7082_v34  ;;  %5193 = vmatpush1.bf16.msra.mxu1 %v7085_v35  ;;  %v7172_v34 = vld [vmem:[#allocation11 + $0x4f0] ss:$24 sps:$4 sm:$0xff]   ;;  %v7177_v35 = vld [vmem:[#allocation11 + $0x524] ss:$24 sps:$4 sm:$0xff]  }
 0x553   : > { %5108 = vmatprep.subr.bf16.mxu0 %v7090_v1  ;;  %5194 = vmatprep.subr.bf16.mxu1 %v7093_v37  ;;  %v7180_v1 = vld [vmem:[#allocation11 + $0x554] ss:$24 sps:$4 sm:$0xff]   ;;  %v7178_v37 = vld [vmem:[#allocation11 + $0x550] ss:$24 sps:$4 sm:$0xff]  }
 0x556   : > { %5109 = vmatpush1.bf16.msra.mxu0 %v7088_v38  ;;  %5195 = vmatpush1.bf16.msra.mxu1 %v7091_v39  ;;  %v7183_v38 = vld [vmem:[#allocation11 + $0x584] ss:$24 sps:$4 sm:$0xff]   ;;  %v7181_v39 = vld [vmem:[#allocation11 + $0x580] ss:$24 sps:$4 sm:$0xff]  }
 0x557   : > { %5207 = vmatprep.subr.bf16.mxu0 %v7096_v43  ;;  %v7184_v43 = vld [vmem:[#allocation11 + $0x5b0] ss:$24 sps:$4 sm:$0xff]  }
 0x559   : > { %5111 = vmatmul.mubr.bf16.vlgmr.msra.gmra.mrb[16].mxu0 %v7910_v45  ;;  %5197 = vmatmul.mubr.bf16.vlgmr.msra.gmra.mrb[20].mxu1 %v7910_v45 }
 0x55a   : > { %5208 = vmatpush1.bf16.msra.mxu0 %v7094_v44  ;;  %5239 = vmatprep.mubr.bf16.mxu0 %v7889_v24  ;;  %v7112_v24 = vld [vmem:[#allocation11 + $0x130] ss:$24 sps:$4 sm:$0xff]   ;;  %v7189_v44 = vld [vmem:[#allocation11 + $0x5e4] ss:$24 sps:$4 sm:$0xff]  }
 0x55b   : > { %5209 = vmatprep.subr.bf16.mxu0 %v7099_v46  ;;  %v7187_v46 = vld [vmem:[#allocation11 + $0x5e0] ss:$24 sps:$4 sm:$0xff]  }
 0x55e   : > { %5210 = vmatpush1.bf16.msra.mxu0 %v7097_v6  ;;  %v4055_v6 = vsub.s32 2, %v7787_v41 }
 0x55f   : > { %5211 = vmatprep.subr.bf16.mxu0 %v7102_v10  ;;  %v4043_v10 = vld [vmem:[%s8014_s15] sm:$0x3f] }
 0x562   : > { %5212 = vmatpush1.bf16.msra.mxu0 %v7100_v12  ;;  %v4051_v12 = vsub.s32 1, %v7787_v41 }
 0x563   : > { %5213 = vmatprep.subr.bf16.mxu0 %v7105_v47  ;;  %v4059_v47 = vsub.s32 3, %v7787_v41 }
 0x566   : > { %5214 = vmatpush1.bf16.msra.mxu0 %v7103_v48  ;;  %v4048_v48 = vrot.slane %v4043_v10, %v7795_v49 }
 0x567   : > { %5215 = vmatprep.subr.bf16.mxu0 %v7108_v0  ;;  %v4056_v0 = vrot.slane %v4043_v10, %v4055_v6 }
 0x56a   : > { %5216 = vmatpush1.bf16.msra.mxu0 %v7106_v50  ;;  %v4052_v50 = vrot.slane %v4043_v10, %v4051_v12 }
 0x56b   : > { %5217 = vmatprep.subr.bf16.mxu0 %v7111_v51  ;;  %v4060_v51 = vrot.slane %v4043_v10, %v4059_v47 }
 0x56e   : > { %5218 = vmatpush1.bf16.msra.mxu0 %v7109_v52 }
 0x56f   : > { %5219 = vmatprep.subr.bf16.mxu0 %v7114_v19 }
 0x572   : > { %5220 = vmatpush1.bf16.msra.mxu0 %v7112_v24 }
 0x573   : > { %5221 = vmatprep.subr.bf16.mxu0 %v7117_v53 }
 0x576   : > { %5222 = vmatpush1.bf16.msra.mxu0 %v7115_v54 }
 0x577   : > { %5223 = vmatprep.subr.bf16.mxu0 %v7120_v55 }
 0x57a   : > { %5224 = vmatpush1.bf16.msra.mxu0 %v7118_v56 }
 0x57b   : > { %5225 = vmatprep.subr.bf16.mxu0 %v7123_v57 }
 0x57e   : > { %5226 = vmatpush1.bf16.msra.mxu0 %v7121_v58 }
 0x57f   : > { %5227 = vmatprep.subr.bf16.mxu0 %v7126_v59 }
 0x582   : > { %5228 = vmatpush1.bf16.msra.mxu0 %v7124_v60 }
 0x583   : > { %5229 = vmatprep.subr.bf16.mxu0 %v7129_v61 }
 0x586   : > { %5230 = vmatpush1.bf16.msra.mxu0 %v7127_v62 }
 0x587   : > { %5231 = vmatprep.subr.bf16.mxu0 %v7132_v63 }
 0x58a   : > { %5232 = vmatpush1.bf16.msra.mxu0 %v7130_v15 }
 0x58b   : > { %5233 = vmatprep.subr.bf16.mxu0 %v7135_v30 }
 0x58e   : > { %5234 = vmatpush1.bf16.msra.mxu0 %v7133_v33 }
 0x58f   : > { %5235 = vmatprep.subr.bf16.mxu0 %v7138_v2 }
 0x592   : > { %5236 = vmatpush1.bf16.msra.mxu0 %v7136_v11  ;;  %v4063_v11 = vsub.s32 4, %v7787_v41 }
 0x593   : > { %5237 = vmatprep.subr.bf16.mxu0 %v7141_v3  ;;  %v4067_v3 = vsub.s32 5, %v7787_v41 }
 0x596   : > { %5238 = vmatpush1.bf16.msra.mxu0 %v7139_v4  ;;  %v4064_v4 = vrot.slane %v4043_v10, %v4063_v11 }
 0x597   : > { %5250 = vmatprep.subr.bf16.mxu0 %v7144_v5  ;;  %v4068_v5 = vrot.slane %v4043_v10, %v4067_v3 }
 0x599   : > { %5240 = vmatmul.mubr.bf16.vlgmr.msra.gmra.mrb[20].mxu0 %v7892_v28  ;;  %v7157_v28 = vld [vmem:[#allocation11 + $0x400] ss:$24 sps:$4 sm:$0xff]  }
 0x59a   : > { %5251 = vmatpush1.bf16.msra.mxu0 %v7142_v7  ;;  %5282 = vmatprep.mubr.bf16.mxu0 %v7899_v32  ;;  %v7160_v32 = vld [vmem:[#allocation11 + $0x430] ss:$24 sps:$4 sm:$0xff]  }
 0x59b   : > { %5252 = vmatprep.subr.bf16.mxu0 %v7147_v8 }
 0x59e   : > { %5253 = vmatpush1.bf16.msra.mxu0 %v7145_v9 }
 0x59f   : > { %5254 = vmatprep.subr.bf16.mxu0 %v7150_v26 }
 0x5a2   : > { %5255 = vmatpush1.bf16.msra.mxu0 %v7148_v27 }
 0x5a3   : > { %5256 = vmatprep.subr.bf16.mxu0 %v7153_v42 }
 0x5a6   : > { %5257 = vmatpush1.bf16.msra.mxu0 %v7151_v13 }
 0x5a7   : > { %5258 = vmatprep.subr.bf16.mxu0 %v7156_v16 }
 0x5aa   : > { %5259 = vmatpush1.bf16.msra.mxu0 %v7154_v17 }
 0x5ab   : > { %5260 = vmatprep.subr.bf16.mxu0 %v7159_v18 }
 0x5ae   : > { %5261 = vmatpush1.bf16.msra.mxu0 %v7157_v28 }
 0x5af   : > { %5262 = vmatprep.subr.bf16.mxu0 %v7162_v20 }
 0x5b2   : > { %5263 = vmatpush1.bf16.msra.mxu0 %v7160_v32 }
 0x5b3   : > { %5264 = vmatprep.subr.bf16.mxu0 %v7165_v21 }
 0x5b6   : > { %5265 = vmatpush1.bf16.msra.mxu0 %v7163_v22 }
 0x5b7   : > { %5266 = vmatprep.subr.bf16.mxu0 %v7168_v23 }
 0x5ba   : > { %5267 = vmatpush1.bf16.msra.mxu0 %v7166_v25 }
 0x5bb   : > { %5268 = vmatprep.subr.bf16.mxu0 %v7171_v14 }
 0x5be   : > { %5269 = vmatpush1.bf16.msra.mxu0 %v7169_v29 }
 0x5bf   : > { %5270 = vmatprep.subr.bf16.mxu0 %v7174_v31 }
 0x5c2   : > { %5271 = vmatpush1.bf16.msra.mxu0 %v7172_v34 }
 0x5c3   : > { %5272 = vmatprep.subr.bf16.mxu0 %v7177_v35 }
 0x5c6   : > { %5273 = vmatpush1.bf16.msra.mxu0 %v7175_v36 }
 0x5c7   : > { %5274 = vmatprep.subr.bf16.mxu0 %v7180_v1 }
 0x5ca   : > { %5275 = vmatpush1.bf16.msra.mxu0 %v7178_v37 }
 0x5cb   : > { %5276 = vmatprep.subr.bf16.mxu0 %v7183_v38 }
 0x5ce   : > { %5277 = vmatpush1.bf16.msra.mxu0 %v7181_v39 }
 0x5cf   : > { %5278 = vmatprep.subr.bf16.mxu0 %v7186_v40 }
 0x5d2   : > { %5279 = vmatpush1.bf16.msra.mxu0 %v7184_v43 }
 0x5d3   : > { %5280 = vmatprep.subr.bf16.mxu0 %v7189_v44 }
 0x5d6   : > { %5281 = vmatpush1.bf16.msra.mxu0 %v7187_v46 }
 0x5d9   : > { %5283 = vmatmul.mubr.bf16.vlgmr.msra.gmra.mrb[20].mxu0 %v7910_v45 }
 0x62c   : > { %v5112_v52 = vpop.f32.mrb[16].mxu0  ;;  %v5198_v19 = vpop.f32.mrb[20].mxu1 }
 0x62d   : > { %v6124_v24 = vadd.f32 %v5112_v52, %v4048_v48  ;;  %v6128_v45 = vadd.f32 %v5198_v19, %v4056_v0  ;;  %v5114_v53 = vpop.f32.mrb[17].mxu0  ;;  %v5200_v54 = vpop.f32.mrb[21].mxu1 }
 0x62e   : > { %v6125_v55 = vadd.f32 %v5114_v53, %v4052_v50  ;;  %v6129_v56 = vadd.f32 %v5200_v54, %v4060_v51  ;;  %v5116_v57 = vpop.f32.mrb[18].mxu0  ;;  %v5202_v58 = vpop.f32.mrb[22].mxu1 }
 0x62f   : > { %v6126_v59 = vadd.f32 %v5116_v57, %v4048_v48  ;;  %v6130_v60 = vadd.f32 %v5202_v58, %v4056_v0  ;;  %v5118_v61 = vpop.f32.mrb[19].mxu0  ;;  %v5204_v62 = vpop.f32.mrb[23].mxu1 }
 0x630   : > { %v6114_v63 = vpack.c.bf16 %v6125_v55, %v6124_v24  ;;  %v6115_v49 = vpack.c.bf16 %v6129_v56, %v6128_v45  ;;  %v6127_v15 = vadd.f32 %v5118_v61, %v4052_v50  ;;  %v6131_v30 = vadd.f32 %v5204_v62, %v4060_v51 }
 0x632   : > { %5329 = vst [vmem:[%s477_s24] sm:$0xff] %v6114_v63  ;;  %5330 = vst [vmem:[%s477_s24 + $0x8] sm:$0xff] %v6115_v49  ;;  %v6117_v33 = vpack.c.bf16 %v6127_v15, %v6126_v59  ;;  %v6118_v2 = vpack.c.bf16 %v6131_v30, %v6130_v60 }
 0x634   : > { %5332 = vst [vmem:[%s477_s24 + $0x18] sm:$0xff] %v6117_v33  ;;  %5333 = vst [vmem:[%s477_s24 + $0x20] sm:$0xff] %v6118_v2 }
 0x6ac   : > { %v5284_v7 = vpop.f32.mrb[20].mxu0 }
 0x6ad   : > { %v6132_v8 = vadd.f32 %v5284_v7, %v4064_v4  ;;  %v5286_v9 = vpop.f32.mrb[21].mxu0 }
 0x6ae   : > { %v6133_v26 = vadd.f32 %v5286_v9, %v4068_v5  ;;  %v5288_v27 = vpop.f32.mrb[22].mxu0 }
 0x6af   : > { %v6134_v42 = vadd.f32 %v5288_v27, %v4064_v4  ;;  %v5290_v13 = vpop.f32.mrb[23].mxu0 }
 0x6b0   : > { %v6116_v16 = vpack.c.bf16 %v6133_v26, %v6132_v8  ;;  %v6135_v41 = vadd.f32 %v5290_v13, %v4068_v5 }
 0x6b2   : > { %5331 = vst [vmem:[%s477_s24 + $0x10] sm:$0xff] %v6116_v16  ;;  %v6119_v17 = vpack.c.bf16 %v6135_v41, %v6134_v42 }
 0x6b4   : > { %5334 = vst [vmem:[%s477_s24 + $0x28] sm:$0xff] %v6119_v17 }
 0x6b5   : > { %7373 = shalt.err (!%p7370_p7)
}
 0x6b6   : > { %s7374_s15 = scalar_lea.hbm %s7934_s10, 768  ;;  %s7378_s30 = scalar_lea.hbm %s8015_s29, 5376 }
 0x6b7   : > { %p7375_p5 = scmp.ne.s32.totalorder %s7934_s10, %s7374_s15  ;;  %p7379_p3 = scmp.lt.u32.totalorder %s7934_s10, %s8015_s29 }
 0x6b8   : > { %p7380_p4 = scmp.lt.u32.totalorder %s7378_s30, %s7374_s15  ;;  %p7382_p6 = scmp.lt.u32.totalorder %s7374_s15, %s7934_s10 }
 0x6b9   : > { %p7376_p10 = pnand %p7375_p5, %p8016_p9 }
 0x6ba   : > { %p7381_p8 = por %p7380_p4, %p7379_p3 }
 0x6bb   : > { %p7377_p11 = pneg %p7376_p10 }
 0x6bc   : > { %p7383_p12 = por %p7382_p6, %p7381_p8 }
 0x6be   : > { %p7384_p1 = pnand %p7383_p12, %p7377_p11 }
 0x6c0   : > { %7387 = shalt.err (!%p7384_p1)
}
 0x6c1   : > { %s7455_s25 = smov 384   ;;  %s7456_s8 = smov 24  }
 0x6c2   : > { %6192 = dma.vmem_to_hbm [thread:$0]  (%p8016_p9), %s7929_s27, 768, %s7934_s10, %s5336_s23, %s7455_s25, %s7455_s25, %s7456_s8  }
 0x6c3 PF: > { %p6229_p13 = scmp.ge.s32.totalorder %s7438_s20, 2  ;;  %s5365_s28 = sand.u32 1, %s7426_s17  }
 0x6c4   : > { %p8017_p0 = scmp.ne.s32.totalorder %s8004_s21, 0  ;;  %s5366_s22 = scalar_lea.sflag [#allocation4], %s5365_s28 }
 0x6c6   : > { %p6215_p2 = pnand %p6229_p13, %p8017_p0 }
 0x6c8   : > { %7421 = dma.done.wait (!%p6215_p2), %s5366_s22, 768  }
 0x6c9   : > { %7423 = vsyncadd (!%p6215_p2), %s5366_s22, 4294966528  ;;  %p27_p7 = scmp.ge.s32.totalorder %s7686_s1, 9   ;;  %s8018_s17 = smov %s7430_s18 }
 0x6ca   : > { %s8019_s18 = smov %s7434_s19  ;;  %s8020_s19 = smov %s7698_s13 }
 0x6cb   : > { %s8021_s20 = smov %s7686_s1  ;;  %29 = sbr.rel (!%p27_p7) target bundleno = 13 (0xd), region = 129 }
 0x6d2   :  { %5371 = vsyncpa [#allocation3], 1 }
 0x6d3   :  { %5373 = vsyncpa [#allocation3 + $0x1], 1 }
 0x6d4   :  { %5374 = vsyncpa [#allocation6], 1 }
 0x6d5   :  { %5375 = vsyncpa [#allocation9], 1 }
 0x6d6   :  { %5376 = vsyncpa [#allocation12], 1 }
 0x6d7   :  { %5377 = vsyncpa [#allocation4], 1 }
 0x6d8   :  { %5379 = vsyncpa [#allocation4 + $0x1], 1 }

</bundles_post_ra>
